<compile_context>
chip_gen: v7x
topology: tpu7x:2x2x1
jax: 0.10.0
libtpu: 0.0.40
codegen_flags: <defaults>
</compile_context>

<pallas_src>
import jax
import jax.numpy as jnp
from jax import lax
from jax.experimental import pallas as pl
from jax.experimental.pallas import tpu as pltpu


def _upsample_conv_kernel(x_lo_ref, x_hi_ref, w_ref, b_ref, o_ref):
    """One (sample, T-tile) step of fused nearest-x2 upsample + Conv3d(3, pad=1).

    x_lo_ref: (tT, H+2, W+2, C)   padded input planes [i*tT, (i+1)*tT)
    x_hi_ref: (tT, H+2, W+2, C)   padded input planes [(i+1)*tT, (i+2)*tT)
                                  (only its first 2 planes -- the halo -- are used)
    w_ref:    (27*C, 8*C)         phase-folded weights (see wrapper)
    b_ref:    (1, 8*C)            bias replicated per phase (f32)
    o_ref:    (tT, 2, H, 2, W, 2*C)  == (2*tT, 2H, 2W, C) output tile (NDHWC)
    """
    tT, Hp, Wp, C = x_lo_ref.shape
    H, W = Hp - 2, Wp - 2
    M = tT * H * W
    mxu_dtype = w_ref.dtype

    # (tT+2, H+2, W+2, C) slab = this block's planes + 2 halo planes from the
    # next block (both delivered by the auto-pipeline, no manual DMA needed).
    slab = jnp.concatenate([x_lo_ref[...], x_hi_ref[0:2]], axis=0)

    # im2col: one (M, 27*C) slab; channels stay on the lane dim throughout.
    cols = []
    for dt in range(3):
        for dh in range(3):
            for dw in range(3):
                win = slab[dt:dt + tT, dh:dh + H, dw:dw + W, :]
                cols.append(win.astype(mxu_dtype).reshape(M, C))
    patch = jnp.concatenate(cols, axis=1)                         # (M, 27*C)

    # Single MXU matmul: K = 27*C contraction, N = 8*C (all 8 phases at once).
    r = jnp.dot(patch, w_ref[...], preferred_element_type=jnp.float32)
    r = r + b_ref[...]                                            # f32 bias add

    # Scatter the 8 phases into the interleaved output tile with static-index
    # stores (stays in VMEM; the HBM writeback of the block is one dense DMA).
    for pt in range(2):
        for ph in range(2):
            for pw in range(2):
                pidx = (pt * 2 + ph) * 2 + pw
                blk = r[:, pidx * C:(pidx + 1) * C].reshape(tT, H, W, C)
                o_ref[:, pt, :, ph, :, pw * C:(pw + 1) * C] = blk.astype(o_ref.dtype)


def _phase_folded_weights(weight, mxu_dtype):
    """torch Conv3d weight (Cout, Cin, 3, 3, 3) -> (27*Cin, 8*Cout) matrix W such
    that, with P the (M, 27*Cin) im2col slab of the *original* (zero-padded)
    input, P @ W equals the conv over the nearest-x2-upsampled input for all 8
    sub-pixel phases simultaneously."""
    C_out, C_in = weight.shape[0], weight.shape[1]
    # Per-dim sub-pixel folding: G[p, d, k] = coefficient of original tap k on
    # the input sample at slab offset d (0..2) for output phase p (0 or 1).
    #   p=0: out = w0*x[-1] + (w1+w2)*x[0]
    #   p=1: out = (w0+w1)*x[0] + w2*x[+1]
    G = jnp.array([[[1., 0., 0.],
                    [0., 1., 1.],
                    [0., 0., 0.]],
                   [[0., 0., 0.],
                    [1., 1., 0.],
                    [0., 0., 1.]]], dtype=jnp.float32)
    w = weight.astype(jnp.float32)
    # (pt, ph, pw, dt, dh, dw, cin, cout)
    w_phase = jnp.einsum('pak,qbl,rcm,oiklm->pqrabcio', G, G, G, w)
    w_mat = jnp.transpose(w_phase, (3, 4, 5, 6, 0, 1, 2, 7))
    w_mat = w_mat.reshape(27 * C_in, 8 * C_out)
    return w_mat.astype(mxu_dtype)


def upsample_forward(x_ncdhw, weight, bias, time_emb=None, y=None, *,
                     t_tile=2, mxu_dtype=jnp.float32):
    """x_ncdhw: (N, C, T, H, W).  weight: (C, C, 3, 3, 3) (torch OIDHW layout).
    bias: (C,).  Returns (N, C, 2T, 2H, 2W).  time_emb / y are ignored."""
    del time_emb, y
    N, C, T, H, W = x_ncdhw.shape
    if t_tile < 2 or (T % t_tile) != 0:
        t_tile = T
    # TODO(synk): support T == 1 (current halo scheme needs at least 2 planes).
    assert T >= 2 and t_tile >= 2 and T % t_tile == 0
    Hp, Wp = H + 2, W + 2

    # Channels-last + zero halo on T/H/W (input-resolution, i.e. 1/8 of the
    # output -- cheap glue).  T back-pad is t_tile-1 so the "hi" halo block
    # never runs out of bounds; only plane T+1 of it is ever used.
    xl = jnp.transpose(x_ncdhw, (0, 2, 3, 4, 1))                  # (N,T,H,W,C)
    xl = jnp.pad(xl, ((0, 0), (1, t_tile - 1), (1, 1), (1, 1), (0, 0)))
    # TODO(synk): fold this transpose+pad and the output NDHWC->NCDHW transpose
    # below into the kernel (channel-major store path); for small C they are
    # the remaining extra HBM passes.

    w_mat = _phase_folded_weights(weight, mxu_dtype)              # (27C, 8C)
    b8 = jnp.tile(bias.astype(jnp.float32), 8).reshape(1, 8 * C)

    grid = (N, T // t_tile)
    out_shape = jax.ShapeDtypeStruct((N, T, 2, H, 2, W, 2 * C), x_ncdhw.dtype)

    flops = 2 * N * T * H * W * (27 * C) * (8 * C)
    bytes_accessed = int(2 * xl.size * xl.dtype.itemsize
                         + N * T * H * W * 8 * C * x_ncdhw.dtype.itemsize
                         + w_mat.size * w_mat.dtype.itemsize)

    out = pl.pallas_call(
        _upsample_conv_kernel,
        out_shape=out_shape,
        grid=grid,
        in_specs=[
            # current T block, and the next one (supplies the 2-plane halo)
            pl.BlockSpec((None, t_tile, Hp, Wp, C), lambda n, i: (n, i, 0, 0, 0)),
            pl.BlockSpec((None, t_tile, Hp, Wp, C), lambda n, i: (n, i + 1, 0, 0, 0)),
            pl.BlockSpec((27 * C, 8 * C), lambda n, i: (0, 0)),
            pl.BlockSpec((1, 8 * C), lambda n, i: (0, 0)),
        ],
        out_specs=pl.BlockSpec((None, t_tile, 2, H, 2, W, 2 * C),
                               lambda n, i: (n, i, 0, 0, 0, 0, 0)),
        compiler_params=pltpu.CompilerParams(
            dimension_semantics=("parallel", "parallel"),
            vmem_limit_bytes=48 * 1024 * 1024),
        cost_estimate=pl.CostEstimate(flops=flops, transcendentals=0,
                                      bytes_accessed=bytes_accessed),
    )(xl, xl, w_mat, b8)

    # (N, T, 2, H, 2, W, 2C) -> (N, 2T, 2H, 2W, C) is a free row-major reshape.
    out = out.reshape(N, 2 * T, 2 * H, 2 * W, C)
    return jnp.transpose(out, (0, 4, 1, 2, 3))                    # NCDHW


def _reference(x_ncdhw, weight, bias):
    # Pure-JAX reference: nearest x2 upsample + Conv3d(3, padding=1) in NCDHW.
    x_up = jnp.repeat(x_ncdhw, 2, axis=2)
    x_up = jnp.repeat(x_up, 2, axis=3)
    x_up = jnp.repeat(x_up, 2, axis=4)
    out = lax.conv_general_dilated(
        x_up, weight,
        window_strides=(1, 1, 1),
        padding=((1, 1), (1, 1), (1, 1)),
        dimension_numbers=("NCDHW", "OIDHW", "NCDHW"))
    return out + bias[None, :, None, None, None]


if __name__ == "__main__":
    # Small shapes consistent with the module: video tensor (N, C, T, H, W).
    N, C, T, H, W = 2, 8, 4, 8, 8

    key = jax.random.PRNGKey(0)
    kx, kw, kb = jax.random.split(key, 3)

    x = jax.random.normal(kx, (N, C, T, H, W), dtype=jnp.float32)
    weight = 0.1 * jax.random.normal(kw, (C, C, 3, 3, 3), dtype=jnp.float32)
    bias = 0.1 * jax.random.normal(kb, (C,), dtype=jnp.float32)

    ref = jax.block_until_ready(_reference(x, weight, bias))

    # f32 MXU path (tight check).
    out32 = jax.block_until_ready(upsample_forward(x, weight, bias))
    assert out32.shape == (N, C, 2 * T, 2 * H, 2 * W), out32.shape
    assert jnp.allclose(out32, ref, atol=5e-3, rtol=5e-3), (
        float(jnp.max(jnp.abs(out32 - ref))))

    # bf16 MXU operands, f32 accumulation (looser check).
    out16 = jax.block_until_ready(
        upsample_forward(x, weight, bias, mxu_dtype=jnp.bfloat16))
    assert out16.shape == (N, C, 2 * T, 2 * H, 2 * W), out16.shape
    assert jnp.allclose(out16, ref, atol=1.5e-1, rtol=1e-1), (
        float(jnp.max(jnp.abs(out16 - ref))))

    print("KERNEL_OK")
</pallas_src>

<mosaic_0001>
module attributes {stable_mosaic.version = 11 : i64} {
  func.func @_upsample_conv_kernel(%arg0: i32, %arg1: i32, %arg2: memref<1x2x10x10x8xf32, #tpu.memory_space<vmem>>, %arg3: memref<1x2x10x10x8xf32, #tpu.memory_space<vmem>>, %arg4: memref<216x64xf32, #tpu.memory_space<vmem>>, %arg5: memref<1x64xf32, #tpu.memory_space<vmem>>, %arg6: memref<1x2x2x8x2x8x16xf32, #tpu.memory_space<vmem>>) attributes {dimension_semantics = [#tpu.dimension_semantics<parallel>, #tpu.dimension_semantics<parallel>], iteration_bounds = array<i64: 2, 2>, scalar_prefetch = 0 : i64, scratch_operands = 0 : i64, tpu.core_type = #tpu.core_type<tc>, window_params = [{transform_indices = @transform_0, window_bounds = array<i64: 1, 2, 10, 10, 8>}, {transform_indices = @transform_1, window_bounds = array<i64: 1, 2, 10, 10, 8>}, {pipeline_mode = #tpu.pipeline_mode<synchronous>, transform_indices = @transform_2, window_bounds = array<i64: 216, 64>}, {pipeline_mode = #tpu.pipeline_mode<synchronous>, transform_indices = @transform_3, window_bounds = array<i64: 1, 64>}, {transform_indices = @transform_4, window_bounds = array<i64: 1, 2, 2, 8, 2, 8, 16>}]} {
    %c0 = arith.constant 0 : index
    %c0_0 = arith.constant 0 : index
    %c0_1 = arith.constant 0 : index
    %c0_2 = arith.constant 0 : index
    %c0_3 = arith.constant 0 : index
    %0 = vector.load %arg2[%c0, %c0_0, %c0_1, %c0_2, %c0_3] : memref<1x2x10x10x8xf32, #tpu.memory_space<vmem>>, vector<1x2x10x10x8xf32>
    %1 = vector.shape_cast %0 : vector<1x2x10x10x8xf32> to vector<2x10x10x8xf32>
    %c0_4 = arith.constant 0 : index
    %c0_5 = arith.constant 0 : index
    %c0_6 = arith.constant 0 : index
    %c0_7 = arith.constant 0 : index
    %c0_8 = arith.constant 0 : index
    %2 = vector.load %arg3[%c0_4, %c0_5, %c0_6, %c0_7, %c0_8] : memref<1x2x10x10x8xf32, #tpu.memory_space<vmem>>, vector<1x2x10x10x8xf32>
    %3 = vector.shape_cast %2 : vector<1x2x10x10x8xf32> to vector<2x10x10x8xf32>
    %4 = tpu.concatenate %1, %3 in 0 : vector<2x10x10x8xf32>, vector<2x10x10x8xf32> -> vector<4x10x10x8xf32>
    %5 = vector.extract_strided_slice %4 {offsets = [0, 0, 0, 0], sizes = [2, 8, 8, 8], strides = [1, 1, 1, 1]} : vector<4x10x10x8xf32> to vector<2x8x8x8xf32>
    %6 = vector.shape_cast %5 : vector<2x8x8x8xf32> to vector<128x8xf32>
    %7 = vector.extract_strided_slice %4 {offsets = [0, 0, 1, 0], sizes = [2, 8, 8, 8], strides = [1, 1, 1, 1]} : vector<4x10x10x8xf32> to vector<2x8x8x8xf32>
    %8 = vector.shape_cast %7 : vector<2x8x8x8xf32> to vector<128x8xf32>
    %9 = vector.extract_strided_slice %4 {offsets = [0, 0, 2, 0], sizes = [2, 8, 8, 8], strides = [1, 1, 1, 1]} : vector<4x10x10x8xf32> to vector<2x8x8x8xf32>
    %10 = vector.shape_cast %9 : vector<2x8x8x8xf32> to vector<128x8xf32>
    %11 = vector.extract_strided_slice %4 {offsets = [0, 1, 0, 0], sizes = [2, 8, 8, 8], strides = [1, 1, 1, 1]} : vector<4x10x10x8xf32> to vector<2x8x8x8xf32>
    %12 = vector.shape_cast %11 : vector<2x8x8x8xf32> to vector<128x8xf32>
    %13 = vector.extract_strided_slice %4 {offsets = [0, 1, 1, 0], sizes = [2, 8, 8, 8], strides = [1, 1, 1, 1]} : vector<4x10x10x8xf32> to vector<2x8x8x8xf32>
    %14 = vector.shape_cast %13 : vector<2x8x8x8xf32> to vector<128x8xf32>
    %15 = vector.extract_strided_slice %4 {offsets = [0, 1, 2, 0], sizes = [2, 8, 8, 8], strides = [1, 1, 1, 1]} : vector<4x10x10x8xf32> to vector<2x8x8x8xf32>
    %16 = vector.shape_cast %15 : vector<2x8x8x8xf32> to vector<128x8xf32>
    %17 = vector.extract_strided_slice %4 {offsets = [0, 2, 0, 0], sizes = [2, 8, 8, 8], strides = [1, 1, 1, 1]} : vector<4x10x10x8xf32> to vector<2x8x8x8xf32>
    %18 = vector.shape_cast %17 : vector<2x8x8x8xf32> to vector<128x8xf32>
    %19 = vector.extract_strided_slice %4 {offsets = [0, 2, 1, 0], sizes = [2, 8, 8, 8], strides = [1, 1, 1, 1]} : vector<4x10x10x8xf32> to vector<2x8x8x8xf32>
    %20 = vector.shape_cast %19 : vector<2x8x8x8xf32> to vector<128x8xf32>
    %21 = vector.extract_strided_slice %4 {offsets = [0, 2, 2, 0], sizes = [2, 8, 8, 8], strides = [1, 1, 1, 1]} : vector<4x10x10x8xf32> to vector<2x8x8x8xf32>
    %22 = vector.shape_cast %21 : vector<2x8x8x8xf32> to vector<128x8xf32>
    %23 = vector.extract_strided_slice %4 {offsets = [1, 0, 0, 0], sizes = [2, 8, 8, 8], strides = [1, 1, 1, 1]} : vector<4x10x10x8xf32> to vector<2x8x8x8xf32>
    %24 = vector.shape_cast %23 : vector<2x8x8x8xf32> to vector<128x8xf32>
    %25 = vector.extract_strided_slice %4 {offsets = [1, 0, 1, 0], sizes = [2, 8, 8, 8], strides = [1, 1, 1, 1]} : vector<4x10x10x8xf32> to vector<2x8x8x8xf32>
    %26 = vector.shape_cast %25 : vector<2x8x8x8xf32> to vector<128x8xf32>
    %27 = vector.extract_strided_slice %4 {offsets = [1, 0, 2, 0], sizes = [2, 8, 8, 8], strides = [1, 1, 1, 1]} : vector<4x10x10x8xf32> to vector<2x8x8x8xf32>
    %28 = vector.shape_cast %27 : vector<2x8x8x8xf32> to vector<128x8xf32>
    %29 = vector.extract_strided_slice %4 {offsets = [1, 1, 0, 0], sizes = [2, 8, 8, 8], strides = [1, 1, 1, 1]} : vector<4x10x10x8xf32> to vector<2x8x8x8xf32>
    %30 = vector.shape_cast %29 : vector<2x8x8x8xf32> to vector<128x8xf32>
    %31 = vector.extract_strided_slice %4 {offsets = [1, 1, 1, 0], sizes = [2, 8, 8, 8], strides = [1, 1, 1, 1]} : vector<4x10x10x8xf32> to vector<2x8x8x8xf32>
    %32 = vector.shape_cast %31 : vector<2x8x8x8xf32> to vector<128x8xf32>
    %33 = vector.extract_strided_slice %4 {offsets = [1, 1, 2, 0], sizes = [2, 8, 8, 8], strides = [1, 1, 1, 1]} : vector<4x10x10x8xf32> to vector<2x8x8x8xf32>
    %34 = vector.shape_cast %33 : vector<2x8x8x8xf32> to vector<128x8xf32>
    %35 = vector.extract_strided_slice %4 {offsets = [1, 2, 0, 0], sizes = [2, 8, 8, 8], strides = [1, 1, 1, 1]} : vector<4x10x10x8xf32> to vector<2x8x8x8xf32>
    %36 = vector.shape_cast %35 : vector<2x8x8x8xf32> to vector<128x8xf32>
    %37 = vector.extract_strided_slice %4 {offsets = [1, 2, 1, 0], sizes = [2, 8, 8, 8], strides = [1, 1, 1, 1]} : vector<4x10x10x8xf32> to vector<2x8x8x8xf32>
    %38 = vector.shape_cast %37 : vector<2x8x8x8xf32> to vector<128x8xf32>
    %39 = vector.extract_strided_slice %4 {offsets = [1, 2, 2, 0], sizes = [2, 8, 8, 8], strides = [1, 1, 1, 1]} : vector<4x10x10x8xf32> to vector<2x8x8x8xf32>
    %40 = vector.shape_cast %39 : vector<2x8x8x8xf32> to vector<128x8xf32>
    %41 = vector.extract_strided_slice %4 {offsets = [2, 0, 0, 0], sizes = [2, 8, 8, 8], strides = [1, 1, 1, 1]} : vector<4x10x10x8xf32> to vector<2x8x8x8xf32>
    %42 = vector.shape_cast %41 : vector<2x8x8x8xf32> to vector<128x8xf32>
    %43 = vector.extract_strided_slice %4 {offsets = [2, 0, 1, 0], sizes = [2, 8, 8, 8], strides = [1, 1, 1, 1]} : vector<4x10x10x8xf32> to vector<2x8x8x8xf32>
    %44 = vector.shape_cast %43 : vector<2x8x8x8xf32> to vector<128x8xf32>
    %45 = vector.extract_strided_slice %4 {offsets = [2, 0, 2, 0], sizes = [2, 8, 8, 8], strides = [1, 1, 1, 1]} : vector<4x10x10x8xf32> to vector<2x8x8x8xf32>
    %46 = vector.shape_cast %45 : vector<2x8x8x8xf32> to vector<128x8xf32>
    %47 = vector.extract_strided_slice %4 {offsets = [2, 1, 0, 0], sizes = [2, 8, 8, 8], strides = [1, 1, 1, 1]} : vector<4x10x10x8xf32> to vector<2x8x8x8xf32>
    %48 = vector.shape_cast %47 : vector<2x8x8x8xf32> to vector<128x8xf32>
    %49 = vector.extract_strided_slice %4 {offsets = [2, 1, 1, 0], sizes = [2, 8, 8, 8], strides = [1, 1, 1, 1]} : vector<4x10x10x8xf32> to vector<2x8x8x8xf32>
    %50 = vector.shape_cast %49 : vector<2x8x8x8xf32> to vector<128x8xf32>
    %51 = vector.extract_strided_slice %4 {offsets = [2, 1, 2, 0], sizes = [2, 8, 8, 8], strides = [1, 1, 1, 1]} : vector<4x10x10x8xf32> to vector<2x8x8x8xf32>
    %52 = vector.shape_cast %51 : vector<2x8x8x8xf32> to vector<128x8xf32>
    %53 = vector.extract_strided_slice %4 {offsets = [2, 2, 0, 0], sizes = [2, 8, 8, 8], strides = [1, 1, 1, 1]} : vector<4x10x10x8xf32> to vector<2x8x8x8xf32>
    %54 = vector.shape_cast %53 : vector<2x8x8x8xf32> to vector<128x8xf32>
    %55 = vector.extract_strided_slice %4 {offsets = [2, 2, 1, 0], sizes = [2, 8, 8, 8], strides = [1, 1, 1, 1]} : vector<4x10x10x8xf32> to vector<2x8x8x8xf32>
    %56 = vector.shape_cast %55 : vector<2x8x8x8xf32> to vector<128x8xf32>
    %57 = vector.extract_strided_slice %4 {offsets = [2, 2, 2, 0], sizes = [2, 8, 8, 8], strides = [1, 1, 1, 1]} : vector<4x10x10x8xf32> to vector<2x8x8x8xf32>
    %58 = vector.shape_cast %57 : vector<2x8x8x8xf32> to vector<128x8xf32>
    %59 = tpu.concatenate %6, %8, %10, %12, %14, %16, %18, %20, %22, %24, %26, %28, %30, %32, %34, %36 in 1 : vector<128x8xf32>, vector<128x8xf32>, vector<128x8xf32>, vector<128x8xf32>, vector<128x8xf32>, vector<128x8xf32>, vector<128x8xf32>, vector<128x8xf32>, vector<128x8xf32>, vector<128x8xf32>, vector<128x8xf32>, vector<128x8xf32>, vector<128x8xf32>, vector<128x8xf32>, vector<128x8xf32>, vector<128x8xf32> -> vector<128x128xf32>
    %60 = tpu.concatenate %38, %40, %42, %44, %46, %48, %50, %52, %54, %56, %58 in 1 : vector<128x8xf32>, vector<128x8xf32>, vector<128x8xf32>, vector<128x8xf32>, vector<128x8xf32>, vector<128x8xf32>, vector<128x8xf32>, vector<128x8xf32>, vector<128x8xf32>, vector<128x8xf32>, vector<128x8xf32> -> vector<128x88xf32>
    %61 = tpu.concatenate %59, %60 in 1 : vector<128x128xf32>, vector<128x88xf32> -> vector<128x216xf32>
    %c0_9 = arith.constant 0 : index
    %c0_10 = arith.constant 0 : index
    %62 = vector.load %arg4[%c0_9, %c0_10] : memref<216x64xf32, #tpu.memory_space<vmem>>, vector<216x64xf32>
    %cst = arith.constant dense<0.000000e+00> : vector<128x64xf32>
    %63 = tpu.matmul %61, %62, %cst {dimension_numbers = #tpu.dot_dimension_numbers<[1], [0], [0], [1], [0, 0, 1, 1], [], []>} : vector<128x216xf32>, vector<216x64xf32>, vector<128x64xf32> -> vector<128x64xf32>
    %c0_11 = arith.constant 0 : index
    %c0_12 = arith.constant 0 : index
    %64 = vector.load %arg5[%c0_11, %c0_12] : memref<1x64xf32, #tpu.memory_space<vmem>>, vector<1x64xf32>
    %65 = vector.broadcast %64 : vector<1x64xf32> to vector<128x64xf32>
    %66 = arith.addf %63, %65 : vector<128x64xf32>
    %67 = vector.extract_strided_slice %66 {offsets = [0, 0], sizes = [128, 8], strides = [1, 1]} : vector<128x64xf32> to vector<128x8xf32>
    %68 = vector.shape_cast %67 : vector<128x8xf32> to vector<2x8x8x8xf32>
    %c0_13 = arith.constant 0 : index
    %c0_14 = arith.constant 0 : index
    %c0_15 = arith.constant 0 : index
    %c0_16 = arith.constant 0 : index
    %c0_17 = arith.constant 0 : index
    %c0_18 = arith.constant 0 : index
    %c0_19 = arith.constant 0 : index
    %69 = vector.load %arg6[%c0_13, %c0_14, %c0_15, %c0_16, %c0_17, %c0_18, %c0_19] : memref<1x2x2x8x2x8x16xf32, #tpu.memory_space<vmem>>, vector<1x2x1x8x1x8x8xf32>
    %70 = vector.shape_cast %69 : vector<1x2x1x8x1x8x8xf32> to vector<2x8x8x8xf32>
    %71 = vector.shape_cast %68 : vector<2x8x8x8xf32> to vector<1x2x1x8x1x8x8xf32>
    tpu.vector_store %arg6[%c0_13, %c0_14, %c0_15, %c0_16, %c0_17, %c0_18, %c0_19], %71 {strides = array<i32>} : memref<1x2x2x8x2x8x16xf32, #tpu.memory_space<vmem>>, vector<1x2x1x8x1x8x8xf32>,
    %72 = vector.extract_strided_slice %66 {offsets = [0, 8], sizes = [128, 8], strides = [1, 1]} : vector<128x64xf32> to vector<128x8xf32>
    %73 = vector.shape_cast %72 : vector<128x8xf32> to vector<2x8x8x8xf32>
    %c0_20 = arith.constant 0 : index
    %c0_21 = arith.constant 0 : index
    %c0_22 = arith.constant 0 : index
    %c0_23 = arith.constant 0 : index
    %c0_24 = arith.constant 0 : index
    %c0_25 = arith.constant 0 : index
    %c8 = arith.constant 8 : index
    %74 = vector.load %arg6[%c0_20, %c0_21, %c0_22, %c0_23, %c0_24, %c0_25, %c8] : memref<1x2x2x8x2x8x16xf32, #tpu.memory_space<vmem>>, vector<1x2x1x8x1x8x8xf32>
    %75 = vector.shape_cast %74 : vector<1x2x1x8x1x8x8xf32> to vector<2x8x8x8xf32>
    %76 = vector.shape_cast %73 : vector<2x8x8x8xf32> to vector<1x2x1x8x1x8x8xf32>
    tpu.vector_store %arg6[%c0_20, %c0_21, %c0_22, %c0_23, %c0_24, %c0_25, %c8], %76 {strides = array<i32>} : memref<1x2x2x8x2x8x16xf32, #tpu.memory_space<vmem>>, vector<1x2x1x8x1x8x8xf32>,
    %77 = vector.extract_strided_slice %66 {offsets = [0, 16], sizes = [128, 8], strides = [1, 1]} : vector<128x64xf32> to vector<128x8xf32>
    %78 = vector.shape_cast %77 : vector<128x8xf32> to vector<2x8x8x8xf32>
    %c0_26 = arith.constant 0 : index
    %c0_27 = arith.constant 0 : index
    %c0_28 = arith.constant 0 : index
    %c0_29 = arith.constant 0 : index
    %c1 = arith.constant 1 : index
    %c0_30 = arith.constant 0 : index
    %c0_31 = arith.constant 0 : index
    %79 = vector.load %arg6[%c0_26, %c0_27, %c0_28, %c0_29, %c1, %c0_30, %c0_31] : memref<1x2x2x8x2x8x16xf32, #tpu.memory_space<vmem>>, vector<1x2x1x8x1x8x8xf32>
    %80 = vector.shape_cast %79 : vector<1x2x1x8x1x8x8xf32> to vector<2x8x8x8xf32>
    %81 = vector.shape_cast %78 : vector<2x8x8x8xf32> to vector<1x2x1x8x1x8x8xf32>
    tpu.vector_store %arg6[%c0_26, %c0_27, %c0_28, %c0_29, %c1, %c0_30, %c0_31], %81 {strides = array<i32>} : memref<1x2x2x8x2x8x16xf32, #tpu.memory_space<vmem>>, vector<1x2x1x8x1x8x8xf32>,
    %82 = vector.extract_strided_slice %66 {offsets = [0, 24], sizes = [128, 8], strides = [1, 1]} : vector<128x64xf32> to vector<128x8xf32>
    %83 = vector.shape_cast %82 : vector<128x8xf32> to vector<2x8x8x8xf32>
    %c0_32 = arith.constant 0 : index
    %c0_33 = arith.constant 0 : index
    %c0_34 = arith.constant 0 : index
    %c0_35 = arith.constant 0 : index
    %c1_36 = arith.constant 1 : index
    %c0_37 = arith.constant 0 : index
    %c8_38 = arith.constant 8 : index
    %84 = vector.load %arg6[%c0_32, %c0_33, %c0_34, %c0_35, %c1_36, %c0_37, %c8_38] : memref<1x2x2x8x2x8x16xf32, #tpu.memory_space<vmem>>, vector<1x2x1x8x1x8x8xf32>
    %85 = vector.shape_cast %84 : vector<1x2x1x8x1x8x8xf32> to vector<2x8x8x8xf32>
    %86 = vector.shape_cast %83 : vector<2x8x8x8xf32> to vector<1x2x1x8x1x8x8xf32>
    tpu.vector_store %arg6[%c0_32, %c0_33, %c0_34, %c0_35, %c1_36, %c0_37, %c8_38], %86 {strides = array<i32>} : memref<1x2x2x8x2x8x16xf32, #tpu.memory_space<vmem>>, vector<1x2x1x8x1x8x8xf32>,
    %87 = vector.extract_strided_slice %66 {offsets = [0, 32], sizes = [128, 8], strides = [1, 1]} : vector<128x64xf32> to vector<128x8xf32>
    %88 = vector.shape_cast %87 : vector<128x8xf32> to vector<2x8x8x8xf32>
    %c0_39 = arith.constant 0 : index
    %c0_40 = arith.constant 0 : index
    %c1_41 = arith.constant 1 : index
    %c0_42 = arith.constant 0 : index
    %c0_43 = arith.constant 0 : index
    %c0_44 = arith.constant 0 : index
    %c0_45 = arith.constant 0 : index
    %89 = vector.load %arg6[%c0_39, %c0_40, %c1_41, %c0_42, %c0_43, %c0_44, %c0_45] : memref<1x2x2x8x2x8x16xf32, #tpu.memory_space<vmem>>, vector<1x2x1x8x1x8x8xf32>
    %90 = vector.shape_cast %89 : vector<1x2x1x8x1x8x8xf32> to vector<2x8x8x8xf32>
    %91 = vector.shape_cast %88 : vector<2x8x8x8xf32> to vector<1x2x1x8x1x8x8xf32>
    tpu.vector_store %arg6[%c0_39, %c0_40, %c1_41, %c0_42, %c0_43, %c0_44, %c0_45], %91 {strides = array<i32>} : memref<1x2x2x8x2x8x16xf32, #tpu.memory_space<vmem>>, vector<1x2x1x8x1x8x8xf32>,
    %92 = vector.extract_strided_slice %66 {offsets = [0, 40], sizes = [128, 8], strides = [1, 1]} : vector<128x64xf32> to vector<128x8xf32>
    %93 = vector.shape_cast %92 : vector<128x8xf32> to vector<2x8x8x8xf32>
    %c0_46 = arith.constant 0 : index
    %c0_47 = arith.constant 0 : index
    %c1_48 = arith.constant 1 : index
    %c0_49 = arith.constant 0 : index
    %c0_50 = arith.constant 0 : index
    %c0_51 = arith.constant 0 : index
    %c8_52 = arith.constant 8 : index
    %94 = vector.load %arg6[%c0_46, %c0_47, %c1_48, %c0_49, %c0_50, %c0_51, %c8_52] : memref<1x2x2x8x2x8x16xf32, #tpu.memory_space<vmem>>, vector<1x2x1x8x1x8x8xf32>
    %95 = vector.shape_cast %94 : vector<1x2x1x8x1x8x8xf32> to vector<2x8x8x8xf32>
    %96 = vector.shape_cast %93 : vector<2x8x8x8xf32> to vector<1x2x1x8x1x8x8xf32>
    tpu.vector_store %arg6[%c0_46, %c0_47, %c1_48, %c0_49, %c0_50, %c0_51, %c8_52], %96 {strides = array<i32>} : memref<1x2x2x8x2x8x16xf32, #tpu.memory_space<vmem>>, vector<1x2x1x8x1x8x8xf32>,
    %97 = vector.extract_strided_slice %66 {offsets = [0, 48], sizes = [128, 8], strides = [1, 1]} : vector<128x64xf32> to vector<128x8xf32>
    %98 = vector.shape_cast %97 : vector<128x8xf32> to vector<2x8x8x8xf32>
    %c0_53 = arith.constant 0 : index
    %c0_54 = arith.constant 0 : index
    %c1_55 = arith.constant 1 : index
    %c0_56 = arith.constant 0 : index
    %c1_57 = arith.constant 1 : index
    %c0_58 = arith.constant 0 : index
    %c0_59 = arith.constant 0 : index
    %99 = vector.load %arg6[%c0_53, %c0_54, %c1_55, %c0_56, %c1_57, %c0_58, %c0_59] : memref<1x2x2x8x2x8x16xf32, #tpu.memory_space<vmem>>, vector<1x2x1x8x1x8x8xf32>
    %100 = vector.shape_cast %99 : vector<1x2x1x8x1x8x8xf32> to vector<2x8x8x8xf32>
    %101 = vector.shape_cast %98 : vector<2x8x8x8xf32> to vector<1x2x1x8x1x8x8xf32>
    tpu.vector_store %arg6[%c0_53, %c0_54, %c1_55, %c0_56, %c1_57, %c0_58, %c0_59], %101 {strides = array<i32>} : memref<1x2x2x8x2x8x16xf32, #tpu.memory_space<vmem>>, vector<1x2x1x8x1x8x8xf32>,
    %102 = vector.extract_strided_slice %66 {offsets = [0, 56], sizes = [128, 8], strides = [1, 1]} : vector<128x64xf32> to vector<128x8xf32>
    %103 = vector.shape_cast %102 : vector<128x8xf32> to vector<2x8x8x8xf32>
    %c0_60 = arith.constant 0 : index
    %c0_61 = arith.constant 0 : index
    %c1_62 = arith.constant 1 : index
    %c0_63 = arith.constant 0 : index
    %c1_64 = arith.constant 1 : index
    %c0_65 = arith.constant 0 : index
    %c8_66 = arith.constant 8 : index
    %104 = vector.load %arg6[%c0_60, %c0_61, %c1_62, %c0_63, %c1_64, %c0_65, %c8_66] : memref<1x2x2x8x2x8x16xf32, #tpu.memory_space<vmem>>, vector<1x2x1x8x1x8x8xf32>
    %105 = vector.shape_cast %104 : vector<1x2x1x8x1x8x8xf32> to vector<2x8x8x8xf32>
    %106 = vector.shape_cast %103 : vector<2x8x8x8xf32> to vector<1x2x1x8x1x8x8xf32>
    tpu.vector_store %arg6[%c0_60, %c0_61, %c1_62, %c0_63, %c1_64, %c0_65, %c8_66], %106 {strides = array<i32>} : memref<1x2x2x8x2x8x16xf32, #tpu.memory_space<vmem>>, vector<1x2x1x8x1x8x8xf32>,
    return
  }
  func.func @transform_0(%arg0: i32, %arg1: i32) -> (i32, i32, i32, i32, i32) {
    %c0_i32 = arith.constant 0 : i32
    %c0_i32_0 = arith.constant 0 : i32
    %c0_i32_1 = arith.constant 0 : i32
    %c0_i32_2 = arith.constant 0 : i32
    return %arg0, %arg1, %c0_i32, %c0_i32_0, %c0_i32_1 : i32, i32, i32, i32, i32
  }
  func.func @transform_1(%arg0: i32, %arg1: i32) -> (i32, i32, i32, i32, i32) {
    %c1_i32 = arith.constant 1 : i32
    %0 = arith.addi %arg1, %c1_i32 : i32
    %c0_i32 = arith.constant 0 : i32
    %c0_i32_0 = arith.constant 0 : i32
    %c0_i32_1 = arith.constant 0 : i32
    %c0_i32_2 = arith.constant 0 : i32
    return %arg0, %0, %c0_i32, %c0_i32_0, %c0_i32_1 : i32, i32, i32, i32, i32
  }
  func.func @transform_2(%arg0: i32, %arg1: i32) -> (i32, i32) {
    %c0_i32 = arith.constant 0 : i32
    %c0_i32_0 = arith.constant 0 : i32
    %c0_i32_1 = arith.constant 0 : i32
    return %c0_i32, %c0_i32_0 : i32, i32
  }
  func.func @transform_3(%arg0: i32, %arg1: i32) -> (i32, i32) {
    %c0_i32 = arith.constant 0 : i32
    %c0_i32_0 = arith.constant 0 : i32
    %c0_i32_1 = arith.constant 0 : i32
    return %c0_i32, %c0_i32_0 : i32, i32
  }
  func.func @transform_4(%arg0: i32, %arg1: i32) -> (i32, i32, i32, i32, i32, i32, i32) {
    %c0_i32 = arith.constant 0 : i32
    %c0_i32_0 = arith.constant 0 : i32
    %c0_i32_1 = arith.constant 0 : i32
    %c0_i32_2 = arith.constant 0 : i32
    %c0_i32_3 = arith.constant 0 : i32
    %c0_i32_4 = arith.constant 0 : i32
    return %arg0, %arg1, %c0_i32, %c0_i32_0, %c0_i32_1, %c0_i32_2, %c0_i32_3 : i32, i32, i32, i32, i32, i32, i32
  }
}

</mosaic_0001>

<bundles_post_ra>
// kernel: tpu_custom_call.1
= control target key start
LH: loop header
LB: loop body
LE: loop exit
PB: predicated region body
PF: predicated region fallthrough
CT: control target
= control target key end

     0   :  { %9 = vsyncpa [#allocation3], 0  ;;  %s7025_s0 = inlined_call_operand.vmem [shape: f32[2,6,10,10,8], index: 0, kind: input, shape index: {}]   ;;  %s7026_s1 = inlined_call_operand.vmem [shape: f32[2,6,10,10,8], index: 1, kind: input, shape index: {}]   ;;  %s7027_s2 = inlined_call_operand.vmem [shape: f32[216,64], index: 2, kind: input, shape index: {}]   ;;  %s7028_s3 = inlined_call_operand.vmem [shape: f32[1,64], index: 3, kind: input, shape index: {}]   ;;  %s7029_s4 = inlined_call_operand.hbm [shape: f32[2,4,2,8,2,8,16], index: 4, kind: output, shape index: {}]  }
   0x1   :  { %11 = vsyncpa [#allocation3 + $0x1], 0  ;;  %s4007_s15 = smov 0   ;;  %s4009_s16 = smov 0  }
   0x2   :  { %s4011_s17 = smov 0   ;;  %s4013_s18 = smov 0  }
   0x3   :  { %s4015_s19 = smov 0   ;;  %s4017_s20 = smov 0  }
   0x4   :  { %s4019_s21 = smov 0   ;;  %s4021_s22 = smov 0  }
   0x5 LB: > { %s2951_s23 = sadd.s32 4294967295, %s3961_s22   ;;  %s2952_s24 = sadd.s32 4294967294, %s3961_s22   ;;  %s3961_s22 = sphi %s4021_s22, %s17_s22   ;;  %s3957_s21 = sphi %s4019_s21, %s7446_s21   ;;  %s3953_s20 = sphi %s4017_s20, %s7445_s20   ;;  %s3949_s19 = sphi %s4015_s19, %s7444_s19   ;;  %s3945_s18 = sphi %s4013_s18, %s7443_s18   ;;  %s3941_s17 = sphi %s4011_s17, %s7442_s17   ;;  %s3937_s16 = sphi %s4009_s16, %s7441_s16   ;;  %s3933_s15 = sphi %s4007_s15, %s7440_s15  }
   0x6   : > { %s26_s25 = sadd.s32 1, %s3953_s20  ;;  %s29_s26 = sadd.s32 1, %s3957_s21 }
   0x7   : > { %p27_p0 = scmp.ge.s32.totalorder %s26_s25, 2  ;;  %p148_p1 = scmp.ne.s32.totalorder %s3941_s17, %s3937_s16 }
   0x8   : > { %p149_p2 = scmp.eq.s32.totalorder %s2951_s23, 3  ;;  %p154_p5 = scmp.ne.s32.totalorder %s3937_s16, %s3933_s15 }
   0x9   : > { %s7448_s25 = smov (%p27_p0, %s26_s25), 0  ;;  %s7450_s26 = smov (!%p27_p0, %s29_s26), %s3957_s21 }
   0xa   : > { %s134_s27 = ssub.s32 %s3953_s20, %s7448_s25  ;;  %p4058_p3 = por %p149_p2, %p148_p1 }
   0xb   : > { %p31_p4 = scmp.ge.s32.totalorder %s7450_s26, 2  ;;  %p155_p6 = scmp.eq.s32.totalorder %s2952_s24, 3 }
   0xc   : > { %p2955_p7 = scmp.ge.s32.totalorder %s3961_s22, 1  ;;  %p209_p9 = scmp.lt.s32.totalorder %s3961_s22, 5 }
   0xd   : > { %s7452_s26 = smov (%p31_p4, %s7450_s26), 0  ;;  %p4067_p8 = por %p155_p6, %p154_p5 }
   0xe   : > { %s133_s30 = ssub.s32 %s3957_s21, %s7452_s26  ;;  %s138_s5 = sadd.s32 1, %s3941_s17 }
   0xf   : > { %s135_s6 = sor.u32 %s134_s27, %s133_s30  ;;  %p210_p10 = pnand %p2955_p7, %p209_p9 }
  0x10   : > { %p136_p11 = scmp.eq.s32.totalorder %s135_s6, 0 }
  0x11   : > { %213 = sbr.rel (%p210_p10) target bundleno = 1142 (0x476), region = 36 }
  0x12   : > { %s4076_s7 = scalar_select %p136_p11, %s3941_s17, %s138_s5  }
  0x18   : > { %s2957_s8 = sshll.u32 %s3945_s18, 1  ;;  %p252_p12 = scmp.lt.s32.totalorder %s3949_s19, 1  ;;  %vm388_vm0 = vcmask 1046528   ;;  %vm7148_vm1 = vcmask 1045504   ;;  %vm1414_vm2 = vcmask 64512   ;;  %vm1431_vm3 = vcmask 130048  }
  0x19   : > { %p254_p13 = scmp.lt.s32.totalorder %s2957_s8, 5  ;;  %s3082_s9 = sadd.s32 2, %s2957_s8  ;;  %vm1448_vm4 = vcmask 195584   ;;  %vm1465_vm5 = vcmask 261120   ;;  %vm7147_vm6 = vcmask 326656   ;;  %vm1499_vm7 = vcmask 392192  }
  0x1a   : > { %s253_s10 = scalar_select %p252_p12, %s3949_s19, 1  ;;  %vm1516_vm8 = vcmask 457728   ;;  %vm1533_vm9 = vcmask 523264   ;;  %vm1550_vm10 = vcmask 588800   ;;  %vm1567_vm11 = vcmask 654336  }
  0x1b   : > { %s7454_s8 = smov (!%p254_p13, %s2957_s8), 5  ;;  %p266_p0 = scmp.lt.s32.totalorder %s3082_s9, 5  ;;  %vm1584_vm12 = vcmask 719872   ;;  %vm1601_vm13 = vcmask 785408   ;;  %vm7144_vm14 = vcmask 850944   ;;  %vm1635_vm15 = vcmask 916480  }
  0x1c   : > { %s3152_s11 = smul.u32 120, %s253_s10  ;;  %s7143_s6 = smov 8  }
  0x1d   : > { %s3151_s12 = smul.u32 20, %s7454_s8  ;;  %s7456_s9 = smov (!%p266_p0, %s3082_s9), 5 }
  0x1e   : > { %s3153_s23 = smul.u32 20, %s7456_s9  ;;  %s3964_s8 = smov 16  }
  0x1f   : > { %s258_s13 = sadd.s32 %s3152_s11, %s3151_s12  ;;  %s3965_s9 = smov 24  }
  0x20   : > { %s2958_s14 = sshll.u32 %s258_s13, 3  ;;  %s4086_s5 = sadd.s32 %s3153_s23, %s3152_s11 }
  0x21   : > { %s4084_s30 = scalar_lea.vmem %s7025_s0, %s2958_s14  ;;  %s3966_s10 = smov 32  }
  0x22   : > { %v4089_v0 = vld [vmem:[%s4084_s30 + $0x40] sm:$0xff]  ;;  %v4092_v1 = vld [vmem:[%s4084_s30 + $0x48] sm:$0x3]  ;;  %v4095_v2 = vld [vmem:[%s4084_s30 + $0x50] sm:$0xff]  ;;  %s3967_s11 = smov 40   ;;  %s3968_s12 = smov 48  }
  0x23   : > { %v4098_v3 = vld [vmem:[%s4084_s30 + $0x58] sm:$0x3]  ;;  %v401_v4 = vrot.slane %v4089_v0, 1  ;;  %v402_v5 = vrot.slane %v4092_v1, 1  ;;  %v404_v6 = vrot.slane %v4095_v2, 1  ;;  %v4107_v10 = vld [vmem:[%s4084_s30 + $0x10] sm:$0xff] }
  0x24   : > { %v405_v7 = vrot.slane %v4098_v3, 1  ;;  %v4110_v11 = vld [vmem:[%s4084_s30 + $0x18] sm:$0x3]  ;;  %v4116_v13 = vld [vmem:[%s4084_s30 + $0x20] sm:$0xff]  ;;  %v4119_v14 = vld [vmem:[%s4084_s30 + $0x28] sm:$0x3] }
  0x25   : > { %v4113_v12 = vsel %vm388_vm0, %v401_v4, %v402_v5  ;;  %v392_v15 = vrot.slane %v4107_v10, 1  ;;  %v393_v16 = vrot.slane %v4110_v11, 1  ;;  %v442_v17 = vrot.slane %v4110_v11, 2  ;;  %v4130_v21 = vld [vmem:[%s4084_s30] sm:$0xff]  ;;  %v4133_v22 = vld [vmem:[%s4084_s30 + $0x8] sm:$0x3] }
  0x26   : > { %v4125_v18 = vsel %vm388_vm0, %v404_v6, %v405_v7  ;;  %v395_v19 = vrot.slane %v4116_v13, 1  ;;  %v396_v20 = vrot.slane %v4119_v14, 1  ;;  %v4136_v23 = vld [vmem:[%s4084_s30 + $0x60] sm:$0xff]  ;;  %v389_v26 = vrot.slane %v4130_v21, 1  ;;  %v4148_v28 = vld [vmem:[%s4084_s30 + $0x68] sm:$0x3] }
  0x27   : > { %v4140_v24 = vpack.i.bf16 %v4125_v18, %v4113_v12  ;;  %v4143_v25 = vsel %vm388_vm0, %v392_v15, %v393_v16  ;;  %v390_v27 = vrot.slane %v4133_v22, 1  ;;  %v4151_v29 = vld [vmem:[%s4084_s30 + $0x70] sm:$0xff]  ;;  %v439_v31 = vrot.slane %v4133_v22, 2  ;;  %v4158_v32 = vld [vmem:[%s4084_s30 + $0x78] sm:$0x3]  ;;  %v4163_v35 = vld [vmem:[%s4084_s30 + $0xc0] sm:$0xff] }
  0x28   : > { %v4154_v30 = vld [vmem:[%s4084_s30 + $0x30] sm:$0xff]  ;;  %v407_v33 = vrot.slane %v4136_v23, 1  ;;  %v408_v34 = vrot.slane %v4148_v28, 1  ;;  %v4168_v36 = vsel %vm388_vm0, %v395_v19, %v396_v20  ;;  %v410_v38 = vrot.slane %v4151_v29, 1  ;;  %v4174_v40 = vld [vmem:[%s4084_s30 + $0x38] sm:$0x3] }
  0x29   : > { %3254 = vrot.lane.b32.xlu1 %v4140_v24, %s7143_s6  ;;  %v391_v37 = vsel %vm388_vm0, %v389_v26, %v390_v27  ;;  %v411_v39 = vrot.slane %v4158_v32, 1  ;;  %v4177_v41 = vld [vmem:[%s4084_s30 + $0xc8] sm:$0x3]  ;;  %v398_v44 = vrot.slane %v4154_v30, 1  ;;  %v399_v45 = vrot.slane %v4174_v40, 1  ;;  %v4186_v46 = vld [vmem:[%s4084_s30 + $0xd0] sm:$0xff] }
  0x2a   : > { %v3243_v42 = vpack.i.bf16 %v4143_v25, %v391_v37  ;;  %v4181_v43 = vsel %vm388_vm0, %v407_v33, %v408_v34  ;;  %v4189_v47 = vld [vmem:[%s4084_s30 + $0xd8] sm:$0x3]  ;;  %v4192_v48 = vld [vmem:[%s4084_s30 + $0xa0] sm:$0xff]  ;;  %v419_v50 = vrot.slane %v4163_v35, 1  ;;  %v420_v51 = vrot.slane %v4177_v41, 1  ;;  %v4204_v54 = vld [vmem:[%s4084_s30 + $0xb0] sm:$0xff] }
  0x2b   : > { %7151 = vst [vmem:[#allocation5_spill] sm:$0xff] %v4192_v48  ;;  %v4195_v49 = vsel %vm388_vm0, %v410_v38, %v411_v39  ;;  %v422_v52 = vrot.slane %v4186_v46, 1  ;;  %v4201_v53 = vld [vmem:[%s4084_s30 + $0xa8] sm:$0x3]  ;;  %7152 = vst [vmem:[#allocation6_spill] sm:$0xff] %v4204_v54  ;;  %v4212_v56 = vsel %vm388_vm0, %v398_v44, %v399_v45  ;;  %v423_v57 = vrot.slane %v4189_v47, 1 }
  0x2c   : > { %3244 = vrot.lane.b32.xlu0 %v3243_v42, %s7143_s6  ;;  %v4209_v55 = vpack.i.bf16 %v4195_v49, %v4181_v43  ;;  %v4216_v58 = vld [vmem:[%s4084_s30 + $0xb8] sm:$0x3]  ;;  %v413_v59 = vrot.slane %v4192_v48, 1  ;;  %v4220_v60 = vld [vmem:[%s4084_s30 + $0x100] sm:$0xff]  ;;  %v4223_v61 = vld [vmem:[%s4084_s30 + $0x110] sm:$0xff]  ;;  %v4227_v62 = vpack.i.bf16 %v4212_v56, %v4168_v36  ;;  %v4230_v63 = vsel %vm388_vm0, %v419_v50, %v420_v51  ;;  %s7039_s13 = smov 56  }
  0x2d   : > { %7153 = vst [vmem:[#allocation7_spill] sm:$0xff] %v4230_v63  ;;  %v414_v4 = vrot.slane %v4201_v53, 1  ;;  %v416_v5 = vrot.slane %v4204_v54, 1  ;;  %v4235_v6 = vld [vmem:[%s4084_s30 + $0x108] sm:$0x3]  ;;  %v4243_v15 = vsel %vm388_vm0, %v422_v52, %v423_v57  ;;  %v417_v16 = vrot.slane %v4216_v58, 1 }
  0x2e   : > { %v4238_v7 = vld [vmem:[%s4084_s30 + $0x118] sm:$0x3]  ;;  %3259 = vrot.lane.b32.xlu1 %v4209_v55, %s7143_s6  ;;  %7154 = vst [vmem:[#allocation8_spill] sm:$0xff] %v4243_v15  ;;  %v431_v19 = vrot.slane %v4220_v60, 1  ;;  %v432_v20 = vrot.slane %v4235_v6, 1  ;;  %v4249_v26 = vld [vmem:[%s4084_s30 + $0xe0] sm:$0xff]  ;;  %v4256_v33 = vpack.i.bf16 %v4243_v15, %v4230_v63 }
  0x2f   : > { %7155 = vst [vmem:[#allocation9_spill] sm:$0xff] %v4249_v26  ;;  %v4252_v27 = vld [vmem:[%s4084_s30 + $0xe8] sm:$0x3]  ;;  %v415_v34 = vsel %vm388_vm0, %v413_v59, %v414_v4  ;;  %v434_v37 = vrot.slane %v4223_v61, 1  ;;  %v435_v38 = vrot.slane %v4238_v7, 1  ;;  %v4262_v39 = vld [vmem:[%s4084_s30 + $0xf0] sm:$0xff]  ;;  %v4270_v44 = vsel %vm388_vm0, %v416_v5, %v417_v16 }
  0x30   : > { %7156 = vst [vmem:[#allocation10_spill] sm:$0xff] %v4262_v39  ;;  %v4265_v42 = vld [vmem:[%s4084_s30 + $0xf8] sm:$0x3]  ;;  %3249 = vrot.lane.b32.xlu0 %v4227_v62, %s7143_s6  ;;  %v4273_v45 = vsel %vm388_vm0, %v431_v19, %v432_v20  ;;  %v425_v50 = vrot.slane %v4249_v26, 1  ;;  %v426_v51 = vrot.slane %v4252_v27, 1  ;;  %v4278_v52 = vpack.i.bf16 %v4270_v44, %v415_v34  ;;  %s3970_s14 = smov 64  }
  0x31   : > { %7157 = vst [vmem:[#allocation11_spill] sm:$0xff] %v4273_v45  ;;  %v4281_v57 = vsel %vm388_vm0, %v434_v37, %v435_v38  ;;  %v428_v59 = vrot.slane %v4262_v39, 1  ;;  %v429_v4 = vrot.slane %v4265_v42, 1  ;;  %v444_v19 = vrot.slane %v4116_v13, 2  ;;  %s2960_s23 = sshll.u32 %s4086_s5, 3  ;;  %s7132_s5 = smov 72  }
  0x32   : > { %7158 = vst [vmem:[#allocation12_spill] sm:$0xff] %v4278_v52  ;;  %7159 = vst [vmem:[#allocation13_spill] sm:$0xff] %v4281_v57  ;;  %3269 = vrot.lane.b32.xlu1 %v4256_v33, %s7143_s6  ;;  %v4289_v5 = vpack.i.bf16 %v4281_v57, %v4273_v45  ;;  %v4292_v16 = vsel %vm388_vm0, %v425_v50, %v426_v51  ;;  %v445_v20 = vrot.slane %v4119_v14, 2  ;;  %v447_v37 = vrot.slane %v4154_v30, 2  ;;  %s3973_s24 = smov 88   ;;  %s7085_s27 = smov 96  }
  0x33   : > { %7161 = vst [vmem:[#allocation15_spill] sm:$0xff] %v4292_v16  ;;  %v4297_v34 = vsel %vm388_vm0, %v428_v59, %v429_v4  ;;  %v448_v38 = vrot.slane %v4174_v40, 2  ;;  %v438_v9 = vrot.slane %v4130_v21, 2  ;;  %v441_v14 = vrot.slane %v4107_v10, 2 }
  0x34   : > { %7160 = vst [vmem:[#allocation14_spill] sm:$0xff] %v4289_v5  ;;  %7162 = vst [vmem:[#allocation16_spill] sm:$0xff] %v4297_v34  ;;  %3264 = vrot.lane.b32.xlu0 %v4278_v52, %s7143_s6  ;;  %v4306_v50 = vpack.i.bf16 %v4297_v34, %v4292_v16  ;;  %v4309_v51 = vsel %vm7148_vm1, %v444_v19, %v445_v20  ;;  %v456_v59 = vrot.slane %v4136_v23, 2  ;;  %v457_v40 = vrot.slane %v4148_v28, 2 }
  0x35   : > { %v4314_v4 = vsel %vm7148_vm1, %v447_v37, %v448_v38  ;;  %v440_v21 = vsel %vm7148_vm1, %v438_v9, %v439_v31  ;;  %v459_v8 = vrot.slane %v4151_v29, 2  ;;  %v4330_v20 = vsel %vm7148_vm1, %v441_v14, %v442_v17 }
  0x36   : > { %3279 = vrot.lane.b32.xlu1 %v4289_v5, %s7143_s6  ;;  %v4325_v19 = vpack.i.bf16 %v4314_v4, %v4309_v51  ;;  %v460_v22 = vrot.slane %v4158_v32, 2  ;;  %v450_v9 = vrot.slane %v4089_v0, 2  ;;  %v4335_v28 = vsel %vm7148_vm1, %v456_v59, %v457_v40 }
  0x37   : > { %v453_v31 = vrot.slane %v4095_v2, 2  ;;  %v468_v37 = vrot.slane %v4163_v35, 2  ;;  %v3283_v38 = vpack.i.bf16 %v4330_v20, %v440_v21  ;;  %v469_v17 = vrot.slane %v4177_v41, 2 }
  0x38   : > { %3274 = vrot.lane.b32.xlu0 %v4306_v50, %s7143_s6  ;;  %v4343_v11 = vsel %vm7148_vm1, %v459_v8, %v460_v22  ;;  %v471_v32 = vrot.slane %v4186_v46, 2  ;;  %v7163_v14 = vrot.slane %v4092_v1, 2  ;;  %v7164_v40 = vrot.slane %v4098_v3, 2 }
  0x39   : > { %v472_v5 = vrot.slane %v4189_v47, 2  ;;  %v462_v21 = vrot.slane %v4192_v48, 2  ;;  %v4363_v8 = vpack.i.bf16 %v4343_v11, %v4335_v28  ;;  %v4366_v1 = vsel %vm7148_vm1, %v468_v37, %v469_v17 }
  0x3a   : > { %v4350_v59 = vsel %vm7148_vm1, %v450_v9, %v7163_v14  ;;  %v4355_v52 = vsel %vm7148_vm1, %v453_v31, %v7164_v40  ;;  %3289 = vrot.lane.b32.xlu1 %v4325_v19, %s3964_s8  ;;  %7165 = vst [vmem:[#allocation17_spill] sm:$0xff] %v4366_v1  ;;  %v463_v3 = vrot.slane %v4201_v53, 2  ;;  %v465_v41 = vrot.slane %v4204_v54, 2 }
  0x3b   : > { %v4371_v22 = vsel %vm7148_vm1, %v471_v32, %v472_v5  ;;  %v466_v47 = vrot.slane %v4216_v58, 2  ;;  %v480_v9 = vrot.slane %v4220_v60, 2  ;;  %v481_v31 = vrot.slane %v4235_v6, 2 }
  0x3c   : > { %3284 = vrot.lane.b32.xlu0 %v3283_v38, %s3964_s8  ;;  %v4379_v14 = vpack.i.bf16 %v4355_v52, %v4350_v59  ;;  %v483_v37 = vrot.slane %v4223_v61, 2  ;;  %v484_v53 = vrot.slane %v4238_v7, 2  ;;  %v464_v17 = vsel %vm7148_vm1, %v462_v21, %v463_v3 }
  0x3d   : > { %v4385_v5 = vsel %vm7148_vm1, %v465_v41, %v466_v47  ;;  %v474_v58 = vrot.slane %v4249_v26, 2  ;;  %v475_v32 = vrot.slane %v4252_v27, 2  ;;  %v4393_v6 = vpack.i.bf16 %v4371_v22, %v4366_v1 }
  0x3e   : > { %3299 = vrot.lane.b32.xlu1 %v4363_v8, %s3964_s8  ;;  %v477_v38 = vrot.slane %v4262_v39, 2  ;;  %v478_v7 = vrot.slane %v4265_v42, 2  ;;  %v4398_v40 = vsel %vm7148_vm1, %v480_v9, %v481_v31  ;;  %v4401_v21 = vsel %vm7148_vm1, %v483_v37, %v484_v53  ;;  %v4431_v31 = vld [vmem:[%s4084_s30 + $0x80] sm:$0xff] }
  0x3f   : > { %7166 = vst [vmem:[#allocation18_spill] sm:$0xff] %v4398_v40  ;;  %7167 = vst [vmem:[#allocation19_spill] sm:$0xff] %v4401_v21  ;;  %v4406_v27 = vpack.i.bf16 %v4385_v5, %v464_v17  ;;  %v4409_v3 = vsel %vm7148_vm1, %v474_v58, %v475_v32  ;;  %v4418_v42 = vpack.i.bf16 %v4401_v21, %v4398_v40  ;;  %v4449_v32 = vld [vmem:[%s4084_s30 + $0x120] sm:$0xff] }
  0x40   : > { %3294 = vrot.lane.b32.xlu0 %v4379_v14, %s3964_s8  ;;  %7169 = vst [vmem:[#allocation21_spill] sm:$0xff] %v4409_v3  ;;  %v4412_v41 = vsel %vm7148_vm1, %v477_v38, %v478_v7  ;;  %v3328_v9 = vpack.i.bf16 %v4089_v0, %v4154_v30  ;;  %v3323_v37 = vpack.i.bf16 %v4116_v13, %v4107_v10  ;;  %v293_v38 = vld [vmem:[%s4084_s30 + $0x88] sm:$0x3] }
  0x41   : > { %7168 = vst [vmem:[#allocation20_spill] sm:$0xff] %v4406_v27  ;;  %7170 = vst [vmem:[#allocation22_spill] sm:$0xff] %v4412_v41  ;;  %v4424_v47 = vpack.i.bf16 %v4412_v41, %v4409_v3  ;;  %v3338_v53 = vpack.i.bf16 %v4431_v31, %v4151_v29  ;;  %v3333_v17 = vpack.i.bf16 %v4136_v23, %v4095_v2 }
  0x42   : > { %3309 = vrot.lane.b32.xlu1 %v4393_v6, %s3964_s8  ;;  %v4446_v58 = vpack.i.bf16 %v4249_v26, %v4186_v46  ;;  %v4454_v10 = vpack.i.bf16 %v4163_v35, %v4204_v54  ;;  %v4461_v7 = vpack.i.bf16 %v4449_v32, %v4223_v61 }
  0x44   : > { %3304 = vrot.lane.b32.xlu0 %v4406_v27, %s3964_s8  ;;  %7171 = vst [vmem:[#allocation23_spill] sm:$0xff] %v4446_v58  ;;  %7172 = vst [vmem:[#allocation24_spill] sm:$0xff] %v4454_v10  ;;  %v3363_v27 = vpack.i.bf16 %v4168_v36, %v4143_v25  ;;  %v4492_v25 = vpack.i.bf16 %v4292_v16, %v4243_v15 }
  0x45   : > { %7173 = vst [vmem:[#allocation25_spill] sm:$0xff] %v4461_v7 }
  0x46   : > { %3319 = vrot.lane.b32.xlu1 %v4418_v42, %s3964_s8 }
  0x48   : > { %3314 = vrot.lane.b32.xlu0 %v4424_v47, %s3964_s8 }
  0x4a   : > { %3329 = vrot.lane.b32.xlu1 %v3328_v9, %s3965_s9  ;;  %v490_v9 = vrot.slane %v4431_v31, 1 }
  0x4c   : > { %3324 = vrot.lane.b32.xlu0 %v3323_v37, %s3965_s9  ;;  %v491_v37 = vrot.slane %v293_v38, 1 }
  0x4e   : > { %3339 = vrot.lane.b32.xlu1 %v3338_v53, %s3965_s9  ;;  %v4468_v53 = vpack.i.bf16 %v4220_v60, %v4262_v39 }
  0x50   : > { %3334 = vrot.lane.b32.xlu0 %v3333_v17, %s3965_s9  ;;  %v3368_v17 = vpack.i.bf16 %v4113_v12, %v4212_v56  ;;  %v3373_v12 = vpack.i.bf16 %v4181_v43, %v4125_v18  ;;  %v496_v43 = vrot.slane %v4431_v31, 2  ;;  %v3408_v56 = vpack.i.bf16 %v4350_v59, %v4314_v4 }
  0x51   : > { %v3413_v4 = vpack.i.bf16 %v4335_v28, %v4355_v52  ;;  %v4556_v28 = vpack.i.bf16 %v4398_v40, %v4412_v41  ;;  %v3448_v59 = vpack.i.bf16 %v4095_v2, %v4089_v0  ;;  %v4575_v0 = vpack.i.bf16 %v4262_v39, %v4249_v26  ;;  %v314_v2 = vld [vmem:[%s4084_s30 + $0x130] sm:$0xff] }
  0x52   : > { %3349 = vrot.lane.b32.xlu1 %v4446_v58, %s3965_s9  ;;  %v4475_v58 = vsel %vm388_vm0, %v490_v9, %v491_v37 }
  0x53   : > { %v3378_v54 = vpack.i.bf16 %v4475_v58, %v4195_v49  ;;  %v4500_v49 = vpack.i.bf16 %v4230_v63, %v4270_v44 }
  0x54   : > { %3344 = vrot.lane.b32.xlu0 %v4454_v10, %s3965_s9  ;;  %v313_v10 = vld [vmem:[%s4084_s30 + $0x128] sm:$0x3] }
  0x55   : > { %v494_v48 = vrot.slane %v313_v10, 1  ;;  %v500_v9 = vrot.slane %v313_v10, 2  ;;  %v3443_v10 = vpack.i.bf16 %v4154_v30, %v4116_v13  ;;  %v4581_v13 = vpack.i.bf16 %v4186_v46, %v4163_v35  ;;  %v295_v30 = vld [vmem:[%s4084_s30 + $0x98] sm:$0x3] }
  0x56   : > { %3359 = vrot.lane.b32.xlu1 %v4461_v7, %s3965_s9  ;;  %v493_v7 = vrot.slane %v4449_v32, 1  ;;  %v315_v46 = vld [vmem:[%s4084_s30 + $0x138] sm:$0x3] }
  0x58   : > { %3354 = vrot.lane.b32.xlu0 %v4468_v53, %s3965_s9  ;;  %v4495_v36 = vsel %vm388_vm0, %v493_v7, %v494_v48  ;;  %v4513_v48 = vpack.i.bf16 %v4273_v45, %v4297_v34  ;;  %v499_v7 = vrot.slane %v4449_v32, 2 }
  0x59   : > { %7174 = vst [vmem:[#allocation26_spill] sm:$0xff] %v4495_v36  ;;  %v4506_v18 = vpack.i.bf16 %v4495_v36, %v4281_v57 }
  0x5a   : > { %3369 = vrot.lane.b32.xlu1 %v3368_v17, %s3966_s10  ;;  %v3453_v17 = vpack.i.bf16 %v4151_v29, %v4136_v23  ;;  %v4587_v23 = vpack.i.bf16 %v314_v2, %v4449_v32 }
  0x5c   : > { %3364 = vrot.lane.b32.xlu0 %v3363_v27, %s3966_s10  ;;  %v3403_v27 = vpack.i.bf16 %v4309_v51, %v4330_v20  ;;  %v4536_v51 = vpack.i.bf16 %v4409_v3, %v4371_v22  ;;  %v4539_v20 = vsel %vm7148_vm1, %v499_v7, %v500_v9  ;;  %v516_v7 = vrot.slane %v315_v46, 2 }
  0x5d   : > { %7175 = vst [vmem:[#allocation27_spill] sm:$0xff] %v4539_v20  ;;  %v4550_v52 = vpack.i.bf16 %v4539_v20, %v4401_v21 }
  0x5e   : > { %3379 = vrot.lane.b32.xlu1 %v3378_v54, %s3966_s10  ;;  %v497_v54 = vrot.slane %v293_v38, 2 }
  0x60   : > { %3374 = vrot.lane.b32.xlu0 %v3373_v12, %s3966_s10  ;;  %v4520_v44 = vsel %vm7148_vm1, %v496_v43, %v497_v54  ;;  %v4593_v12 = vpack.i.bf16 %v4223_v61, %v4220_v60  ;;  %v509_v43 = vrot.slane %v314_v2, 1  ;;  %v510_v54 = vrot.slane %v315_v46, 1 }
  0x61   : > { %v3418_v38 = vpack.i.bf16 %v4520_v44, %v4343_v11  ;;  %v4544_v11 = vpack.i.bf16 %v4366_v1, %v4385_v5  ;;  %v294_v5 = vld [vmem:[%s4084_s30 + $0x90] sm:$0xff] }
  0x62   : > { %3389 = vrot.lane.b32.xlu1 %v4492_v25, %s3966_s10  ;;  %v3458_v37 = vpack.i.bf16 %v294_v5, %v4431_v31  ;;  %v506_v29 = vrot.slane %v294_v5, 1  ;;  %v507_v31 = vrot.slane %v295_v30, 1  ;;  %v4608_v60 = vsel %vm388_vm0, %v509_v43, %v510_v54 }
  0x63   : > { %7176 = vst [vmem:[#allocation28_spill] sm:$0xff] %v4608_v60  ;;  %v512_v61 = vrot.slane %v294_v5, 2 }
  0x64   : > { %3384 = vrot.lane.b32.xlu0 %v4500_v49, %s3966_s10  ;;  %v508_v35 = vsel %vm388_vm0, %v506_v29, %v507_v31 }
  0x65   : > { %v3498_v32 = vpack.i.bf16 %v508_v35, %v4475_v58  ;;  %v513_v58 = vrot.slane %v295_v30, 2 }
  0x66   : > { %3399 = vrot.lane.b32.xlu1 %v4506_v18, %s3966_s10 }
  0x68   : > { %3394 = vrot.lane.b32.xlu0 %v4513_v48, %s3966_s10 }
  0x6a   : > { %3409 = vrot.lane.b32.xlu1 %v3408_v56, %s3967_s11  ;;  %v7177_v56 = vld [vmem:[#allocation14_spill] sm:$0xff] }
  0x6c   : > { %3404 = vrot.lane.b32.xlu0 %v3403_v27, %s3967_s11 }
  0x6e   : > { %3419 = vrot.lane.b32.xlu1 %v3418_v38, %s3967_s11  ;;  %v515_v38 = vrot.slane %v314_v2, 2 }
  0x70   : > { %3414 = vrot.lane.b32.xlu0 %v3413_v4, %s3967_s11  ;;  %v4633_v4 = vsel %vm7148_vm1, %v515_v38, %v516_v7 }
  0x71   : > { %7179 = vst [vmem:[#allocation29_spill] sm:$0xff] %v4633_v4 }
  0x72   : > { %3429 = vrot.lane.b32.xlu1 %v4536_v51, %s3967_s11 }
  0x74   : > { %3424 = vrot.lane.b32.xlu0 %v4544_v11, %s3967_s11 }
  0x76   : > { %3439 = vrot.lane.b32.xlu1 %v4550_v52, %s3967_s11 }
  0x78   : > { %3434 = vrot.lane.b32.xlu0 %v4556_v28, %s3967_s11 }
  0x7a   : > { %3449 = vrot.lane.b32.xlu1 %v3448_v59, %s3968_s12 }
  0x7c   : > { %3444 = vrot.lane.b32.xlu0 %v3443_v10, %s3968_s12  ;;  %v7181_v10 = vld [vmem:[#allocation5_spill] sm:$0xff] }
  0x7e   : > { %3459 = vrot.lane.b32.xlu1 %v3458_v37, %s3968_s12  ;;  %v7182_v37 = vld [vmem:[#allocation6_spill] sm:$0xff] }
  0x80   : > { %3454 = vrot.lane.b32.xlu0 %v3453_v17, %s3968_s12  ;;  %v3563_v17 = vpack.i.bf16 %v7182_v37, %v7181_v10 }
  0x82   : > { %3469 = vrot.lane.b32.xlu1 %v4575_v0, %s3968_s12 }
  0x84   : > { %3464 = vrot.lane.b32.xlu0 %v4581_v13, %s3968_s12 }
  0x86   : > { %3479 = vrot.lane.b32.xlu1 %v4587_v23, %s3968_s12 }
  0x88   : > { %3474 = vrot.lane.b32.xlu0 %v4593_v12, %s3968_s12 }
  0x8a   : > { %3489 = vrot.lane.b32.xlu1 %v4140_v24, %s7039_s13  ;;  %v3518_v24 = vpack.i.bf16 %v4608_v60, %v4495_v36 }
  0x8c   : > { %3484 = vrot.lane.b32.xlu0 %v4227_v62, %s7039_s13  ;;  %v514_v62 = vsel %vm7148_vm1, %v512_v61, %v513_v58 }
  0x8e   : > { %3499 = vrot.lane.b32.xlu1 %v3498_v32, %s7039_s13 }
  0x90   : > { %3494 = vrot.lane.b32.xlu0 %v4209_v55, %s7039_s13  ;;  %v3538_v55 = vpack.i.bf16 %v514_v62, %v4520_v44 }
  0x92   : > { %3509 = vrot.lane.b32.xlu1 %v4306_v50, %s7039_s13 }
  0x94   : > { %3504 = vrot.lane.b32.xlu0 %v4256_v33, %s7039_s13 }
  0x96   : > { %3519 = vrot.lane.b32.xlu1 %v3518_v24, %s7039_s13 }
  0x98   : > { %3514 = vrot.lane.b32.xlu0 %v7177_v56, %s7039_s13  ;;  %s4656_s13 = scalar_lea.vmem %s7026_s1, %s2960_s23  ;;  %s7130_s23 = smov 80  }
  0x99   : > { %v4669_v30 = vld [vmem:[%s4656_s13 + $0x20] sm:$0xff]  ;;  %v4672_v29 = vld [vmem:[%s4656_s13 + $0x30] sm:$0xff]  ;;  %v4731_v60 = vld [vmem:[%s4656_s13 + $0x8] sm:$0x3] }
  0x9a   : > { %3529 = vrot.lane.b32.xlu1 %v4379_v14, %s3970_s14  ;;  %7183 = vst [vmem:[#allocation5_spill] sm:$0xff] %v4669_v30  ;;  %7184 = vst [vmem:[#allocation6_spill] sm:$0xff] %v4672_v29  ;;  %v4678_v35 = vld [vmem:[%s4656_s13] sm:$0xff]  ;;  %v4681_v46 = vld [vmem:[%s4656_s13 + $0x10] sm:$0xff]  ;;  %v4689_v43 = vpack.i.bf16 %v4672_v29, %v4669_v30  ;;  %v543_v34 = vrot.slane %v4672_v29, 1 }
  0x9b   : > { %v4625_v27 = vpop.permute.xlu1 %3254  ;;  %7185 = vst [vmem:[#allocation31_spill] sm:$0xff] %v4678_v35  ;;  %v4692_v54 = vld [vmem:[%s4656_s13 + $0x60] sm:$0xff]  ;;  %v4695_v24 = vld [vmem:[%s4656_s13 + $0x70] sm:$0xff]  ;;  %v3583_v58 = vpack.i.bf16 %v4681_v46, %v4678_v35  ;;  %v4734_v36 = vld [vmem:[%s4656_s13 + $0x18] sm:$0x3] }
  0x9c   : > { %3524 = vrot.lane.b32.xlu0 %v4325_v19, %s3970_s14  ;;  %v3558_v19 = vpack.i.bf16 %v4633_v4, %v4539_v20  ;;  %7187 = vst [vmem:[#allocation33_spill] sm:$0xff] %v4692_v54  ;;  %v4704_v62 = vld [vmem:[%s4656_s13 + $0x40] sm:$0xff]  ;;  %v4715_v7 = vpack.i.bf16 %v4695_v24, %v4692_v54  ;;  %v4745_v15 = vld [vmem:[%s4656_s13 + $0x68] sm:$0x3]  ;;  %v4756_v20 = vld [vmem:[%s4656_s13 + $0x78] sm:$0x3] }
  0x9d   : > { %7189 = vst [vmem:[#allocation35_spill] sm:$0xff] %v4704_v62  ;;  %v552_v21 = vrot.slane %v4692_v54, 1  ;;  %v4767_v3 = vld [vmem:[%s4656_s13 + $0x48] sm:$0x3]  ;;  %v556_v41 = vrot.slane %v4756_v20, 1 }
  0x9e   : > { %v4629_v9 = vpop.permute.xlu0 %3244  ;;  %3539 = vrot.lane.b32.xlu1 %v3538_v55, %s3970_s14  ;;  %v4707_v55 = vld [vmem:[%s4656_s13 + $0x50] sm:$0xff] }
  0x9f   : > { %7178 = vst [vmem:[#allocation14_spill] sm:$0xff] %v4629_v9  ;;  %7190 = vst [vmem:[#allocation36_spill] sm:$0xff] %v4707_v55  ;;  %v4725_v37 = vpack.i.bf16 %v4707_v55, %v4704_v62  ;;  %v538_v9 = vrot.slane %v4734_v36, 1 }
  0xa0   : > { %3534 = vrot.lane.b32.xlu0 %v4363_v8, %s3970_s14  ;;  %v4637_v14 = vpop.permute.xlu1 %3259 }
  0xa2   : > { %v4639_v44 = vpop.permute.xlu0 %3249  ;;  %3549 = vrot.lane.b32.xlu1 %v4424_v47, %s3970_s14 }
  0xa4   : > { %3544 = vrot.lane.b32.xlu0 %v4393_v6, %s3970_s14  ;;  %v4647_v59 = vpop.permute.xlu1 %3269 }
  0xa6   : > { %v4650_v5 = vpop.permute.xlu0 %3264  ;;  %3559 = vrot.lane.b32.xlu1 %v3558_v19, %s3970_s14  ;;  %v4718_v19 = vld [vmem:[%s4656_s13 + $0x28] sm:$0x3] }
  0xa7   : > { %7180 = vst [vmem:[#allocation30_spill] sm:$0xff] %v4650_v5  ;;  %v541_v45 = vrot.slane %v4718_v19, 1  ;;  %v537_v5 = vrot.slane %v4681_v46, 1 }
  0xa8   : > { %3554 = vrot.lane.b32.xlu0 %v4418_v42, %s3970_s14  ;;  %v4660_v8 = vpop.permute.xlu1 %3279 }
  0xa9   : > { %v4786_v26 = vsel %vm388_vm0, %v537_v5, %v538_v9 }
  0xaa   : > { %v4664_v2 = vpop.permute.xlu0 %3274  ;;  %3569 = vrot.lane.b32.xlu1 %v4581_v13, %s7132_s5  ;;  %7201 = vst [vmem:[#allocation45_spill] sm:$0xff] %v4786_v26 }
  0xac   : > { %3564 = vrot.lane.b32.xlu0 %v3563_v17, %s7132_s5  ;;  %v4675_v31 = vpop.permute.xlu1 %3289  ;;  %v4728_v17 = vld [vmem:[%s4656_s13 + $0x38] sm:$0x3] }
  0xad   : > { %v544_v16 = vrot.slane %v4728_v17, 1 }
  0xae   : > { %v4683_v32 = vpop.permute.xlu0 %3284  ;;  %3579 = vrot.lane.b32.xlu1 %v4593_v12, %s7132_s5 }
  0xaf   : > { %7186 = vst [vmem:[#allocation32_spill] sm:$0xff] %v4683_v32  ;;  %v535_v32 = vrot.slane %v4731_v60, 1 }
  0xb0   : > { %3574 = vrot.lane.b32.xlu0 %v4575_v0, %s7132_s5  ;;  %v4699_v61 = vpop.permute.xlu1 %3299 }
  0xb1   : > { %7188 = vst [vmem:[#allocation34_spill] sm:$0xff] %v4699_v61  ;;  %v549_v61 = vrot.slane %v4707_v55, 1 }
  0xb2   : > { %v4709_v38 = vpop.permute.xlu0 %3294  ;;  %3589 = vrot.lane.b32.xlu1 %v4689_v43, %s7132_s5 }
  0xb3   : > { %7191 = vst [vmem:[#allocation37_spill] sm:$0xff] %v4709_v38  ;;  %v553_v38 = vrot.slane %v4745_v15, 1 }
  0xb4   : > { %3584 = vrot.lane.b32.xlu0 %v3583_v58, %s7132_s5  ;;  %v4721_v10 = vpop.permute.xlu1 %3309  ;;  %v540_v58 = vrot.slane %v4669_v30, 1 }
  0xb5   : > { %7192 = vst [vmem:[#allocation38_spill] sm:$0xff] %v4721_v10  ;;  %v4773_v10 = vsel %vm388_vm0, %v543_v34, %v544_v16  ;;  %v546_v16 = vrot.slane %v4704_v62, 1  ;;  %v547_v34 = vrot.slane %v4767_v3, 1 }
  0xb6   : > { %v4736_v57 = vpop.permute.xlu0 %3304  ;;  %3599 = vrot.lane.b32.xlu1 %v4715_v7, %s7132_s5  ;;  %v4763_v40 = vsel %vm388_vm0, %v540_v58, %v541_v45  ;;  %7197 = vst [vmem:[#allocation43_spill] sm:$0xff] %v4773_v10 }
  0xb7   : > { %7193 = vst [vmem:[#allocation39_spill] sm:$0xff] %v4736_v57  ;;  %v534_v57 = vrot.slane %v4678_v35, 1  ;;  %7196 = vst [vmem:[#allocation42_spill] sm:$0xff] %v4763_v40 }
  0xb8   : > { %3594 = vrot.lane.b32.xlu0 %v4725_v37, %s7132_s5  ;;  %v4749_v63 = vpop.permute.xlu1 %3319  ;;  %s7295_s5 = smov 72  }
  0xb9   : > { %7194 = vst [vmem:[#allocation40_spill] sm:$0xff] %v4749_v63  ;;  %v4770_v63 = vld [vmem:[%s4656_s13 + $0x58] sm:$0x3]  ;;  %v4783_v58 = vsel %vm388_vm0, %v534_v57, %v535_v32  ;;  %v3628_v57 = vpack.i.bf16 %v4773_v10, %v4763_v40  ;;  %v4799_v32 = vsel %vm388_vm0, %v552_v21, %v553_v38  ;;  %v567_v38 = vrot.slane %v4672_v29, 2 }
  0xba   : > { %v4758_v4 = vpop.permute.xlu0 %3314  ;;  %3609 = vrot.lane.b32.xlu1 %v4256_v33, %s7130_s23  ;;  %v7198_v33 = vld [vmem:[#allocation12_spill] sm:$0xff]  ;;  %7200 = vst [vmem:[#allocation44_spill] sm:$0xff] %v4783_v58  ;;  %v550_v39 = vrot.slane %v4770_v63, 1  ;;  %7203 = vst [vmem:[#allocation47_spill] sm:$0xff] %v4799_v32 }
  0xbb   : > { %7195 = vst [vmem:[#allocation41_spill] sm:$0xff] %v4758_v4  ;;  %v555_v4 = vrot.slane %v4695_v24, 1 }
  0xbc   : > { %3604 = vrot.lane.b32.xlu0 %v7198_v33, %s7130_s23  ;;  %v4780_v45 = vpop.permute.xlu1 %3329  ;;  %v3623_v33 = vpack.i.bf16 %v4786_v26, %v4783_v58 }
  0xbd   : > { %7199 = vst [vmem:[#allocation12_spill] sm:$0xff] %v4780_v45  ;;  %v4802_v9 = vsel %vm388_vm0, %v555_v4, %v556_v41 }
  0xbe   : > { %v4792_v1 = vpop.permute.xlu0 %3324  ;;  %3619 = vrot.lane.b32.xlu1 %v7177_v56, %s7130_s23  ;;  %7204 = vst [vmem:[#allocation48_spill] sm:$0xff] %v4802_v9  ;;  %v4814_v56 = vsel %vm388_vm0, %v549_v61, %v550_v39  ;;  %v3638_v21 = vpack.i.bf16 %v4802_v9, %v4799_v32  ;;  %v564_v39 = vrot.slane %v4669_v30, 2  ;;  %v565_v61 = vrot.slane %v4718_v19, 2 }
  0xbf   : > { %7202 = vst [vmem:[#allocation46_spill] sm:$0xff] %v4792_v1  ;;  %v4811_v1 = vsel %vm388_vm0, %v546_v16, %v547_v34  ;;  %7206 = vst [vmem:[#allocation50_spill] sm:$0xff] %v4814_v56  ;;  %v568_v16 = vrot.slane %v4728_v17, 2 }
  0xc0   : > { %3614 = vrot.lane.b32.xlu0 %v4306_v50, %s7130_s23  ;;  %v4806_v5 = vpop.permute.xlu1 %3339  ;;  %7205 = vst [vmem:[#allocation49_spill] sm:$0xff] %v4811_v1  ;;  %v3633_v41 = vpack.i.bf16 %v4814_v56, %v4811_v1  ;;  %v4845_v19 = vsel %vm7148_vm1, %v564_v39, %v565_v61  ;;  %v570_v61 = vrot.slane %v4704_v62, 2 }
  0xc1   : > { %v4848_v17 = vsel %vm7148_vm1, %v567_v38, %v568_v16  ;;  %v571_v38 = vrot.slane %v4767_v3, 2  ;;  %v574_v16 = vrot.slane %v4770_v63, 2 }
  0xc2   : > { %v4816_v45 = vpop.permute.xlu0 %3334  ;;  %3629 = vrot.lane.b32.xlu1 %v3628_v57, %s7130_s23  ;;  %v558_v57 = vrot.slane %v4678_v35, 2  ;;  %v579_v35 = vrot.slane %v4695_v24, 2 }
  0xc4   : > { %3624 = vrot.lane.b32.xlu0 %v3623_v33, %s7130_s23  ;;  %v4822_v50 = vpop.permute.xlu1 %3349  ;;  %v559_v33 = vrot.slane %v4731_v60, 2  ;;  %v577_v60 = vrot.slane %v4745_v15, 2  ;;  %v573_v15 = vrot.slane %v4707_v55, 2 }
  0xc6   : > { %v4826_v4 = vpop.permute.xlu0 %3344  ;;  %3639 = vrot.lane.b32.xlu1 %v3638_v21, %s7130_s23  ;;  %v562_v21 = vrot.slane %v4734_v36, 2  ;;  %v580_v36 = vrot.slane %v4756_v20, 2 }
  0xc7   : > { %7207 = vst [vmem:[#allocation51_spill] sm:$0xff] %v4826_v4  ;;  %v561_v4 = vrot.slane %v4681_v46, 2 }
  0xc8   : > { %3634 = vrot.lane.b32.xlu0 %v3633_v41, %s7130_s23  ;;  %v4834_v34 = vpop.permute.xlu1 %3359  ;;  %v576_v41 = vrot.slane %v4692_v54, 2 }
  0xc9   : > { %7208 = vst [vmem:[#allocation52_spill] sm:$0xff] %v4834_v34  ;;  %v4862_v39 = vsel %vm7148_vm1, %v561_v4, %v562_v21  ;;  %v4878_v4 = vsel %vm7148_vm1, %v579_v35, %v580_v36 }
  0xca   : > { %v4840_v58 = vpop.permute.xlu0 %3354  ;;  %3649 = vrot.lane.b32.xlu1 %v4393_v6, %s3973_s24  ;;  %v4859_v6 = vsel %vm7148_vm1, %v558_v57, %v559_v33  ;;  %7212 = vst [vmem:[#allocation54_spill] sm:$0xff] %v4862_v39  ;;  %v4875_v57 = vsel %vm7148_vm1, %v576_v41, %v577_v60  ;;  %7215 = vst [vmem:[#allocation57_spill] sm:$0xff] %v4878_v4  ;;  %v4887_v33 = vsel %vm7148_vm1, %v570_v61, %v571_v38  ;;  %v7217_v38 = vld [vmem:[#allocation23_spill] sm:$0xff] }
  0xcb   : > { %7209 = vst [vmem:[#allocation53_spill] sm:$0xff] %v4840_v58  ;;  %v7210_v58 = vld [vmem:[#allocation20_spill] sm:$0xff]  ;;  %7214 = vst [vmem:[#allocation56_spill] sm:$0xff] %v4875_v57  ;;  %v3663_v63 = vpack.i.bf16 %v4862_v39, %v4859_v6  ;;  %v3678_v35 = vpack.i.bf16 %v4878_v4, %v4875_v57 }
  0xcc   : > { %3644 = vrot.lane.b32.xlu0 %v7210_v58, %s3973_s24  ;;  %v4856_v34 = vpop.permute.xlu1 %3369  ;;  %7211 = vst [vmem:[#allocation20_spill] sm:$0xff] %v4859_v6  ;;  %v3668_v58 = vpack.i.bf16 %v4848_v17, %v4845_v19 }
  0xce   : > { %v4868_v20 = vpop.permute.xlu0 %3364  ;;  %3659 = vrot.lane.b32.xlu1 %v4418_v42, %s3973_s24  ;;  %v4890_v42 = vsel %vm7148_vm1, %v573_v15, %v574_v16  ;;  %v7218_v15 = vld [vmem:[#allocation24_spill] sm:$0xff] }
  0xcf   : > { %7213 = vst [vmem:[#allocation55_spill] sm:$0xff] %v4868_v20  ;;  %v3673_v41 = vpack.i.bf16 %v4890_v42, %v4887_v33  ;;  %v3713_v20 = vpack.i.bf16 %v4692_v54, %v4707_v55  ;;  %v3743_v55 = vpack.i.bf16 %v4763_v40, %v4786_v26  ;;  %v3292_v40 = vunpack.i.h.bf16 %v4675_v31  ;;  %v3844_v26 = vld [vmem:[%s4084_s30 + $0x40] sm:$0xff] }
  0xd0   : > { %3654 = vrot.lane.b32.xlu0 %v4424_v47, %s3973_s24  ;;  %v4882_v3 = vpop.permute.xlu1 %3379 }
  0xd2   : > { %v4892_v21 = vpop.permute.xlu0 %3374  ;;  %3669 = vrot.lane.b32.xlu1 %v3668_v58, %s3973_s24 }
  0xd4   : > { %3664 = vrot.lane.b32.xlu0 %v3663_v63, %s3973_s24  ;;  %v4898_v47 = vpop.permute.xlu1 %3389  ;;  %v7220_v63 = vld [vmem:[#allocation25_spill] sm:$0xff] }
  0xd6   : > { %v4902_v60 = vpop.permute.xlu0 %3384  ;;  %3679 = vrot.lane.b32.xlu1 %v3678_v35, %s3973_s24  ;;  %v3708_v35 = vpack.i.bf16 %v4704_v62, %v4672_v29  ;;  %v333_v62 = vld [vmem:[%s4656_s13 + $0x88] sm:$0x3] }
  0xd7   : > { %7216 = vst [vmem:[#allocation58_spill] sm:$0xff] %v4902_v60 }
  0xd8   : > { %3674 = vrot.lane.b32.xlu0 %v3673_v41, %s3973_s24  ;;  %v4906_v36 = vpop.permute.xlu1 %3399  ;;  %v4923_v41 = vld [vmem:[%s4656_s13 + $0x80] sm:$0xff]  ;;  %s3975_s24 = smov 104  }
  0xda   : > { %v4908_v61 = vpop.permute.xlu0 %3394  ;;  %3689 = vrot.lane.b32.xlu1 %v7217_v38, %s7085_s27 }
  0xdc   : > { %3684 = vrot.lane.b32.xlu0 %v7218_v15, %s7085_s27  ;;  %v4914_v16 = vpop.permute.xlu1 %3409  ;;  %v3703_v15 = vpack.i.bf16 %v4669_v30, %v4681_v46 }
  0xde   : > { %v4916_v58 = vpop.permute.xlu0 %3404  ;;  %3699 = vrot.lane.b32.xlu1 %v7220_v63, %s7085_s27  ;;  %v3718_v63 = vpack.i.bf16 %v4923_v41, %v4695_v24  ;;  %v584_v24 = vrot.slane %v4923_v41, 1 }
  0xdf   : > { %7219 = vst [vmem:[#allocation23_spill] sm:$0xff] %v4916_v58 }
  0xe0   : > { %3694 = vrot.lane.b32.xlu0 %v4468_v53, %s7085_s27  ;;  %v4927_v38 = vpop.permute.xlu1 %3419 }
  0xe2   : > { %v4931_v60 = vpop.permute.xlu0 %3414  ;;  %3709 = vrot.lane.b32.xlu1 %v3708_v35, %s7085_s27 }
  0xe4   : > { %3704 = vrot.lane.b32.xlu0 %v3703_v15, %s7085_s27  ;;  %v4937_v58 = vpop.permute.xlu1 %3429  ;;  %v585_v15 = vrot.slane %v333_v62, 1 }
  0xe6   : > { %v4941_v53 = vpop.permute.xlu0 %3424  ;;  %3719 = vrot.lane.b32.xlu1 %v3718_v63, %s7085_s27  ;;  %v4961_v63 = vsel %vm388_vm0, %v584_v24, %v585_v15  ;;  %v3753_v24 = vpack.i.bf16 %v4799_v32, %v4814_v56  ;;  %v3261_v56 = vunpack.i.l.bf16 %v4637_v14 }
  0xe7   : > { %7221 = vst [vmem:[#allocation24_spill] sm:$0xff] %v4941_v53  ;;  %7223 = vst [vmem:[#allocation59_spill] sm:$0xff] %v4961_v63 }
  0xe8   : > { %3714 = vrot.lane.b32.xlu0 %v3713_v20, %s7085_s27  ;;  %v4945_v6 = vpop.permute.xlu1 %3439  ;;  %v3748_v20 = vpack.i.bf16 %v4811_v1, %v4773_v10  ;;  %s7128_s27 = smov 112   ;;  %v3271_v10 = vunpack.i.l.bf16 %v4647_v59 }
  0xea   : > { %v4948_v35 = vpop.permute.xlu0 %3434  ;;  %3729 = vrot.lane.b32.xlu1 %v4492_v25, %s3975_s24 }
  0xec   : > { %3724 = vrot.lane.b32.xlu0 %v4500_v49, %s3975_s24  ;;  %v4953_v54 = vpop.permute.xlu1 %3449 }
  0xee   : > { %v4955_v53 = vpop.permute.xlu0 %3444  ;;  %3739 = vrot.lane.b32.xlu1 %v4506_v18, %s3975_s24 }
  0xef   : > { %7222 = vst [vmem:[#allocation25_spill] sm:$0xff] %v4955_v53  ;;  %v3758_v53 = vpack.i.bf16 %v4961_v63, %v4802_v9 }
  0xf0   : > { %3734 = vrot.lane.b32.xlu0 %v4513_v48, %s3975_s24  ;;  %v4964_v25 = vpop.permute.xlu1 %3459 }
  0xf2   : > { %v4968_v49 = vpop.permute.xlu0 %3454  ;;  %3749 = vrot.lane.b32.xlu1 %v3748_v20, %s3975_s24  ;;  %v587_v20 = vrot.slane %v4923_v41, 2 }
  0xf4   : > { %3744 = vrot.lane.b32.xlu0 %v3743_v55, %s3975_s24  ;;  %v4972_v18 = vpop.permute.xlu1 %3469  ;;  %v588_v55 = vrot.slane %v333_v62, 2 }
  0xf6   : > { %v4976_v15 = vpop.permute.xlu0 %3464  ;;  %3759 = vrot.lane.b32.xlu1 %v3758_v53, %s3975_s24  ;;  %v3788_v53 = vpack.i.bf16 %v4887_v33, %v4848_v17 }
  0xf7   : > { %7224 = vst [vmem:[#allocation60_spill] sm:$0xff] %v4976_v15  ;;  %v3262_v15 = vunpack.i.h.bf16 %v4637_v14  ;;  %v3281_v14 = vunpack.i.l.bf16 %v4660_v8 }
  0xf8   : > { %3754 = vrot.lane.b32.xlu0 %v3753_v24, %s3975_s24  ;;  %v4978_v48 = vpop.permute.xlu1 %3479  ;;  %v4996_v24 = vsel %vm7148_vm1, %v587_v20, %v588_v55  ;;  %s3977_s24 = smov 120  }
  0xf9   : > { %7225 = vst [vmem:[#allocation61_spill] sm:$0xff] %v4978_v48  ;;  %7229 = vst [vmem:[#allocation65_spill] sm:$0xff] %v4996_v24 }
  0xfa   : > { %v4980_v1 = vpop.permute.xlu0 %3474  ;;  %3769 = vrot.lane.b32.xlu1 %v4536_v51, %s7128_s27 }
  0xfb   : > { %7226 = vst [vmem:[#allocation62_spill] sm:$0xff] %v4980_v1 }
  0xfc   : > { %3764 = vrot.lane.b32.xlu0 %v4544_v11, %s7128_s27  ;;  %v4987_v63 = vpop.permute.xlu1 %3489  ;;  %v3783_v11 = vpack.i.bf16 %v4845_v19, %v4862_v39 }
  0xfd   : > { %7227 = vst [vmem:[#allocation63_spill] sm:$0xff] %v4987_v63  ;;  %v3341_v63 = vunpack.i.l.bf16 %v4806_v5 }
  0xfe   : > { %v4989_v9 = vpop.permute.xlu0 %3484  ;;  %3779 = vrot.lane.b32.xlu1 %v4550_v52, %s7128_s27  ;;  %v3798_v52 = vpack.i.bf16 %v4996_v24, %v4878_v4 }
  0xff   : > { %7228 = vst [vmem:[#allocation64_spill] sm:$0xff] %v4989_v9 }
 0x100   : > { %3774 = vrot.lane.b32.xlu0 %v4556_v28, %s7128_s27  ;;  %v5000_v51 = vpop.permute.xlu1 %3499  ;;  %v3793_v28 = vpack.i.bf16 %v4875_v57, %v4890_v42 }
 0x101   : > { %7230 = vst [vmem:[#allocation66_spill] sm:$0xff] %v5000_v51  ;;  %v7257_v51 = vld [vmem:[#allocation12_spill] sm:$0xff] }
 0x102   : > { %v5004_v62 = vpop.permute.xlu0 %3494  ;;  %3789 = vrot.lane.b32.xlu1 %v3788_v53, %s7128_s27  ;;  %v3332_v29 = vunpack.i.h.bf16 %v7257_v51 }
 0x103   : > { %7231 = vst [vmem:[#allocation67_spill] sm:$0xff] %v5004_v62 }
 0x104   : > { %3784 = vrot.lane.b32.xlu0 %v3783_v11, %s7128_s27  ;;  %v5010_v20 = vpop.permute.xlu1 %3509 }
 0x105   : > { %7232 = vst [vmem:[#allocation68_spill] sm:$0xff] %v5010_v20 }
 0x106   : > { %v5014_v55 = vpop.permute.xlu0 %3504  ;;  %3799 = vrot.lane.b32.xlu1 %v3798_v52, %s7128_s27 }
 0x107   : > { %7233 = vst [vmem:[#allocation69_spill] sm:$0xff] %v5014_v55  ;;  %v5030_v55 = vld [vmem:[%s4656_s13 + $0x90] sm:$0xff] }
 0x108   : > { %3794 = vrot.lane.b32.xlu0 %v3793_v28, %s7128_s27  ;;  %v5018_v32 = vpop.permute.xlu1 %3519 }
 0x109   : > { %7234 = vst [vmem:[#allocation70_spill] sm:$0xff] %v5018_v32 }
 0x10a   : > { %v5020_v53 = vpop.permute.xlu0 %3514  ;;  %3809 = vrot.lane.b32.xlu1 %v4575_v0, %s3977_s24  ;;  %v3838_v0 = vpack.i.bf16 %v5030_v55, %v4923_v41  ;;  %v3251_v41 = vunpack.i.l.bf16 %v4639_v44 }
 0x10b   : > { %7235 = vst [vmem:[#allocation71_spill] sm:$0xff] %v5020_v53  ;;  %v3849_v53 = vld [vmem:[%s4084_s30 + $0xd0] sm:$0xff] }
 0x10c   : > { %3804 = vrot.lane.b32.xlu0 %v4581_v13, %s3977_s24  ;;  %v5024_v11 = vpop.permute.xlu1 %3529 }
 0x10d   : > { %7236 = vst [vmem:[#allocation72_spill] sm:$0xff] %v5024_v11  ;;  %v3848_v11 = vld [vmem:[%s4084_s30 + $0x20] sm:$0xff] }
 0x10e   : > { %v5026_v9 = vpop.permute.xlu0 %3524  ;;  %3819 = vrot.lane.b32.xlu1 %v4587_v23, %s3977_s24  ;;  %v3257_v23 = vunpack.i.h.bf16 %v4625_v27 }
 0x10f   : > { %7237 = vst [vmem:[#allocation73_spill] sm:$0xff] %v5026_v9 }
 0x110   : > { %3814 = vrot.lane.b32.xlu0 %v4593_v12, %s3977_s24  ;;  %v5033_v52 = vpop.permute.xlu1 %3539  ;;  %v3256_v12 = vunpack.i.l.bf16 %v4625_v27  ;;  %v3282_v27 = vunpack.i.h.bf16 %v4660_v8  ;;  %v3843_v8 = vld [vmem:[%s4084_s30 + $0x50] sm:$0xff] }
 0x111   : > { %7238 = vst [vmem:[#allocation74_spill] sm:$0xff] %v5033_v52  ;;  %v1420_v39 = vsel %vm1414_vm2, %v3843_v8, %v3257_v23  ;;  %v3847_v52 = vld [vmem:[%s4084_s30 + $0x30] sm:$0xff]  ;;  %v3850_v8 = vld [vmem:[%s4084_s30 + $0xc0] sm:$0xff] }
 0x112   : > { %v5035_v28 = vpop.permute.xlu0 %3534  ;;  %3829 = vrot.lane.b32.xlu1 %v4725_v37, %s3977_s24  ;;  %v3252_v37 = vunpack.i.h.bf16 %v4639_v44  ;;  %v3276_v44 = vunpack.i.l.bf16 %v4664_v2 }
 0x113   : > { %7239 = vst [vmem:[#allocation75_spill] sm:$0xff] %v5035_v28 }
 0x114   : > { %3824 = vrot.lane.b32.xlu0 %v4689_v43, %s3977_s24  ;;  %v5041_v13 = vpop.permute.xlu1 %3549  ;;  %v3272_v43 = vunpack.i.h.bf16 %v4647_v59  ;;  %v3291_v59 = vunpack.i.l.bf16 %v4675_v31  ;;  %v3846_v31 = vld [vmem:[%s4084_s30 + $0x60] sm:$0xff] }
 0x115   : > { %7240 = vst [vmem:[#allocation76_spill] sm:$0xff] %v5041_v13  ;;  %v1421_v28 = vsel %vm1414_vm2, %v3846_v31, %v3261_v56  ;;  %v3852_v31 = vld [vmem:[%s4084_s30 + $0x100] sm:$0xff] }
 0x116   : > { %v5043_v9 = vpop.permute.xlu0 %3544  ;;  %3839 = vrot.lane.b32.xlu1 %v3838_v0, %s3977_s24  ;;  %v1426_v23 = vsel %vm1414_vm2, %v3849_v53, %v3272_v43  ;;  %v335_v53 = vld [vmem:[%s4656_s13 + $0x98] sm:$0x3]  ;;  %v7248_v43 = vld [vmem:[#allocation9_spill] sm:$0xff] }
 0x117   : > { %7241 = vst [vmem:[#allocation77_spill] sm:$0xff] %v5043_v9  ;;  %v3277_v9 = vunpack.i.h.bf16 %v4664_v2  ;;  %v1419_v2 = vsel %vm1414_vm2, %v3844_v26, %v3256_v12  ;;  %v1425_v26 = vsel %vm1414_vm2, %v3850_v8, %v3271_v10  ;;  %v7244_v12 = vld [vmem:[#allocation17_spill] sm:$0xff]  ;;  %v1427_v10 = vsel %vm1414_vm2, %v7248_v43, %v3276_v44  ;;  %v7253_v44 = vld [vmem:[#allocation40_spill] sm:$0xff] }
 0x118   : > { %3834 = vrot.lane.b32.xlu0 %v4715_v7, %s3977_s24  ;;  %v5054_v0 = vpop.permute.xlu1 %3559  ;;  %v3322_v43 = vunpack.i.h.bf16 %v7253_v44  ;;  %s7297_s24 = smov 80  }
 0x119   : > { %7242 = vst [vmem:[#allocation78_spill] sm:$0xff] %v5054_v0  ;;  %v3845_v0 = vld [vmem:[%s4084_s30 + $0x70] sm:$0xff] }
 0x11a   : > { %v5062_v7 = vpop.permute.xlu0 %3554  ;;  %1671 = vrot.lane.b32.xlu1 %v4371_v22, %s7143_s6  ;;  %v1422_v13 = vsel %vm1414_vm2, %v3845_v0, %v3262_v15  ;;  %v1417_v22 = vsel %vm1414_vm2, %v3848_v11, %v3251_v41  ;;  %v3851_v0 = vld [vmem:[%s4084_s30 + $0x110] sm:$0xff]  ;;  %v7247_v41 = vld [vmem:[#allocation34_spill] sm:$0xff] }
 0x11b   : > { %7243 = vst [vmem:[#allocation79_spill] sm:$0xff] %v5062_v7  ;;  %v1418_v7 = vsel %vm1414_vm2, %v3847_v52, %v3252_v37  ;;  %v1430_v56 = vsel %vm1414_vm2, %v3851_v0, %v3282_v27  ;;  %v1429_v52 = vsel %vm1414_vm2, %v3852_v31, %v3281_v14  ;;  %v7246_v37 = vld [vmem:[#allocation10_spill] sm:$0xff]  ;;  %v3302_v32 = vunpack.i.h.bf16 %v7247_v41  ;;  %v7251_v14 = vld [vmem:[#allocation37_spill] sm:$0xff] }
 0x11c   : > { %1669 = vrot.lane.b32.xlu0 %v7244_v12, %s7143_s6  ;;  %v5084_v15 = vpop.permute.xlu1 %3569  ;;  %v1428_v11 = vsel %vm1414_vm2, %v7246_v37, %v3277_v9  ;;  %v1434_v8 = vsel %vm1431_vm3, %v1417_v22, %v3291_v59  ;;  %v1435_v12 = vsel %vm1431_vm3, %v1418_v7, %v3292_v40  ;;  %v7250_v27 = vld [vmem:[#allocation22_spill] sm:$0xff]  ;;  %v3297_v0 = vunpack.i.h.bf16 %v7251_v14  ;;  %v7254_v40 = vld [vmem:[#allocation21_spill] sm:$0xff] }
 0x11d   : > { %7245 = vst [vmem:[#allocation17_spill] sm:$0xff] %v5084_v15  ;;  %v3301_v15 = vunpack.i.l.bf16 %v7247_v41  ;;  %v3296_v9 = vunpack.i.l.bf16 %v7251_v14  ;;  %v7252_v31 = vld [vmem:[#allocation38_spill] sm:$0xff]  ;;  %v3321_v59 = vunpack.i.l.bf16 %v7253_v44  ;;  %v611_v22 = vrot.slane %v5030_v55, 2  ;;  %v7259_v55 = vld [vmem:[#allocation19_spill] sm:$0xff] }
 0x11e   : > { %v5099_v20 = vpop.permute.xlu0 %3564  ;;  %1675 = vrot.lane.b32.xlu1 %v7250_v27, %s7143_s6  ;;  %v3312_v37 = vunpack.i.h.bf16 %v7252_v31  ;;  %v3311_v30 = vunpack.i.l.bf16 %v7252_v31  ;;  %v612_v41 = vrot.slane %v335_v53, 2  ;;  %v1439_v27 = vsel %vm1431_vm3, %v1422_v13, %v3302_v32 }
 0x11f   : > { %7249 = vst [vmem:[#allocation10_spill] sm:$0xff] %v5099_v20  ;;  %v7256_v20 = vld [vmem:[#allocation41_spill] sm:$0xff]  ;;  %v3331_v31 = vunpack.i.l.bf16 %v7257_v51  ;;  %v3342_v44 = vunpack.i.h.bf16 %v4806_v5  ;;  %v1438_v32 = vsel %vm1431_vm3, %v1421_v28, %v3301_v15  ;;  %v1436_v51 = vsel %vm1431_vm3, %v1419_v2, %v3296_v9 }
 0x120   : > { %1673 = vrot.lane.b32.xlu0 %v7254_v40, %s7143_s6  ;;  %v5111_v7 = vpop.permute.xlu1 %3579  ;;  %v3317_v14 = vunpack.i.h.bf16 %v7256_v20  ;;  %v3316_v62 = vunpack.i.l.bf16 %v7256_v20  ;;  %v3336_v40 = vunpack.i.l.bf16 %v4816_v45  ;;  %v1437_v20 = vsel %vm1431_vm3, %v1420_v39, %v3297_v0 }
 0x121   : > { %7255 = vst [vmem:[#allocation34_spill] sm:$0xff] %v5111_v7  ;;  %v1443_v13 = vsel %vm1431_vm3, %v1426_v23, %v3312_v37  ;;  %v1442_v5 = vsel %vm1431_vm3, %v1425_v26, %v3311_v30  ;;  %v1447_v53 = vsel %vm1431_vm3, %v1430_v56, %v3322_v43  ;;  %v1446_v1 = vsel %vm1431_vm3, %v1429_v52, %v3321_v59  ;;  %v5145_v23 = vld [vmem:[%s4656_s13 + $0xa0] sm:$0xff]  ;;  %v337_v26 = vld [vmem:[%s4656_s13 + $0xa8] sm:$0x3]  ;;  %v7265_v43 = vld [vmem:[#allocation27_spill] sm:$0xff] }
 0x122   : > { %v5122_v7 = vpop.permute.xlu0 %3574  ;;  %1679 = vrot.lane.b32.xlu1 %v7259_v55, %s7143_s6  ;;  %v5138_v55 = vsel %vm7148_vm1, %v611_v22, %v612_v41  ;;  %v1444_v39 = vsel %vm1431_vm3, %v1427_v10, %v3316_v62  ;;  %v1445_v28 = vsel %vm1431_vm3, %v1428_v11, %v3317_v14  ;;  %v1451_v2 = vsel %vm1448_vm4, %v1434_v8, %v3331_v31  ;;  %v7262_v62 = vld [vmem:[#allocation29_spill] sm:$0xff]  ;;  %v7263_v10 = vld [vmem:[#allocation52_spill] sm:$0xff] }
 0x123   : > { %7258 = vst [vmem:[#allocation9_spill] sm:$0xff] %v5122_v7  ;;  %v7260_v7 = vld [vmem:[#allocation18_spill] sm:$0xff]  ;;  %7261 = vst [vmem:[#allocation22_spill] sm:$0xff] %v5138_v55  ;;  %v3337_v30 = vunpack.i.h.bf16 %v4816_v45  ;;  %v1452_v15 = vsel %vm1448_vm4, %v1435_v12, %v3332_v29  ;;  %v1455_v56 = vsel %vm1448_vm4, %v1438_v32, %v3341_v63  ;;  %v1456_v52 = vsel %vm1448_vm4, %v1439_v27, %v3342_v44  ;;  %v7264_v29 = vld [vmem:[#allocation53_spill] sm:$0xff] }
 0x124   : > { %1677 = vrot.lane.b32.xlu0 %v7260_v7, %s7143_s6  ;;  %v5135_v48 = vpop.permute.xlu1 %3589  ;;  %v1453_v0 = vsel %vm1448_vm4, %v1436_v51, %v3336_v40  ;;  %v3352_v11 = vunpack.i.h.bf16 %v4822_v50  ;;  %v3351_v45 = vunpack.i.l.bf16 %v4822_v50  ;;  %v3362_v8 = vunpack.i.h.bf16 %v7263_v10 }
 0x125   : > { %v3361_v37 = vunpack.i.l.bf16 %v7263_v10  ;;  %v3357_v12 = vunpack.i.h.bf16 %v7264_v29  ;;  %v3356_v63 = vunpack.i.l.bf16 %v7264_v29  ;;  %v630_v7 = vrot.slane %v5145_v23, 1 }
 0x126   : > { %v5152_v9 = vpop.permute.xlu0 %3584  ;;  %1683 = vrot.lane.b32.xlu1 %v7262_v62, %s7143_s6  ;;  %v631_v22 = vrot.slane %v337_v26, 1  ;;  %v1454_v41 = vsel %vm1448_vm4, %v1437_v20, %v3337_v30  ;;  %v3372_v50 = vunpack.i.h.bf16 %v4856_v34  ;;  %v3371_v27 = vunpack.i.l.bf16 %v4856_v34 }
 0x127   : > { %v654_v14 = vrot.slane %v5145_v23, 2  ;;  %v3382_v31 = vunpack.i.h.bf16 %v4882_v3  ;;  %v3381_v44 = vunpack.i.l.bf16 %v4882_v3  ;;  %v3376_v40 = vunpack.i.l.bf16 %v4892_v21 }
 0x128   : > { %1681 = vrot.lane.b32.xlu0 %v7265_v43, %s7143_s6  ;;  %v5164_v59 = vpop.permute.xlu1 %3599  ;;  %v655_v20 = vrot.slane %v337_v26, 2  ;;  %v1459_v51 = vsel %vm1448_vm4, %v1442_v5, %v3351_v45  ;;  %v1460_v34 = vsel %vm1448_vm4, %v1443_v13, %v3352_v11  ;;  %v1463_v30 = vsel %vm1448_vm4, %v1446_v1, %v3361_v37 }
 0x129   : > { %v3377_v62 = vunpack.i.h.bf16 %v4892_v21  ;;  %v1464_v3 = vsel %vm1448_vm4, %v1447_v53, %v3362_v8  ;;  %v1461_v10 = vsel %vm1448_vm4, %v1444_v39, %v3356_v63  ;;  %v1462_v29 = vsel %vm1448_vm4, %v1445_v28, %v3357_v12  ;;  %v339_v39 = vld [vmem:[%s4656_s13 + $0xb8] sm:$0x3] }
 0x12a   : > { %v5174_v32 = vpop.permute.xlu0 %3594  ;;  %1687 = vrot.lane.b32.xlu1 %v4848_v17, %s7143_s6  ;;  %v5190_v5 = vsel %vm388_vm0, %v630_v7, %v631_v22  ;;  %v1468_v13 = vsel %vm1465_vm5, %v1451_v2, %v3371_v27  ;;  %v1469_v1 = vsel %vm1465_vm5, %v1452_v15, %v3372_v50  ;;  %v3392_v21 = vunpack.i.h.bf16 %v4898_v47  ;;  %v5208_v15 = vld [vmem:[%s4656_s13 + $0xb0] sm:$0xff] }
 0x12b   : > { %v3391_v53 = vunpack.i.l.bf16 %v4898_v47  ;;  %v1472_v26 = vsel %vm1465_vm5, %v1455_v56, %v3381_v44  ;;  %v1473_v28 = vsel %vm1465_vm5, %v1456_v52, %v3382_v31  ;;  %v1470_v11 = vsel %vm1465_vm5, %v1453_v0, %v3376_v40 }
 0x12c   : > { %1685 = vrot.lane.b32.xlu0 %v4845_v19, %s7143_s6  ;;  %v5187_v43 = vpop.permute.xlu1 %3609  ;;  %v5205_v2 = vsel %vm7148_vm1, %v654_v14, %v655_v20  ;;  %v1471_v8 = vsel %vm1465_vm5, %v1454_v41, %v3377_v62  ;;  %v3402_v47 = vunpack.i.h.bf16 %v4906_v36  ;;  %v3401_v56 = vunpack.i.l.bf16 %v4906_v36 }
 0x12d   : > { %v633_v52 = vrot.slane %v5208_v15, 1  ;;  %v3397_v0 = vunpack.i.h.bf16 %v4908_v61  ;;  %v3396_v37 = vunpack.i.l.bf16 %v4908_v61  ;;  %v657_v63 = vrot.slane %v5208_v15, 2 }
 0x12e   : > { %v5200_v45 = vpop.permute.xlu0 %3604  ;;  %1691 = vrot.lane.b32.xlu1 %v4890_v42, %s7143_s6  ;;  %v634_v7 = vrot.slane %v339_v39, 1  ;;  %v1476_v22 = vsel %vm1465_vm5, %v1459_v51, %v3391_v53  ;;  %v1477_v41 = vsel %vm1465_vm5, %v1460_v34, %v3392_v21  ;;  %v3412_v36 = vunpack.i.h.bf16 %v4914_v16 }
 0x12f   : > { %v3411_v50 = vunpack.i.l.bf16 %v4914_v16  ;;  %v3422_v27 = vunpack.i.h.bf16 %v4927_v38  ;;  %v3421_v61 = vunpack.i.l.bf16 %v4927_v38  ;;  %v3416_v14 = vunpack.i.l.bf16 %v4931_v60 }
 0x130   : > { %1689 = vrot.lane.b32.xlu0 %v4887_v33, %s7143_s6  ;;  %v5218_v12 = vpop.permute.xlu1 %3619  ;;  %v658_v44 = vrot.slane %v339_v39, 2  ;;  %v1480_v40 = vsel %vm1465_vm5, %v1463_v30, %v3401_v56  ;;  %v1481_v20 = vsel %vm1465_vm5, %v1464_v3, %v3402_v47  ;;  %v3417_v51 = vunpack.i.h.bf16 %v4931_v60 }
 0x131   : > { %v3431_v16 = vunpack.i.l.bf16 %v4937_v58  ;;  %v1478_v34 = vsel %vm1465_vm5, %v1461_v10, %v3396_v37  ;;  %v1479_v38 = vsel %vm1465_vm5, %v1462_v29, %v3397_v0  ;;  %v3432_v62 = vunpack.i.h.bf16 %v4937_v58 }
 0x132   : > { %v5228_v31 = vpop.permute.xlu0 %3614  ;;  %1695 = vrot.lane.b32.xlu1 %v4878_v4, %s7143_s6  ;;  %v5244_v53 = vsel %vm388_vm0, %v633_v52, %v634_v7  ;;  %v1485_v30 = vsel %vm7147_vm6, %v1468_v13, %v3411_v50  ;;  %v1486_v60 = vsel %vm7147_vm6, %v1469_v1, %v3412_v36  ;;  %v3442_v3 = vunpack.i.h.bf16 %v4945_v6 }
 0x133   : > { %v3441_v10 = vunpack.i.l.bf16 %v4945_v6  ;;  %v1489_v29 = vsel %vm7147_vm6, %v1472_v26, %v3421_v61  ;;  %v1490_v58 = vsel %vm7147_vm6, %v1473_v28, %v3422_v27  ;;  %v1487_v39 = vsel %vm7147_vm6, %v1470_v11, %v3416_v14 }
 0x134   : > { %1693 = vrot.lane.b32.xlu0 %v4875_v57, %s7143_s6  ;;  %v5241_v21 = vpop.permute.xlu1 %3629  ;;  %v5258_v56 = vsel %vm7148_vm1, %v657_v63, %v658_v44  ;;  %v1488_v13 = vsel %vm7147_vm6, %v1471_v8, %v3417_v51  ;;  %v1493_v1 = vsel %vm7147_vm6, %v1476_v22, %v3431_v16  ;;  %v3437_v6 = vunpack.i.h.bf16 %v4948_v35  ;;  %v2309_v22 = vld [vmem:[%s7027_s2] sm:$0xff] }
 0x135   : > { %v3436_v26 = vunpack.i.l.bf16 %v4948_v35  ;;  %v1494_v28 = vsel %vm7147_vm6, %v1477_v41, %v3432_v62  ;;  %v3452_v11 = vunpack.i.h.bf16 %v4953_v54  ;;  %v3451_v52 = vunpack.i.l.bf16 %v4953_v54  ;;  %v2310_v54 = vld [vmem:[%s7027_s2 + $0x8] sm:$0xff]  ;;  %v7266_v44 = vld [vmem:[#allocation61_spill] sm:$0xff] }
 0x136   : > { %v5253_v47 = vpop.permute.xlu0 %3624  ;;  %1699 = vrot.lane.b32.xlu1 %v5138_v55, %s7143_s6  ;;  %v3461_v0 = vunpack.i.l.bf16 %v4964_v25  ;;  %v1497_v8 = vsel %vm7147_vm6, %v1480_v40, %v3441_v10  ;;  %v1498_v63 = vsel %vm7147_vm6, %v1481_v20, %v3442_v3  ;;  %v3462_v35 = vunpack.i.h.bf16 %v4964_v25  ;;  %v7268_v3 = vld [vmem:[#allocation62_spill] sm:$0xff]  ;;  %v7278_v55 = vld [vmem:[#allocation72_spill] sm:$0xff] }
 0x137   : > { %v3456_v7 = vunpack.i.l.bf16 %v4968_v49  ;;  %v3457_v41 = vunpack.i.h.bf16 %v4968_v49  ;;  %v3471_v36 = vunpack.i.l.bf16 %v4972_v18  ;;  %v3085_v25 = vpack.c.bf16 %v2310_v54, %v2309_v22  ;;  %v7271_v54 = vld [vmem:[#allocation66_spill] sm:$0xff] }
 0x138   : > { %1697 = vrot.lane.b32.xlu0 %v4996_v24, %s7143_s6  ;;  %v5270_v37 = vpop.permute.xlu1 %3639  ;;  %v1495_v27 = vsel %vm7147_vm6, %v1478_v34, %v3436_v26  ;;  %v1496_v61 = vsel %vm7147_vm6, %v1479_v38, %v3437_v6  ;;  %v3472_v14 = vunpack.i.h.bf16 %v4972_v18  ;;  %v3481_v40 = vunpack.i.l.bf16 %v7266_v44  ;;  %v7267_v34 = vld [vmem:[#allocation31_spill] sm:$0xff]  ;;  %s7293_s6 = smov 56  }
 0x139   : > { %v7135_v20 = vmov 0.0|0.0   ;;  %v1502_v49 = vsel %vm1499_vm7, %v1485_v30, %v3451_v52  ;;  %v1503_v51 = vsel %vm1499_vm7, %v1486_v60, %v3452_v11  ;;  %v3482_v16 = vunpack.i.h.bf16 %v7266_v44  ;;  %v2311_v60 = vld [vmem:[%s7027_s2 + $0x10] sm:$0xff]  ;;  %v7270_v52 = vld [vmem:[#allocation6_spill] sm:$0xff] }
 0x13a   : > { %v5284_v50 = vpop.permute.xlu0 %3634  ;;  %1719 = vrot.lane.b32.xlu1 %v4681_v46, %s3964_s8  ;;  %3084 = vmatprep.subr.bf16.mxu0 %v7135_v20  ;;  %v1506_v46 = vsel %vm1499_vm7, %v1489_v29, %v3461_v0  ;;  %v1507_v18 = vsel %vm1499_vm7, %v1490_v58, %v3462_v35  ;;  %v1504_v62 = vsel %vm1499_vm7, %v1487_v39, %v3456_v7  ;;  %v3477_v10 = vunpack.i.h.bf16 %v7268_v3  ;;  %v2312_v29 = vld [vmem:[%s7027_s2 + $0x18] sm:$0xff]  ;;  %v7269_v6 = vld [vmem:[#allocation63_spill] sm:$0xff] }
 0x13b   : > { %3123 = vmatprep.subr.bf16.mxu1 %v7135_v20  ;;  %3086 = vmatpush1.bf16.msra.mxu0 %v3085_v25  ;;  %v3476_v30 = vunpack.i.l.bf16 %v7268_v3  ;;  %v1505_v58 = vsel %vm1499_vm7, %v1488_v13, %v3457_v41  ;;  %v1510_v39 = vsel %vm1499_vm7, %v1493_v1, %v3471_v36  ;;  %v3491_v26 = vunpack.i.l.bf16 %v7269_v6  ;;  %v7272_v36 = vld [vmem:[#allocation67_spill] sm:$0xff] }
 0x13c   : > { %1717 = vrot.lane.b32.xlu0 %v7267_v34, %s3964_s8  ;;  %v5300_v38 = vpop.permute.xlu1 %3649  ;;  %3137 = vmatpush1.bf16.msra.mxu1 %v3085_v25  ;;  %v3088_v0 = vpack.c.bf16 %v2312_v29, %v2311_v60  ;;  %v1511_v35 = vsel %vm1499_vm7, %v1494_v28, %v3472_v14  ;;  %v1514_v7 = vsel %vm1499_vm7, %v1497_v8, %v3481_v40  ;;  %v3492_v22 = vunpack.i.h.bf16 %v7269_v6  ;;  %v7273_v34 = vld [vmem:[#allocation5_spill] sm:$0xff]  ;;  %v7274_v14 = vld [vmem:[#allocation68_spill] sm:$0xff]  ;;  %v2314_v60 = vld [vmem:[%s7027_s2 + $0x28] sm:$0xff] }
 0x13d   : > { %3087 = vmatprep.subr.bf16.mxu0 %v7135_v20  ;;  %3124 = vmatprep.subr.bf16.mxu1 %v7135_v20  ;;  %v3501_v13 = vunpack.i.l.bf16 %v7271_v54  ;;  %v1515_v1 = vsel %vm1499_vm7, %v1498_v63, %v3482_v16  ;;  %v3502_v41 = vunpack.i.h.bf16 %v7271_v54  ;;  %v3497_v25 = vunpack.i.h.bf16 %v7272_v36  ;;  %v2313_v16 = vld [vmem:[%s7027_s2 + $0x20] sm:$0xff]  ;;  %v7276_v6 = vld [vmem:[#allocation36_spill] sm:$0xff] }
 0x13e   : > { %v5316_v11 = vpop.permute.xlu0 %3644  ;;  %1723 = vrot.lane.b32.xlu1 %v7270_v52, %s3964_s8  ;;  %v3496_v44 = vunpack.i.l.bf16 %v7272_v36  ;;  %v1512_v28 = vsel %vm1499_vm7, %v1495_v27, %v3476_v30  ;;  %v1513_v8 = vsel %vm1499_vm7, %v1496_v61, %v3477_v10  ;;  %v3512_v40 = vunpack.i.h.bf16 %v7274_v14  ;;  %v7275_v27 = vld [vmem:[#allocation70_spill] sm:$0xff]  ;;  %v7277_v36 = vld [vmem:[#allocation71_spill] sm:$0xff] }
 0x13f   : > { %3089 = vmatpush1.bf16.msra.mxu0 %v3088_v0  ;;  %v3511_v63 = vunpack.i.l.bf16 %v7274_v14  ;;  %v1519_v29 = vsel %vm1516_vm8, %v1502_v49, %v3491_v26  ;;  %v3522_v30 = vunpack.i.h.bf16 %v7275_v27  ;;  %v3521_v61 = vunpack.i.l.bf16 %v7275_v27 }
 0x140   : > { %1721 = vrot.lane.b32.xlu0 %v7273_v34, %s3964_s8  ;;  %v5331_v3 = vpop.permute.xlu1 %3659  ;;  %3138 = vmatpush1.bf16.msra.mxu1 %v3088_v0  ;;  %v3091_v52 = vpack.c.bf16 %v2314_v60, %v2313_v16  ;;  %v1520_v0 = vsel %vm1516_vm8, %v1503_v51, %v3492_v22  ;;  %v1523_v54 = vsel %vm1516_vm8, %v1506_v46, %v3501_v13  ;;  %v3517_v34 = vunpack.i.h.bf16 %v7277_v36  ;;  %v7280_v13 = vld [vmem:[#allocation74_spill] sm:$0xff] }
 0x141   : > { %3090 = vmatprep.subr.bf16.mxu0 %v7135_v20  ;;  %3125 = vmatprep.subr.bf16.mxu1 %v7135_v20  ;;  %v3516_v49 = vunpack.i.l.bf16 %v7277_v36  ;;  %v1524_v26 = vsel %vm1516_vm8, %v1507_v18, %v3502_v41  ;;  %v1521_v14 = vsel %vm1516_vm8, %v1504_v62, %v3496_v44  ;;  %v1522_v27 = vsel %vm1516_vm8, %v1505_v58, %v3497_v25  ;;  %v7279_v20 = vld [vmem:[#allocation35_spill] sm:$0xff]  ;;  %v7284_v36 = vld [vmem:[#allocation78_spill] sm:$0xff] }
 0x142   : > { %v5347_v10 = vpop.permute.xlu0 %3654  ;;  %1727 = vrot.lane.b32.xlu1 %v7276_v6, %s3964_s8  ;;  %v3531_v6 = vunpack.i.l.bf16 %v7278_v55  ;;  %v1527_v51 = vsel %vm1516_vm8, %v1510_v39, %v3511_v63  ;;  %v1528_v46 = vsel %vm1516_vm8, %v1511_v35, %v3512_v40  ;;  %v3532_v22 = vunpack.i.h.bf16 %v7278_v55  ;;  %v2315_v58 = vld [vmem:[%s7027_s2 + $0x30] sm:$0xff] }
 0x143   : > { %3092 = vmatpush1.bf16.msra.mxu0 %v3091_v52  ;;  %v3541_v18 = vunpack.i.l.bf16 %v7280_v13  ;;  %v7281_v62 = vmov 0.0|0.0   ;;  %v1531_v41 = vsel %vm1516_vm8, %v1514_v7, %v3521_v61  ;;  %v1532_v39 = vsel %vm1516_vm8, %v1515_v1, %v3522_v30  ;;  %v7282_v63 = vld [vmem:[#allocation75_spill] sm:$0xff]  ;;  %v7283_v30 = vld [vmem:[#allocation76_spill] sm:$0xff] }
 0x144   : > { %1725 = vrot.lane.b32.xlu0 %v7279_v20, %s3964_s8  ;;  %v5362_v16 = vpop.permute.xlu1 %3669  ;;  %3139 = vmatpush1.bf16.msra.mxu1 %v3091_v52  ;;  %v2316_v20 = vld [vmem:[%s7027_s2 + $0x38] sm:$0xff]  ;;  %v3542_v35 = vunpack.i.h.bf16 %v7280_v13  ;;  %v1529_v44 = vsel %vm1516_vm8, %v1512_v28, %v3516_v49  ;;  %v1530_v40 = vsel %vm1516_vm8, %v1513_v8, %v3517_v34  ;;  %v3537_v60 = vunpack.i.h.bf16 %v7282_v63  ;;  %v7286_v49 = vld [vmem:[#allocation79_spill] sm:$0xff] }
 0x145   : > { %3093 = vmatprep.subr.bf16.mxu0 %v7281_v62  ;;  %3126 = vmatprep.subr.bf16.mxu1 %v7281_v62  ;;  %v3094_v25 = vpack.c.bf16 %v2316_v20, %v2315_v58  ;;  %v3536_v7 = vunpack.i.l.bf16 %v7282_v63  ;;  %v1536_v1 = vsel %vm1533_vm9, %v1519_v29, %v3531_v6  ;;  %v3552_v61 = vunpack.i.h.bf16 %v7283_v30  ;;  %v2317_v6 = vld [vmem:[%s7027_s2 + $0x40] sm:$0xff]  ;;  %v2318_v20 = vld [vmem:[%s7027_s2 + $0x48] sm:$0xff] }
 0x146   : > { %v5378_v55 = vpop.permute.xlu0 %3664  ;;  %1733 = vrot.lane.b32.xlu1 %v5145_v23, %s3964_s8  ;;  %v3551_v52 = vunpack.i.l.bf16 %v7283_v30  ;;  %v3561_v13 = vunpack.i.l.bf16 %v7284_v36  ;;  %v7285_v23 = vld [vmem:[#allocation33_spill] sm:$0xff]  ;;  %v1537_v28 = vsel %vm1533_vm9, %v1520_v0, %v3532_v22  ;;  %v1540_v8 = vsel %vm1533_vm9, %v1523_v54, %v3541_v18 }
 0x147   : > { %3095 = vmatpush1.bf16.msra.mxu0 %v3094_v25  ;;  %v3562_v34 = vunpack.i.h.bf16 %v7284_v36  ;;  %v3556_v29 = vunpack.i.l.bf16 %v7286_v49  ;;  %v1541_v63 = vsel %vm1533_vm9, %v1524_v26, %v3542_v35  ;;  %v3557_v0 = vunpack.i.h.bf16 %v7286_v49  ;;  %v7287_v54 = vld [vmem:[#allocation17_spill] sm:$0xff]  ;;  %v7288_v26 = vld [vmem:[#allocation34_spill] sm:$0xff] }
 0x148   : > { %1729 = vrot.lane.b32.xlu0 %v7285_v23, %s3964_s8  ;;  %v5393_v58 = vpop.permute.xlu1 %3679  ;;  %3140 = vmatpush1.bf16.msra.mxu1 %v3094_v25  ;;  %v3571_v22 = vunpack.i.l.bf16 %v7287_v54  ;;  %v3097_v25 = vpack.c.bf16 %v2318_v20, %v2317_v6  ;;  %v1538_v30 = vsel %vm1533_vm9, %v1521_v14, %v3536_v7  ;;  %v1539_v36 = vsel %vm1533_vm9, %v1522_v27, %v3537_v60  ;;  %v7290_v60 = vld [vmem:[#allocation9_spill] sm:$0xff] }
 0x149   : > { %3096 = vmatprep.subr.bf16.mxu0 %v7281_v62  ;;  %3127 = vmatprep.subr.bf16.mxu1 %v7281_v62  ;;  %v3572_v23 = vunpack.i.h.bf16 %v7287_v54  ;;  %v3581_v35 = vunpack.i.l.bf16 %v7288_v26  ;;  %v1544_v49 = vsel %vm1533_vm9, %v1527_v51, %v3551_v52  ;;  %v1545_v24 = vsel %vm1533_vm9, %v1528_v46, %v3552_v61  ;;  %v2319_v46 = vld [vmem:[%s7027_s2 + $0x50] sm:$0xff] }
 0x14a   : > { %v5409_v18 = vpop.permute.xlu0 %3674  ;;  %1781 = vrot.lane.b32.xlu1 %v5190_v5, %s3965_s9  ;;  %v1548_v4 = vsel %vm1533_vm9, %v1531_v41, %v3561_v13  ;;  %v3582_v57 = vunpack.i.h.bf16 %v7288_v26  ;;  %v7289_v5 = vld [vmem:[#allocation44_spill] sm:$0xff]  ;;  %v1549_v14 = vsel %vm1533_vm9, %v1532_v39, %v3562_v34  ;;  %v1546_v27 = vsel %vm1533_vm9, %v1529_v44, %v3556_v29 }
 0x14b   : > { %3098 = vmatpush1.bf16.msra.mxu0 %v3097_v25  ;;  %v3577_v7 = vunpack.i.h.bf16 %v7290_v60  ;;  %v3576_v51 = vunpack.i.l.bf16 %v7290_v60  ;;  %v2320_v41 = vld [vmem:[%s7027_s2 + $0x58] sm:$0xff]  ;;  %v1547_v61 = vsel %vm1533_vm9, %v1530_v40, %v3557_v0  ;;  %v1553_v39 = vsel %vm1550_vm10, %v1536_v1, %v3571_v22 }
 0x14c   : > { %1765 = vrot.lane.b32.xlu0 %v7289_v5, %s3965_s9  ;;  %v5424_v6 = vpop.permute.xlu1 %3689  ;;  %3141 = vmatpush1.bf16.msra.mxu1 %v3097_v25  ;;  %v3591_v44 = vunpack.i.l.bf16 %v5135_v48  ;;  %v3100_v13 = vpack.c.bf16 %v2320_v41, %v2319_v46  ;;  %v1554_v34 = vsel %vm1550_vm10, %v1537_v28, %v3572_v23  ;;  %v1557_v29 = vsel %vm1550_vm10, %v1540_v8, %v3581_v35  ;;  %v3853_v46 = vld [vmem:[%s4656_s13 + $0x10] sm:$0xff] }
 0x14d   : > { %3099 = vmatprep.subr.bf16.mxu0 %v7281_v62  ;;  %3128 = vmatprep.subr.bf16.mxu1 %v7281_v62  ;;  %v3592_v20 = vunpack.i.h.bf16 %v5135_v48  ;;  %v3601_v40 = vunpack.i.l.bf16 %v5164_v59  ;;  %v1558_v1 = vsel %vm1550_vm10, %v1541_v63, %v3582_v57  ;;  %v3602_v0 = vunpack.i.h.bf16 %v5164_v59  ;;  %v2321_v59 = vld [vmem:[%s7027_s2 + $0x60] sm:$0xff]  ;;  %v2323_v41 = vld [vmem:[%s7027_s2 + $0x70] sm:$0xff] }
 0x14e   : > { %v5440_v52 = vpop.permute.xlu0 %3684  ;;  %1829 = vrot.lane.b32.xlu1 %v5205_v2, %s3966_s10  ;;  %v3597_v54 = vunpack.i.h.bf16 %v5174_v32  ;;  %v3596_v22 = vunpack.i.l.bf16 %v5174_v32  ;;  %v7291_v2 = vld [vmem:[#allocation20_spill] sm:$0xff]  ;;  %v1555_v28 = vsel %vm1550_vm10, %v1538_v30, %v3576_v51  ;;  %v1556_v48 = vsel %vm1550_vm10, %v1539_v36, %v3577_v7  ;;  %v2322_v32 = vld [vmem:[%s7027_s2 + $0x68] sm:$0xff] }
 0x14f   : > { %3101 = vmatpush1.bf16.msra.mxu0 %v3100_v13  ;;  %v3612_v8 = vunpack.i.h.bf16 %v5187_v43  ;;  %v3611_v57 = vunpack.i.l.bf16 %v5187_v43  ;;  %v1561_v63 = vsel %vm1550_vm10, %v1544_v49, %v3591_v44  ;;  %v3622_v30 = vunpack.i.h.bf16 %v5218_v12 }
 0x150   : > { %1813 = vrot.lane.b32.xlu0 %v7291_v2, %s3966_s10  ;;  %v5455_v25 = vpop.permute.xlu1 %3699  ;;  %3142 = vmatpush1.bf16.msra.mxu1 %v3100_v13  ;;  %v3621_v36 = vunpack.i.l.bf16 %v5218_v12  ;;  %v3103_v23 = vpack.c.bf16 %v2322_v32, %v2321_v59  ;;  %v1562_v26 = vsel %vm1550_vm10, %v1545_v24, %v3592_v20  ;;  %v1565_v35 = vsel %vm1550_vm10, %v1548_v4, %v3601_v40 }
 0x151   : > { %3102 = vmatprep.subr.bf16.mxu0 %v7281_v62  ;;  %3129 = vmatprep.subr.bf16.mxu1 %v7281_v62  ;;  %v3617_v49 = vunpack.i.h.bf16 %v5228_v31  ;;  %v3616_v5 = vunpack.i.l.bf16 %v5228_v31  ;;  %v1566_v60 = vsel %vm1550_vm10, %v1549_v14, %v3602_v0  ;;  %v5482_v12 = vsel %vm1550_vm10, %v1546_v27, %v3596_v22 }
 0x152   : > { %v5471_v43 = vpop.permute.xlu0 %3694  ;;  %1877 = vrot.lane.b32.xlu1 %v5208_v15, %s3967_s11  ;;  %v5485_v7 = vsel %vm1550_vm10, %v1547_v61, %v3597_v54  ;;  %v3631_v51 = vunpack.i.l.bf16 %v5241_v21  ;;  %v1570_v4 = vsel %vm1567_vm11, %v1553_v39, %v3611_v57  ;;  %v1571_v31 = vsel %vm1567_vm11, %v1554_v34, %v3612_v8  ;;  %v2324_v61 = vld [vmem:[%s7027_s2 + $0x78] sm:$0xff]  ;;  %v7292_v34 = vld [vmem:[#allocation45_spill] sm:$0xff] }
 0x153   : > { %3104 = vmatpush1.bf16.msra.mxu0 %v3103_v23  ;;  %v3632_v14 = vunpack.i.h.bf16 %v5241_v21  ;;  %v3641_v27 = vunpack.i.l.bf16 %v5270_v37  ;;  %v1574_v44 = vsel %vm1567_vm11, %v1557_v29, %v3621_v36  ;;  %v1575_v39 = vsel %vm1567_vm11, %v1558_v1, %v3622_v30 }
 0x154   : > { %1861 = vrot.lane.b32.xlu0 %v3853_v46, %s3967_s11  ;;  %v5490_v24 = vpop.permute.xlu1 %3709  ;;  %3143 = vmatpush1.bf16.msra.mxu1 %v3103_v23  ;;  %v3642_v13 = vunpack.i.h.bf16 %v5270_v37  ;;  %v3106_v20 = vpack.c.bf16 %v2324_v61, %v2323_v41  ;;  %v1572_v40 = vsel %vm1567_vm11, %v1555_v28, %v3616_v5  ;;  %v1573_v0 = vsel %vm1567_vm11, %v1556_v48, %v3617_v49 }
 0x155   : > { %3105 = vmatprep.subr.bf16.mxu0 %v7281_v62  ;;  %3130 = vmatprep.subr.bf16.mxu1 %v7281_v62  ;;  %v3652_v54 = vunpack.i.h.bf16 %v5300_v38  ;;  %v3651_v29 = vunpack.i.l.bf16 %v5300_v38  ;;  %v1578_v1 = vsel %vm1567_vm11, %v1561_v63, %v3631_v51  ;;  %v3662_v37 = vunpack.i.h.bf16 %v5331_v3 }
 0x156   : > { %v5506_v21 = vpop.permute.xlu0 %3704  ;;  %1909 = vrot.lane.b32.xlu1 %v7292_v34, %s3968_s12  ;;  %v3661_v22 = vunpack.i.l.bf16 %v5331_v3  ;;  %v3656_v2 = vunpack.i.l.bf16 %v5347_v10  ;;  %v1579_v28 = vsel %vm1567_vm11, %v1562_v26, %v3632_v14  ;;  %v5525_v48 = vsel %vm1567_vm11, %v1565_v35, %v3641_v27  ;;  %v2325_v3 = vld [vmem:[%s7027_s2 + $0x80] sm:$0xff]  ;;  %v2327_v27 = vld [vmem:[%s7027_s2 + $0x90] sm:$0xff] }
 0x157   : > { %3107 = vmatpush1.bf16.msra.mxu0 %v3106_v20  ;;  %v3657_v38 = vunpack.i.h.bf16 %v5347_v10  ;;  %v3691_v57 = vunpack.i.l.bf16 %v5424_v6  ;;  %v5537_v59 = vsel %vm1567_vm11, %v1566_v60, %v3642_v13  ;;  %v3637_v32 = vunpack.i.h.bf16 %v5284_v50  ;;  %v7294_v13 = vld [vmem:[#allocation54_spill] sm:$0xff] }
 0x158   : > { %1735 = vrot.lane.b32.xlu0 %v5208_v15, %s3964_s8  ;;  %v5521_v8 = vpop.permute.xlu1 %3719  ;;  %3144 = vmatpush1.bf16.msra.mxu1 %v3106_v20  ;;  %v2326_v15 = vld [vmem:[%s7027_s2 + $0x88] sm:$0xff]  ;;  %v3692_v10 = vunpack.i.h.bf16 %v5424_v6  ;;  %v3636_v36 = vunpack.i.l.bf16 %v5284_v50  ;;  %v1587_v23 = vsel %vm1584_vm12, %v1570_v4, %v3651_v29  ;;  %v1588_v26 = vsel %vm1584_vm12, %v1571_v31, %v3652_v54 }
 0x159   : > { %3108 = vmatprep.subr.bf16.mxu0 %v7281_v62  ;;  %3131 = vmatprep.subr.bf16.mxu1 %v7281_v62  ;;  %v3109_v30 = vpack.c.bf16 %v2326_v15, %v2325_v3  ;;  %v3671_v35 = vunpack.i.l.bf16 %v5362_v16  ;;  %v1591_v49 = vsel %vm1584_vm12, %v1574_v44, %v3661_v22  ;;  %v1592_v6 = vsel %vm1584_vm12, %v1575_v39, %v3662_v37 }
 0x15a   : > { %v5541_v63 = vpop.permute.xlu0 %3714  ;;  %1767 = vrot.lane.b32.xlu1 %v7292_v34, %s3965_s9  ;;  %v1589_v5 = vsel %vm1584_vm12, %v1572_v40, %v3656_v2  ;;  %v3672_v60 = vunpack.i.h.bf16 %v5362_v16  ;;  %v1590_v46 = vsel %vm1584_vm12, %v1573_v0, %v3657_v38  ;;  %v1604_v4 = vsel %vm1601_vm13, %v1587_v23, %v3691_v57  ;;  %v2328_v16 = vld [vmem:[%s7027_s2 + $0x98] sm:$0xff] }
 0x15b   : > { %3110 = vmatpush1.bf16.msra.mxu0 %v3109_v30  ;;  %v1605_v41 = vsel %vm1601_vm13, %v1588_v26, %v3692_v10  ;;  %v3702_v61 = vunpack.i.h.bf16 %v5455_v25  ;;  %v3701_v44 = vunpack.i.l.bf16 %v5455_v25  ;;  %v3112_v34 = vpack.c.bf16 %v2328_v16, %v2327_v27 }
 0x15c   : > { %1925 = vrot.lane.b32.xlu0 %v5244_v53, %s3968_s12  ;;  %v3730_v51 = vpop.permute.xlu1 %3729  ;;  %3145 = vmatpush1.bf16.msra.mxu1 %v3109_v30  ;;  %v1595_v20 = vsel %vm1584_vm12, %v1578_v1, %v3671_v35  ;;  %v3696_v40 = vunpack.i.l.bf16 %v5471_v43  ;;  %v1596_v25 = vsel %vm1584_vm12, %v1579_v28, %v3672_v60  ;;  %v3682_v29 = vunpack.i.h.bf16 %v5393_v58  ;;  %v2330_v28 = vld [vmem:[%s7027_s2 + $0xa8] sm:$0xff] }
 0x15d   : > { %v3732_v31 = vunpack.i.h.bf16 %v3730_v51  ;;  %v3731_v14 = vunpack.i.l.bf16 %v3730_v51  ;;  %3111 = vmatprep.subr.bf16.mxu0 %v7281_v62  ;;  %3132 = vmatprep.subr.bf16.mxu1 %v7281_v62  ;;  %v3697_v37 = vunpack.i.h.bf16 %v5471_v43  ;;  %v3711_v22 = vunpack.i.l.bf16 %v5490_v24  ;;  %v2329_v43 = vld [vmem:[%s7027_s2 + $0xa0] sm:$0xff] }
 0x15e   : > { %v5568_v39 = vpop.permute.xlu0 %3724  ;;  %1957 = vrot.lane.b32.xlu1 %v7294_v13, %s7293_s6  ;;  %v3681_v2 = vunpack.i.l.bf16 %v5393_v58  ;;  %v3677_v38 = vunpack.i.h.bf16 %v5409_v18  ;;  %v1609_v15 = vsel %vm1601_vm13, %v1592_v6, %v3702_v61  ;;  %v3712_v58 = vunpack.i.h.bf16 %v5490_v24 }
 0x15f   : > { %v5576_v0 = vsel %vm7144_vm14, %v1604_v4, %v3731_v14  ;;  %v5579_v54 = vsel %vm7144_vm14, %v1605_v41, %v3732_v31  ;;  %3113 = vmatpush1.bf16.msra.mxu0 %v3112_v34  ;;  %v3115_v30 = vpack.c.bf16 %v2330_v28, %v2329_v43  ;;  %v1606_v23 = vsel %vm1601_vm13, %v1589_v5, %v3696_v40 }
 0x160   : > { %1783 = vrot.lane.b32.xlu0 %v5244_v53, %s3965_s9  ;;  %v3740_v1 = vpop.permute.xlu1 %3739  ;;  %3146 = vmatpush1.bf16.msra.mxu1 %v3112_v34  ;;  %v1608_v53 = vsel %vm1601_vm13, %v1591_v49, %v3701_v44  ;;  %v3676_v49 = vunpack.i.l.bf16 %v5409_v18  ;;  %v1607_v6 = vsel %vm1601_vm13, %v1590_v46, %v3697_v37  ;;  %v1612_v24 = vsel %vm1601_vm13, %v1595_v20, %v3711_v22  ;;  %v2331_v18 = vld [vmem:[%s7027_s2 + $0xb0] sm:$0xff]  ;;  %v2332_v46 = vld [vmem:[%s7027_s2 + $0xb8] sm:$0xff] }
 0x161   : > { %v3742_v57 = vunpack.i.h.bf16 %v3740_v1  ;;  %v3741_v3 = vunpack.i.l.bf16 %v3740_v1  ;;  %3114 = vmatprep.subr.bf16.mxu0 %v7281_v62  ;;  %3133 = vmatprep.subr.bf16.mxu1 %v7281_v62  ;;  %v1613_v16 = vsel %vm1601_vm13, %v1596_v25, %v3712_v58  ;;  %v3722_v41 = vunpack.i.h.bf16 %v5521_v8 }
 0x162   : > { %v3735_v10 = vpop.permute.xlu0 %3734  ;;  %1815 = vrot.lane.b32.xlu1 %v7294_v13, %s3966_s10  ;;  %v3721_v61 = vunpack.i.l.bf16 %v5521_v8  ;;  %v3854_v13 = vld [vmem:[%s4656_s13 + $0x20] sm:$0xff]  ;;  %v3118_v34 = vpack.c.bf16 %v2332_v46, %v2331_v18  ;;  %v1580_v20 = vsel %vm1567_vm11, %v5482_v12, %v3636_v36  ;;  %v1581_v8 = vsel %vm1567_vm11, %v5485_v7, %v3637_v32 }
 0x163   : > { %v3737_v26 = vunpack.i.h.bf16 %v3735_v10  ;;  %v3736_v35 = vunpack.i.l.bf16 %v3735_v10  ;;  %v5604_v60 = vsel %vm7144_vm14, %v1608_v53, %v3741_v3  ;;  %3116 = vmatpush1.bf16.msra.mxu0 %v3115_v30  ;;  %v5612_v4 = vsel %vm7144_vm14, %v1609_v15, %v3742_v57  ;;  %v5658_v32 = vld [vmem:[%s4656_s13 + $0xc0] sm:$0xff] }
 0x164   : > { %1973 = vrot.lane.b32.xlu0 %v5258_v56, %s7293_s6  ;;  %v3750_v51 = vpop.permute.xlu1 %3749  ;;  %3147 = vmatpush1.bf16.msra.mxu1 %v3115_v30  ;;  %v1599_v37 = vsel %vm1584_vm12, %v5525_v48, %v3681_v2  ;;  %v1600_v22 = vsel %vm1584_vm12, %v5537_v59, %v3682_v29  ;;  %v3717_v12 = vunpack.i.h.bf16 %v5541_v63  ;;  %v3716_v50 = vunpack.i.l.bf16 %v5541_v63  ;;  %v341_v2 = vld [vmem:[%s4656_s13 + $0xc8] sm:$0x3]  ;;  %v2333_v59 = vld [vmem:[%s7027_s2 + $0xc0] sm:$0xff] }
 0x165   : > { %v3752_v5 = vunpack.i.h.bf16 %v3750_v51  ;;  %v3751_v31 = vunpack.i.l.bf16 %v3750_v51  ;;  %3117 = vmatprep.subr.bf16.mxu0 %v7281_v62  ;;  %v5622_v14 = vsel %vm7144_vm14, %v1606_v23, %v3736_v35  ;;  %v5625_v27 = vsel %vm7144_vm14, %v1607_v6, %v3737_v26  ;;  %3134 = vmatprep.subr.bf16.mxu1 %v7281_v62  ;;  %v7296_v51 = vld [vmem:[#allocation42_spill] sm:$0xff] }
 0x166   : > { %v5630_v44 = vpop.permute.xlu0 %3744  ;;  %2005 = vrot.lane.b32.xlu1 %v3854_v13, %s3970_s14  ;;  %v1597_v36 = vsel %vm1584_vm12, %v1580_v20, %v3676_v49  ;;  %v1598_v1 = vsel %vm1584_vm12, %v1581_v8, %v3677_v38  ;;  %v1616_v63 = vsel %vm1601_vm13, %v1599_v37, %v3721_v61  ;;  %v1617_v29 = vsel %vm1601_vm13, %v1600_v22, %v3722_v41 }
 0x167   : > { %v5644_v40 = vsel %vm7144_vm14, %v1612_v24, %v3751_v31  ;;  %v5647_v25 = vsel %vm7144_vm14, %v1613_v16, %v3752_v5  ;;  %3119 = vmatpush1.bf16.msra.mxu0 %v3118_v34  ;;  %v636_v38 = vrot.slane %v5658_v32, 1  ;;  %v1614_v10 = vsel %vm1601_vm13, %v1597_v36, %v3716_v50  ;;  %v2335_v5 = vld [vmem:[%s7027_s2 + $0xd0] sm:$0xff] }
 0x168   : > { %1831 = vrot.lane.b32.xlu0 %v5258_v56, %s3966_s10  ;;  %v3760_v7 = vpop.permute.xlu1 %3759  ;;  %3148 = vmatpush1.bf16.msra.mxu1 %v3118_v34  ;;  %v2334_v56 = vld [vmem:[%s7027_s2 + $0xc8] sm:$0xff]  ;;  %v1615_v30 = vsel %vm1601_vm13, %v1598_v1, %v3717_v12  ;;  %v637_v26 = vrot.slane %v341_v2, 1  ;;  %v3979_v31 = vmov 0.0   ;;  %v660_v20 = vrot.slane %v5658_v32, 2 }
 0x169   : > { %v3762_v57 = vunpack.i.h.bf16 %v3760_v7  ;;  %v3761_v48 = vunpack.i.l.bf16 %v3760_v7  ;;  %3120 = vmatprep.subr.bf16.mxu0 %v7281_v62  ;;  %3135 = vmatprep.subr.bf16.mxu1 %v7281_v62  ;;  %v3121_v43 = vpack.c.bf16 %v2334_v56, %v2333_v59 }
 0x16a   : > { %v3755_v3 = vpop.permute.xlu0 %3754  ;;  %1863 = vrot.lane.b32.xlu1 %v3854_v13, %s3967_s11  ;;  %v638_v13 = vsel %vm388_vm0, %v636_v38, %v637_v26 }
 0x16b   : > { %v3757_v28 = vunpack.i.h.bf16 %v3755_v3  ;;  %v3756_v53 = vunpack.i.l.bf16 %v3755_v3  ;;  %v1633_v15 = vsel %vm7144_vm14, %v1616_v63, %v3761_v48  ;;  %v1634_v58 = vsel %vm7144_vm14, %v1617_v29, %v3762_v57  ;;  %3122 = vmatpush1.bf16.msra.mxu0 %v3121_v43 }
 0x16c   : > { %2021 = vrot.lane.b32.xlu0 %v5658_v32, %s3970_s14  ;;  %v3770_v23 = vpop.permute.xlu1 %3769  ;;  %3149 = vmatpush1.bf16.msra.mxu1 %v3121_v43 }
 0x16d   : > { %v3772_v35 = vunpack.i.h.bf16 %v3770_v23  ;;  %v3771_v62 = vunpack.i.l.bf16 %v3770_v23  ;;  %v1631_v49 = vsel %vm7144_vm14, %v1614_v10, %v3756_v53  ;;  %v1632_v6 = vsel %vm7144_vm14, %v1615_v30, %v3757_v28  ;;  %2443 = vmatprep.subr.mxu0 %v3979_v31  ;;  %3136 = vmatprep.subr.mxu1 %v3979_v31 }
 0x16e   : > { %v5683_v24 = vpop.permute.xlu0 %3764  ;;  %2053 = vrot.lane.b32.xlu1 %v7296_v51, %s7295_s5  ;;  %vm1652_vm14 = vcmask 982016  }
 0x16f   : > { %v1638_v18 = vsel %vm1635_vm15, %v5576_v0, %v3771_v62  ;;  %v1639_v46 = vsel %vm1635_vm15, %v5579_v54, %v3772_v35  ;;  %2444 = vmatpush1.msra.mxu0 %v2335_v5  ;;  %v661_v0 = vrot.slane %v341_v2, 2 }
 0x170   : > { %1879 = vrot.lane.b32.xlu0 %v5658_v32, %s3967_s11  ;;  %v3780_v16 = vpop.permute.xlu1 %3779  ;;  %3150 = vmatpush1.msra.mxu1 %v2335_v5 }
 0x171   : > { %v3782_v41 = vunpack.i.h.bf16 %v3780_v16  ;;  %v3781_v61 = vunpack.i.l.bf16 %v3780_v16 }
 0x172   : > { %v3775_v34 = vpop.permute.xlu0 %3774  ;;  %1737 = vrot.lane.b32.xlu1 %v5658_v32, %s3964_s8 }
 0x173   : > { %v3777_v8 = vunpack.i.h.bf16 %v3775_v34  ;;  %v3776_v37 = vunpack.i.l.bf16 %v3775_v34  ;;  %v1642_v54 = vsel %vm1635_vm15, %v5604_v60, %v3781_v61  ;;  %v1643_v22 = vsel %vm1635_vm15, %v5612_v4, %v3782_v41  ;;  %v342_v41 = vld [vmem:[%s4656_s13 + $0xd0] sm:$0xff]  ;;  %v343_v61 = vld [vmem:[%s4656_s13 + $0xd8] sm:$0x3] }
 0x174   : > { %2069 = vrot.lane.b32.xlu0 %v638_v13, %s7295_s5  ;;  %v3790_v12 = vpop.permute.xlu1 %3789  ;;  %v662_v60 = vsel %vm7148_vm1, %v660_v20, %v661_v0 }
 0x175   : > { %v3792_v50 = vunpack.i.h.bf16 %v3790_v12  ;;  %v3791_v7 = vunpack.i.l.bf16 %v3790_v12  ;;  %v1640_v36 = vsel %vm1635_vm15, %v5622_v14, %v3776_v37  ;;  %v1641_v32 = vsel %vm1635_vm15, %v5625_v27, %v3777_v8 }
 0x176   : > { %v5709_v1 = vpop.permute.xlu0 %3784  ;;  %1927 = vrot.lane.b32.xlu1 %v638_v13, %s3968_s12 }
 0x177   : > { %v1646_v4 = vsel %vm1635_vm15, %v5644_v40, %v3791_v7  ;;  %v1647_v57 = vsel %vm1635_vm15, %v5647_v25, %v3792_v50 }
 0x178   : > { %1911 = vrot.lane.b32.xlu0 %v7296_v51, %s3968_s12  ;;  %v3800_v48 = vpop.permute.xlu1 %3799 }
 0x179   : > { %v3802_v14 = vunpack.i.h.bf16 %v3800_v48  ;;  %v3801_v2 = vunpack.i.l.bf16 %v3800_v48 }
 0x17a   : > { %v3795_v59 = vpop.permute.xlu0 %3794  ;;  %2117 = vrot.lane.b32.xlu1 %v662_v60, %s7297_s24 }
 0x17b   : > { %v3797_v27 = vunpack.i.h.bf16 %v3795_v59  ;;  %v3796_v56 = vunpack.i.l.bf16 %v3795_v59  ;;  %v1650_v63 = vsel %vm1635_vm15, %v1633_v15, %v3801_v2  ;;  %v1651_v29 = vsel %vm1635_vm15, %v1634_v58, %v3802_v14  ;;  %v7313_v59 = vld [vmem:[#allocation43_spill] sm:$0xff] }
 0x17c   : > { %2101 = vrot.lane.b32.xlu0 %v4845_v19, %s7297_s24  ;;  %v3810_v40 = vpop.permute.xlu1 %3809 }
 0x17d   : > { %v3812_v25 = vunpack.i.h.bf16 %v3810_v40  ;;  %v3811_v3 = vunpack.i.l.bf16 %v3810_v40  ;;  %v1648_v38 = vsel %vm1635_vm15, %v1631_v49, %v3796_v56  ;;  %v1649_v43 = vsel %vm1635_vm15, %v1632_v6, %v3797_v27 }
 0x17e   : > { %v5726_v28 = vpop.permute.xlu0 %3804  ;;  %1785 = vrot.lane.b32.xlu1 %v638_v13, %s3965_s9  ;;  %v664_v40 = vrot.slane %v343_v61, 2 }
 0x17f   : > { %v5730_v53 = vsel %vm1652_vm14, %v1638_v18, %v3811_v3  ;;  %v5733_v15 = vsel %vm1652_vm14, %v1639_v46, %v3812_v25 }
 0x180   : > { %7298 = vst [vmem:[#allocation37_spill] sm:$0xff] %v5730_v53  ;;  %7299 = vst [vmem:[#allocation38_spill] sm:$0xff] %v5733_v15  ;;  %1769 = vrot.lane.b32.xlu0 %v7296_v51, %s3965_s9  ;;  %v3820_v58 = vpop.permute.xlu1 %3819 }
 0x181   : > { %v3822_v10 = vunpack.i.h.bf16 %v3820_v58  ;;  %v3821_v30 = vunpack.i.l.bf16 %v3820_v58 }
 0x182   : > { %v3815_v23 = vpop.permute.xlu0 %3814  ;;  %1975 = vrot.lane.b32.xlu1 %v662_v60, %s7293_s6 }
 0x183   : > { %v3817_v26 = vunpack.i.h.bf16 %v3815_v23  ;;  %v3816_v35 = vunpack.i.l.bf16 %v3815_v23  ;;  %v5739_v62 = vsel %vm1652_vm14, %v1642_v54, %v3821_v30  ;;  %v5742_v49 = vsel %vm1652_vm14, %v1643_v22, %v3822_v10 }
 0x184   : > { %7300 = vst [vmem:[#allocation40_spill] sm:$0xff] %v5739_v62  ;;  %7301 = vst [vmem:[#allocation21_spill] sm:$0xff] %v5742_v49  ;;  %1959 = vrot.lane.b32.xlu0 %v4845_v19, %s7293_s6  ;;  %v3830_v6 = vpop.permute.xlu1 %3829  ;;  %v639_v54 = vrot.slane %v342_v41, 1  ;;  %v640_v22 = vrot.slane %v343_v61, 1  ;;  %v345_v61 = vld [vmem:[%s4656_s13 + $0xe8] sm:$0x3] }
 0x185   : > { %v3832_v5 = vunpack.i.h.bf16 %v3830_v6  ;;  %v3831_v31 = vunpack.i.l.bf16 %v3830_v6  ;;  %v5747_v18 = vsel %vm1652_vm14, %v1640_v36, %v3816_v35  ;;  %v5750_v46 = vsel %vm1652_vm14, %v1641_v32, %v3817_v26  ;;  %v3855_v32 = vld [vmem:[%s4656_s13 + $0x30] sm:$0xff]  ;;  %v3856_v6 = vld [vmem:[%s4656_s13 + $0x40] sm:$0xff] }
 0x186   : > { %7302 = vst [vmem:[#allocation41_spill] sm:$0xff] %v5747_v18  ;;  %7303 = vst [vmem:[#allocation12_spill] sm:$0xff] %v5750_v46  ;;  %v5752_v16 = vpop.permute.xlu0 %3824  ;;  %1833 = vrot.lane.b32.xlu1 %v662_v60, %s3966_s10  ;;  %v641_v48 = vsel %vm388_vm0, %v639_v54, %v640_v22  ;;  %v7336_v46 = vld [vmem:[#allocation14_spill] sm:$0xff] }
 0x187   : > { %v5758_v13 = vsel %vm1652_vm14, %v1646_v4, %v3831_v31  ;;  %v5761_v34 = vsel %vm1652_vm14, %v1647_v57, %v3832_v5  ;;  %v344_v31 = vld [vmem:[%s4656_s13 + $0xe0] sm:$0xff] }
 0x188   : > { %7304 = vst [vmem:[#allocation19_spill] sm:$0xff] %v5758_v13  ;;  %7305 = vst [vmem:[#allocation18_spill] sm:$0xff] %v5761_v34  ;;  %1817 = vrot.lane.b32.xlu0 %v4845_v19, %s3966_s10  ;;  %v3840_v20 = vpop.permute.xlu1 %3839  ;;  %v7343_v34 = vld [vmem:[#allocation51_spill] sm:$0xff]  ;;  %v3859_v13 = vld [vmem:[%s4084_s30 + $0xa0] sm:$0xff] }
 0x189   : > { %v3842_v0 = vunpack.i.h.bf16 %v3840_v20  ;;  %v3841_v8 = vunpack.i.l.bf16 %v3840_v20  ;;  %v642_v20 = vrot.slane %v344_v31, 1  ;;  %v3346_v15 = vunpack.i.l.bf16 %v7343_v34 }
 0x18a   : > { %v3835_v37 = vpop.permute.xlu0 %3834  ;;  %2023 = vrot.lane.b32.xlu1 %v342_v41, %s3970_s14 }
 0x18b   : > { %v3837_v12 = vunpack.i.h.bf16 %v3835_v37  ;;  %v3836_v50 = vunpack.i.l.bf16 %v3835_v37  ;;  %v5767_v7 = vsel %vm1652_vm14, %v1650_v63, %v3841_v8  ;;  %v5770_v36 = vsel %vm1652_vm14, %v1651_v29, %v3842_v0  ;;  %v7328_v37 = vld [vmem:[#allocation49_spill] sm:$0xff] }
 0x18c   : > { %7306 = vst [vmem:[#allocation29_spill] sm:$0xff] %v5767_v7  ;;  %7307 = vst [vmem:[#allocation52_spill] sm:$0xff] %v5770_v36  ;;  %2007 = vrot.lane.b32.xlu0 %v3855_v32, %s3970_s14  ;;  %v5774_v19 = vpop.permute.xlu1 %1671  ;;  %v663_v29 = vrot.slane %v342_v41, 2  ;;  %v643_v0 = vrot.slane %v345_v61, 1  ;;  %v347_v36 = vld [vmem:[%s4656_s13 + $0xf8] sm:$0x3] }
 0x18d   : > { %7308 = vst [vmem:[#allocation53_spill] sm:$0xff] %v5774_v19  ;;  %v5777_v60 = vsel %vm1652_vm14, %v1648_v38, %v3836_v50  ;;  %v5780_v4 = vsel %vm1652_vm14, %v1649_v43, %v3837_v12  ;;  %v666_v50 = vrot.slane %v344_v31, 2  ;;  %v646_v62 = vrot.slane %v347_v36, 1  ;;  %v3857_v7 = vld [vmem:[%s4656_s13 + $0x50] sm:$0xff] }
 0x18e   : > { %7309 = vst [vmem:[#allocation27_spill] sm:$0xff] %v5777_v60  ;;  %7310 = vst [vmem:[#allocation61_spill] sm:$0xff] %v5780_v4  ;;  %v5782_v57 = vpop.permute.xlu0 %1669  ;;  %1881 = vrot.lane.b32.xlu1 %v342_v41, %s3967_s11  ;;  %v665_v38 = vsel %vm7148_vm1, %v663_v29, %v664_v40  ;;  %v644_v22 = vsel %vm388_vm0, %v642_v20, %v643_v0  ;;  %v3246_v4 = vunpack.i.l.bf16 %v7336_v46 }
 0x190   : > { %1865 = vrot.lane.b32.xlu0 %v3855_v32, %s3967_s11  ;;  %v5787_v14 = vpop.permute.xlu1 %1675  ;;  %v667_v32 = vrot.slane %v345_v61, 2 }
 0x191   : > { %7311 = vst [vmem:[#allocation31_spill] sm:$0xff] %v5787_v14  ;;  %v3858_v14 = vld [vmem:[%s4084_s30] sm:$0xff] }
 0x192   : > { %v5789_v2 = vpop.permute.xlu0 %1673  ;;  %2071 = vrot.lane.b32.xlu1 %v641_v48, %s7295_s5  ;;  %v668_v40 = vsel %vm7148_vm1, %v666_v50, %v667_v32  ;;  %v1415_v53 = vsel %vm1414_vm2, %v3858_v14, %v3246_v4  ;;  %v7349_v14 = vld [vmem:[#allocation25_spill] sm:$0xff] }
 0x193   : > { %7312 = vst [vmem:[#allocation62_spill] sm:$0xff] %v5789_v2  ;;  %v7345_v2 = vld [vmem:[#allocation58_spill] sm:$0xff] }
 0x194   : > { %2055 = vrot.lane.b32.xlu0 %v7313_v59, %s7295_s5  ;;  %v5794_v27 = vpop.permute.xlu1 %1679 }
 0x195   : > { %7314 = vst [vmem:[#allocation63_spill] sm:$0xff] %v5794_v27 }
 0x196   : > { %v5796_v56 = vpop.permute.xlu0 %1677  ;;  %1913 = vrot.lane.b32.xlu1 %v7313_v59, %s3968_s12 }
 0x197   : > { %7315 = vst [vmem:[#allocation6_spill] sm:$0xff] %v5796_v56 }
 0x198   : > { %1739 = vrot.lane.b32.xlu0 %v342_v41, %s3964_s8  ;;  %v5801_v63 = vpop.permute.xlu1 %1683 }
 0x199   : > { %7316 = vst [vmem:[#allocation66_spill] sm:$0xff] %v5801_v63 }
 0x19a   : > { %v5803_v25 = vpop.permute.xlu0 %1681  ;;  %2103 = vrot.lane.b32.xlu1 %v4848_v17, %s7297_s24 }
 0x19b   : > { %7317 = vst [vmem:[#allocation67_spill] sm:$0xff] %v5803_v25 }
 0x19c   : > { %1929 = vrot.lane.b32.xlu0 %v641_v48, %s3968_s12  ;;  %v5808_v3 = vpop.permute.xlu1 %1687 }
 0x19d   : > { %7318 = vst [vmem:[#allocation5_spill] sm:$0xff] %v5808_v3 }
 0x19e   : > { %v5811_v43 = vpop.permute.xlu0 %1685  ;;  %1771 = vrot.lane.b32.xlu1 %v7313_v59, %s3965_s9  ;;  %v7348_v59 = vld [vmem:[#allocation24_spill] sm:$0xff] }
 0x19f   : > { %v3426_v3 = vunpack.i.l.bf16 %v7348_v59 }
 0x1a0   : > { %2119 = vrot.lane.b32.xlu0 %v665_v38, %s7297_s24  ;;  %v5816_v58 = vpop.permute.xlu1 %1691 }
 0x1a1   : > { %7319 = vst [vmem:[#allocation68_spill] sm:$0xff] %v5816_v58  ;;  %v7344_v58 = vld [vmem:[#allocation55_spill] sm:$0xff] }
 0x1a2   : > { %v5818_v10 = vpop.permute.xlu0 %1689  ;;  %1961 = vrot.lane.b32.xlu1 %v4848_v17, %s7293_s6 }
 0x1a3   : > { %7320 = vst [vmem:[#allocation70_spill] sm:$0xff] %v5818_v10  ;;  %v7346_v10 = vld [vmem:[#allocation23_spill] sm:$0xff] }
 0x1a4   : > { %1787 = vrot.lane.b32.xlu0 %v641_v48, %s3965_s9  ;;  %v5823_v30 = vpop.permute.xlu1 %1695 }
 0x1a5   : > { %7321 = vst [vmem:[#allocation36_spill] sm:$0xff] %v5823_v30  ;;  %v7338_v30 = vld [vmem:[#allocation50_spill] sm:$0xff] }
 0x1a6   : > { %v5825_v23 = vpop.permute.xlu0 %1693  ;;  %1819 = vrot.lane.b32.xlu1 %v4848_v17, %s3966_s10 }
 0x1a7   : > { %7322 = vst [vmem:[#allocation71_spill] sm:$0xff] %v5825_v23 }
 0x1a8   : > { %1977 = vrot.lane.b32.xlu0 %v665_v38, %s7293_s6  ;;  %v5830_v26 = vpop.permute.xlu1 %1699 }
 0x1a9   : > { %7323 = vst [vmem:[#allocation72_spill] sm:$0xff] %v5830_v26 }
 0x1aa   : > { %v5832_v35 = vpop.permute.xlu0 %1697  ;;  %2009 = vrot.lane.b32.xlu1 %v3856_v6, %s3970_s14 }
 0x1ab   : > { %7324 = vst [vmem:[#allocation35_spill] sm:$0xff] %v5832_v35 }
 0x1ac   : > { %1835 = vrot.lane.b32.xlu0 %v665_v38, %s3966_s10  ;;  %v5837_v5 = vpop.permute.xlu1 %1719 }
 0x1ad   : > { %7325 = vst [vmem:[#allocation74_spill] sm:$0xff] %v5837_v5 }
 0x1ae   : > { %v5840_v41 = vpop.permute.xlu0 %1717  ;;  %1867 = vrot.lane.b32.xlu1 %v3856_v6, %s3967_s11 }
 0x1b0   : > { %2025 = vrot.lane.b32.xlu0 %v344_v31, %s3970_s14  ;;  %v5845_v17 = vpop.permute.xlu1 %1723 }
 0x1b1   : > { %7326 = vst [vmem:[#allocation75_spill] sm:$0xff] %v5845_v17  ;;  %v3366_v17 = vunpack.i.l.bf16 %v7344_v58 }
 0x1b2   : > { %v5847_v8 = vpop.permute.xlu0 %1721  ;;  %2057 = vrot.lane.b32.xlu1 %v7328_v37, %s7295_s5 }
 0x1b3   : > { %7327 = vst [vmem:[#allocation76_spill] sm:$0xff] %v5847_v8 }
 0x1b4   : > { %1883 = vrot.lane.b32.xlu0 %v344_v31, %s3967_s11  ;;  %v5852_v54 = vpop.permute.xlu1 %1727 }
 0x1b5   : > { %7329 = vst [vmem:[#allocation78_spill] sm:$0xff] %v5852_v54  ;;  %v7337_v54 = vld [vmem:[#allocation30_spill] sm:$0xff] }
 0x1b6   : > { %v5855_v12 = vpop.permute.xlu0 %1725  ;;  %1741 = vrot.lane.b32.xlu1 %v344_v31, %s3964_s8  ;;  %v3266_v27 = vunpack.i.l.bf16 %v7337_v54 }
 0x1b7   : > { %7330 = vst [vmem:[#allocation33_spill] sm:$0xff] %v5855_v12  ;;  %v7341_v12 = vld [vmem:[#allocation46_spill] sm:$0xff] }
 0x1b8   : > { %2073 = vrot.lane.b32.xlu0 %v644_v22, %s7295_s5  ;;  %v5859_v48 = vpop.permute.xlu1 %1733  ;;  %v3326_v56 = vunpack.i.l.bf16 %v7341_v12  ;;  %v1423_v8 = vsel %vm1414_vm2, %v3859_v13, %v3266_v27  ;;  %v3446_v13 = vunpack.i.l.bf16 %v7349_v14  ;;  %v7350_v27 = vld [vmem:[#allocation60_spill] sm:$0xff] }
 0x1b9   : > { %v3466_v19 = vunpack.i.l.bf16 %v7350_v27  ;;  %v7354_v27 = vld [vmem:[#allocation77_spill] sm:$0xff] }
 0x1ba   : > { %v5861_v29 = vpop.permute.xlu0 %1729  ;;  %1931 = vrot.lane.b32.xlu1 %v644_v22, %s3968_s12  ;;  %v3546_v14 = vunpack.i.l.bf16 %v7354_v27 }
 0x1bb   : > { %7331 = vst [vmem:[#allocation79_spill] sm:$0xff] %v5861_v29 }
 0x1bc   : > { %1915 = vrot.lane.b32.xlu0 %v7328_v37, %s3968_s12  ;;  %v5867_v38 = vpop.permute.xlu1 %1781 }
 0x1be   : > { %v5869_v6 = vpop.permute.xlu0 %1765  ;;  %2121 = vrot.lane.b32.xlu1 %v668_v40, %s7297_s24 }
 0x1c0   : > { %2105 = vrot.lane.b32.xlu0 %v4887_v33, %s7297_s24  ;;  %v5874_v31 = vpop.permute.xlu1 %1829 }
 0x1c2   : > { %v5876_v61 = vpop.permute.xlu0 %1813  ;;  %1789 = vrot.lane.b32.xlu1 %v644_v22, %s3965_s9  ;;  %v346_v22 = vld [vmem:[%s4656_s13 + $0xf0] sm:$0xff] }
 0x1c3   : > { %v645_v26 = vrot.slane %v346_v22, 1 }
 0x1c4   : > { %1773 = vrot.lane.b32.xlu0 %v7328_v37, %s3965_s9  ;;  %v5881_v20 = vpop.permute.xlu1 %1877  ;;  %v3386_v37 = vunpack.i.l.bf16 %v7345_v2 }
 0x1c6   : > { %v5883_v0 = vpop.permute.xlu0 %1861  ;;  %1979 = vrot.lane.b32.xlu1 %v668_v40, %s7293_s6 }
 0x1c8   : > { %1963 = vrot.lane.b32.xlu0 %v4887_v33, %s7293_s6  ;;  %v5888_v50 = vpop.permute.xlu1 %1909 }
 0x1ca   : > { %v5890_v32 = vpop.permute.xlu0 %1735  ;;  %1837 = vrot.lane.b32.xlu1 %v668_v40, %s3966_s10 }
 0x1cb   : > { %7332 = vst [vmem:[#allocation17_spill] sm:$0xff] %v5890_v32 }
 0x1cc   : > { %1821 = vrot.lane.b32.xlu0 %v4887_v33, %s3966_s10  ;;  %v5896_v49 = vpop.permute.xlu1 %1767  ;;  %v5910_v33 = vsel %vm388_vm0, %v645_v26, %v646_v62  ;;  %v7339_v26 = vld [vmem:[#allocation32_spill] sm:$0xff] }
 0x1cd   : > { %7333 = vst [vmem:[#allocation34_spill] sm:$0xff] %v5896_v49  ;;  %v3286_v18 = vunpack.i.l.bf16 %v7339_v26  ;;  %v670_v49 = vrot.slane %v347_v36, 2  ;;  %v7352_v36 = vld [vmem:[#allocation69_spill] sm:$0xff] }
 0x1ce   : > { %v5899_v63 = vpop.permute.xlu0 %1925  ;;  %2027 = vrot.lane.b32.xlu1 %v346_v22, %s3970_s14  ;;  %v3506_v59 = vunpack.i.l.bf16 %v7352_v36 }
 0x1cf   : > { %v1432_v32 = vsel %vm1431_vm3, %v1415_v53, %v3286_v18  ;;  %v7351_v18 = vld [vmem:[#allocation64_spill] sm:$0xff] }
 0x1d0   : > { %2011 = vrot.lane.b32.xlu0 %v3857_v7, %s3970_s14  ;;  %v5904_v29 = vpop.permute.xlu1 %1957  ;;  %v1449_v4 = vsel %vm1448_vm4, %v1432_v32, %v3326_v56 }
 0x1d1   : > { %v1466_v53 = vsel %vm1465_vm5, %v1449_v4, %v3366_v17  ;;  %v3586_v4 = vunpack.i.l.bf16 %v5152_v9 }
 0x1d2   : > { %v5906_v25 = vpop.permute.xlu0 %1783  ;;  %1885 = vrot.lane.b32.xlu1 %v346_v22, %s3967_s11 }
 0x1d3   : > { %7334 = vst [vmem:[#allocation44_spill] sm:$0xff] %v5906_v25  ;;  %v3406_v25 = vunpack.i.l.bf16 %v7346_v10 }
 0x1d4   : > { %1869 = vrot.lane.b32.xlu0 %v3857_v7, %s3967_s11  ;;  %v5913_v40 = vpop.permute.xlu1 %1815  ;;  %v7340_v7 = vld [vmem:[#allocation39_spill] sm:$0xff] }
 0x1d5   : > { %7335 = vst [vmem:[#allocation9_spill] sm:$0xff] %v5913_v40  ;;  %v3306_v60 = vunpack.i.l.bf16 %v7340_v7  ;;  %v669_v40 = vrot.slane %v346_v22, 2  ;;  %v1483_v56 = vsel %vm7147_vm6, %v1466_v53, %v3406_v25  ;;  %v3626_v53 = vunpack.i.l.bf16 %v5253_v47 }
 0x1d6   : > { %v5915_v35 = vpop.permute.xlu0 %1973  ;;  %2075 = vrot.lane.b32.xlu1 %v5910_v33, %s7295_s5  ;;  %v1500_v25 = vsel %vm1499_vm7, %v1483_v56, %v3446_v13  ;;  %v2157_v56 = vsel %vm1414_vm2, %v7296_v51, %v5811_v43 }
 0x1d7   : > { %v1440_v5 = vsel %vm1431_vm3, %v1423_v8, %v3306_v60  ;;  %v7353_v8 = vld [vmem:[#allocation73_spill] sm:$0xff]  ;;  %v5969_v36 = vsel %vm7148_vm1, %v669_v40, %v670_v49  ;;  %v3646_v49 = vunpack.i.l.bf16 %v5316_v11 }
 0x1d8   : > { %2059 = vrot.lane.b32.xlu0 %v7338_v30, %s7295_s5  ;;  %v5923_v62 = vpop.permute.xlu1 %2005  ;;  %v3526_v32 = vunpack.i.l.bf16 %v7353_v8 }
 0x1da   : > { %v5928_v23 = vpop.permute.xlu0 %1831  ;;  %1917 = vrot.lane.b32.xlu1 %v7338_v30, %s3968_s12 }
 0x1db   : > { %7342 = vst [vmem:[#allocation20_spill] sm:$0xff] %v5928_v23 }
 0x1dc   : > { %1743 = vrot.lane.b32.xlu0 %v346_v22, %s3964_s8  ;;  %v5941_v23 = vpop.permute.xlu1 %1863  ;;  %v3486_v22 = vunpack.i.l.bf16 %v7351_v18 }
 0x1dd   : > { %7347 = vst [vmem:[#allocation45_spill] sm:$0xff] %v5941_v23  ;;  %v1457_v23 = vsel %vm1448_vm4, %v1440_v5, %v3346_v15  ;;  %v7355_v5 = vld [vmem:[#allocation10_spill] sm:$0xff] }
 0x1de   : > { %v5949_v2 = vpop.permute.xlu0 %2021  ;;  %2107 = vrot.lane.b32.xlu1 %v4890_v42, %s7297_s24  ;;  %v1474_v60 = vsel %vm1465_vm5, %v1457_v23, %v3386_v37  ;;  %v3566_v17 = vunpack.i.l.bf16 %v7355_v5  ;;  %v3606_v37 = vunpack.i.l.bf16 %v5200_v45 }
 0x1df   : > { %v1491_v15 = vsel %vm7147_vm6, %v1474_v60, %v3426_v3  ;;  %v1517_v3 = vsel %vm1516_vm8, %v1500_v25, %v3486_v22 }
 0x1e0   : > { %1933 = vrot.lane.b32.xlu0 %v5910_v33, %s3968_s12  ;;  %v5963_v10 = vpop.permute.xlu1 %2053  ;;  %v1508_v23 = vsel %vm1499_vm7, %v1491_v15, %v3466_v19  ;;  %v1534_v40 = vsel %vm1533_vm9, %v1517_v3, %v3526_v32  ;;  %v3666_v19 = vunpack.i.l.bf16 %v5378_v55  ;;  %v2173_v32 = vsel %vm1431_vm3, %v2157_v56, %v5859_v48 }
 0x1e1   : > { %v1525_v60 = vsel %vm1516_vm8, %v1508_v23, %v3506_v59  ;;  %v1551_v22 = vsel %vm1550_vm10, %v1534_v40, %v3566_v17  ;;  %v7356_v23 = vld [vmem:[#allocation7_spill] sm:$0xff]  ;;  %v2189_v43 = vsel %vm1448_vm4, %v2173_v32, %v5867_v38  ;;  %v3786_v40 = vunpack.i.l.bf16 %v5709_v1 }
 0x1e2   : > { %v5975_v27 = vpop.permute.xlu0 %1879  ;;  %1775 = vrot.lane.b32.xlu1 %v7338_v30, %s3965_s9  ;;  %v1542_v13 = vsel %vm1533_vm9, %v1525_v60, %v3546_v14  ;;  %v1568_v14 = vsel %vm1567_vm11, %v1551_v22, %v3606_v37  ;;  %v2149_v51 = vsel %vm1414_vm2, %v7356_v23, %v5782_v57  ;;  %v2205_v37 = vsel %vm1465_vm5, %v2189_v43, %v5874_v31  ;;  %v3860_v43 = vld [vmem:[%s4656_s13 + $0x60] sm:$0xff] }
 0x1e3   : > { %v1559_v59 = vsel %vm1550_vm10, %v1542_v13, %v3586_v4  ;;  %v1585_v17 = vsel %vm1584_vm12, %v1568_v14, %v3646_v49  ;;  %v3706_v4 = vunpack.i.l.bf16 %v5506_v21  ;;  %v2165_v48 = vsel %vm1431_vm3, %v2149_v51, %v5840_v41 }
 0x1e4   : > { %2123 = vrot.lane.b32.xlu0 %v5969_v36, %s7297_s24  ;;  %v5990_v15 = vpop.permute.xlu1 %1737  ;;  %v1576_v25 = vsel %vm1567_vm11, %v1559_v59, %v3626_v53  ;;  %v3746_v57 = vunpack.i.l.bf16 %v5630_v44  ;;  %v2181_v38 = vsel %vm1448_vm4, %v2165_v48, %v5869_v6  ;;  %v2221_v60 = vsel %vm7147_vm6, %v2205_v37, %v5881_v20  ;;  %v348_v37 = vld [vmem:[%s4656_s13 + $0x100] sm:$0xff] }
 0x1e5   : > { %v1593_v53 = vsel %vm1584_vm12, %v1576_v25, %v3666_v19  ;;  %v3686_v41 = vunpack.i.l.bf16 %v5440_v52  ;;  %v2197_v31 = vsel %vm1465_vm5, %v2181_v38, %v5876_v61  ;;  %v2237_v13 = vsel %vm1499_vm7, %v2221_v60, %v5899_v63 }
 0x1e6   : > { %v2070_v3 = vpop.permute.xlu0 %2069  ;;  %1965 = vrot.lane.b32.xlu1 %v4890_v42, %s7293_s6  ;;  %v3726_v6 = vunpack.i.l.bf16 %v5568_v39  ;;  %v3826_v19 = vunpack.i.l.bf16 %v5752_v16  ;;  %v2213_v20 = vsel %vm7147_vm6, %v2197_v31, %v5883_v0  ;;  %v1610_v61 = vsel %vm1601_vm13, %v1593_v53, %v3706_v4 }
 0x1e7   : > { %v3766_v63 = vunpack.i.l.bf16 %v5683_v24  ;;  %v2229_v22 = vsel %vm1499_vm7, %v2213_v20, %v5888_v50  ;;  %v3806_v0 = vunpack.i.l.bf16 %v5726_v28  ;;  %vm7357_vm6 = vcmask 850944  }
 0x1e8   : > { %1791 = vrot.lane.b32.xlu0 %v5910_v33, %s3965_s9  ;;  %v6019_v49 = vpop.permute.xlu1 %1927  ;;  %v2253_v33 = vsel %vm1516_vm8, %v2237_v13, %v5915_v35  ;;  %v2245_v35 = vsel %vm1516_vm8, %v2229_v22, %v5904_v29  ;;  %v1627_v14 = vsel %vm7357_vm6, %v1610_v61, %v3746_v57  ;;  %v1602_v25 = vsel %vm1601_vm13, %v1585_v17, %v3686_v41  ;;  %v349_v57 = vld [vmem:[%s4656_s13 + $0x108] sm:$0x3] }
 0x1e9   : > { %v2269_v59 = vsel %vm1533_vm9, %v2253_v33, %v5949_v2  ;;  %v2261_v50 = vsel %vm1533_vm9, %v2245_v35, %v5923_v62  ;;  %v1644_v23 = vsel %vm1635_vm15, %v1627_v14, %v3786_v40  ;;  %v648_v60 = vrot.slane %v348_v37, 1  ;;  %v7358_v40 = vld [vmem:[#allocation47_spill] sm:$0xff] }
 0x1ea   : > { %v6033_v56 = vpop.permute.xlu0 %1911  ;;  %1823 = vrot.lane.b32.xlu1 %v4890_v42, %s3966_s10  ;;  %v2285_v32 = vsel %vm1550_vm10, %v2269_v59, %v2070_v3  ;;  %v2277_v29 = vsel %vm1550_vm10, %v2261_v50, %v5963_v10  ;;  %v1619_v3 = vsel %vm7357_vm6, %v1602_v25, %v3726_v6  ;;  %v1661_v17 = vsel %vm1652_vm14, %v1644_v23, %v3826_v19  ;;  %v3861_v25 = vld [vmem:[%s4084_s30 + $0x10] sm:$0xff] }
 0x1eb   : > { %v1636_v4 = vsel %vm1635_vm15, %v1619_v3, %v3766_v63  ;;  %v649_v41 = vrot.slane %v349_v57, 1  ;;  %v672_v19 = vrot.slane %v348_v37, 2  ;;  %v673_v20 = vrot.slane %v349_v57, 2  ;;  %v3862_v50 = vld [vmem:[%s4084_s30 + $0xb0] sm:$0xff]  ;;  %s248_s30 = sand.u32 1, %s3937_s16  }
 0x1ec   : > { %1981 = vrot.lane.b32.xlu0 %v5969_v36, %s7293_s6  ;;  %v2118_v42 = vpop.permute.xlu1 %2117  ;;  %v1653_v10 = vsel %vm1652_vm14, %v1636_v4, %v3806_v0  ;;  %v3247_v33 = vunpack.i.h.bf16 %v7336_v46  ;;  %v3267_v61 = vunpack.i.h.bf16 %v7337_v54  ;;  %v3287_v22 = vunpack.i.h.bf16 %v7339_v26  ;;  %v7363_v4 = vld [vmem:[#allocation60_spill] sm:$0xff] }
 0x1ed   : > { %v2301_v2 = vsel %vm1567_vm11, %v2285_v32, %v2118_v42  ;;  %v650_v13 = vsel %vm388_vm0, %v648_v60, %v649_v41  ;;  %v3307_v59 = vunpack.i.h.bf16 %v7340_v7  ;;  %v3327_v0 = vunpack.i.h.bf16 %v7341_v12  ;;  %v7359_v42 = vld [vmem:[#allocation58_spill] sm:$0xff]  ;;  %v7360_v12 = vld [vmem:[#allocation23_spill] sm:$0xff] }
 0x1ee   : > { %v2102_v51 = vpop.permute.xlu0 %2101  ;;  %2013 = vrot.lane.b32.xlu1 %v3860_v43, %s3970_s14  ;;  %2970 = vmatprep.mubr.msk.f32.mxu1 %vm1584_vm12, %v2301_v2  ;;  %v3347_v35 = vunpack.i.h.bf16 %v7343_v34  ;;  %v3367_v46 = vunpack.i.h.bf16 %v7344_v58  ;;  %v3387_v54 = vunpack.i.h.bf16 %v7359_v42  ;;  %v6104_v14 = vsel %vm7148_vm1, %v672_v19, %v673_v20  ;;  %v7364_v19 = vld [vmem:[#allocation69_spill] sm:$0xff] }
 0x1ef   : > { %v2293_v62 = vsel %vm1567_vm11, %v2277_v29, %v2102_v51  ;;  %2496 = vmatmul.mubr.f32.vlgmr.msra.gmra.mrb[0].mxu1 %v1661_v17  ;;  %v1416_v26 = vsel %vm1414_vm2, %v3861_v25, %v3247_v33  ;;  %v1424_v7 = vsel %vm1414_vm2, %v3862_v50, %v3267_v61  ;;  %v3407_v2 = vunpack.i.h.bf16 %v7360_v12  ;;  %v7361_v29 = vld [vmem:[#allocation24_spill] sm:$0xff]  ;;  %v7371_v50 = vld [vmem:[#allocation74_spill] sm:$0xff] }
 0x1f0   : > { %1839 = vrot.lane.b32.xlu0 %v5969_v36, %s3966_s10  ;;  %2962 = vmatprep.mubr.msk.f32.mxu0 %vm1584_vm12, %v2293_v62  ;;  %v6068_v48 = vpop.permute.xlu1 %1785  ;;  %v1433_v58 = vsel %vm1431_vm3, %v1416_v26, %v3287_v22  ;;  %v1441_v23 = vsel %vm1431_vm3, %v1424_v7, %v3307_v59  ;;  %v3427_v51 = vunpack.i.h.bf16 %v7361_v29  ;;  %v3507_v20 = vunpack.i.h.bf16 %v7364_v19  ;;  %v7366_v22 = vld [vmem:[#allocation77_spill] sm:$0xff]  ;;  %v7369_v25 = vld [vmem:[#allocation56_spill] sm:$0xff] }
 0x1f1   : > { %2456 = vmatmul.mubr.f32.vlgmr.msra.gmra.mrb[0].mxu0 %v1653_v10  ;;  %v1450_v17 = vsel %vm1448_vm4, %v1433_v58, %v3327_v0  ;;  %v1458_v62 = vsel %vm1448_vm4, %v1441_v23, %v3347_v35  ;;  %v3467_v10 = vunpack.i.h.bf16 %v7363_v4  ;;  %v3527_v33 = vunpack.i.h.bf16 %v7353_v8  ;;  %v7368_v35 = vld [vmem:[#allocation8_spill] sm:$0xff]  ;;  %v7372_v58 = vld [vmem:[#allocation34_spill] sm:$0xff] }
 0x1f2   : > { %v6071_v53 = vpop.permute.xlu0 %1769  ;;  %1871 = vrot.lane.b32.xlu1 %v3860_v43, %s3967_s11  ;;  %v7362_v43 = vld [vmem:[#allocation25_spill] sm:$0xff]  ;;  %v1467_v60 = vsel %vm1465_vm5, %v1450_v17, %v3367_v46  ;;  %v1475_v41 = vsel %vm1465_vm5, %v1458_v62, %v3387_v54  ;;  %vm7365_vm6 = vcmask 326656   ;;  %v3547_v59 = vunpack.i.h.bf16 %v7366_v22 }
 0x1f3   : > { %v3447_v3 = vunpack.i.h.bf16 %v7362_v43  ;;  %v1484_v61 = vsel %vm7365_vm6, %v1467_v60, %v3407_v2  ;;  %v3567_v0 = vunpack.i.h.bf16 %v7355_v5  ;;  %vm7370_vm1 = vmmov %vm7365_vm6  ;;  %v3607_v8 = vunpack.i.h.bf16 %v5200_v45 }
 0x1f4   : > { %2029 = vrot.lane.b32.xlu0 %v348_v37, %s3970_s14  ;;  %v6076_v38 = vpop.permute.xlu1 %1975  ;;  %v1492_v54 = vsel %vm7370_vm1, %v1475_v41, %v3427_v51  ;;  %v3647_v2 = vunpack.i.h.bf16 %v5316_v11  ;;  %v3687_v45 = vunpack.i.h.bf16 %v5440_v52  ;;  %v3727_v11 = vunpack.i.h.bf16 %v5568_v39 }
 0x1f5   : > { %v1501_v26 = vsel %vm1499_vm7, %v1484_v61, %v3447_v3  ;;  %v1509_v5 = vsel %vm1499_vm7, %v1492_v54, %v3467_v10  ;;  %v7373_v3 = vld [vmem:[#allocation9_spill] sm:$0xff]  ;;  %v3587_v60 = vunpack.i.h.bf16 %v5152_v9  ;;  %v3767_v41 = vunpack.i.h.bf16 %v5683_v24  ;;  %v7376_v61 = vld [vmem:[#allocation43_spill] sm:$0xff] }
 0x1f6   : > { %v6078_v36 = vpop.permute.xlu0 %1959  ;;  %2061 = vrot.lane.b32.xlu1 %v7358_v40, %s7295_s5  ;;  %v1526_v51 = vsel %vm1516_vm8, %v1509_v5, %v3507_v20  ;;  %v7374_v10 = vld [vmem:[#allocation45_spill] sm:$0xff]  ;;  %v3807_v39 = vunpack.i.h.bf16 %v5726_v28  ;;  %v3627_v9 = vunpack.i.h.bf16 %v5253_v47  ;;  %vm7379_vm6 = vcmask 850944  }
 0x1f7   : > { %v1543_v62 = vsel %vm1533_vm9, %v1526_v51, %v3547_v59  ;;  %v350_v51 = vld [vmem:[%s4656_s13 + $0x110] sm:$0xff] }
 0x1f8   : > { %1887 = vrot.lane.b32.xlu0 %v348_v37, %s3967_s11  ;;  %v6083_v31 = vpop.permute.xlu1 %1833  ;;  %v1560_v5 = vsel %vm1550_vm10, %v1543_v62, %v3587_v60 }
 0x1fa   : > { %v6086_v6 = vpop.permute.xlu0 %1817  ;;  %1745 = vrot.lane.b32.xlu1 %v348_v37, %s3964_s8  ;;  %v3487_v37 = vunpack.i.h.bf16 %v7351_v18  ;;  %v7367_v18 = vld [vmem:[#allocation53_spill] sm:$0xff] }
 0x1fb   : > { %v2150_v42 = vsel %vm1414_vm2, %v7368_v35, %v7367_v18  ;;  %v3667_v35 = vunpack.i.h.bf16 %v5378_v55 }
 0x1fc   : > { %2077 = vrot.lane.b32.xlu0 %v650_v13, %s7295_s5  ;;  %v6092_v63 = vpop.permute.xlu1 %2023  ;;  %v2166_v7 = vsel %vm1431_vm3, %v2150_v42, %v7371_v50  ;;  %v1518_v12 = vsel %vm1516_vm8, %v1501_v26, %v3487_v37  ;;  %v7378_v42 = vld [vmem:[#allocation44_spill] sm:$0xff] }
 0x1fd   : > { %v2182_v23 = vsel %vm1448_vm4, %v2166_v7, %v7372_v58  ;;  %v1535_v43 = vsel %vm1533_vm9, %v1518_v12, %v3527_v33  ;;  %v7375_v33 = vld [vmem:[#allocation5_spill] sm:$0xff]  ;;  %v7380_v50 = vld [vmem:[#allocation20_spill] sm:$0xff]  ;;  %v3747_v12 = vunpack.i.h.bf16 %v5630_v44 }
 0x1fe   : > { %v6098_v32 = vpop.permute.xlu0 %2007  ;;  %1935 = vrot.lane.b32.xlu1 %v650_v13, %s3968_s12  ;;  %v2198_v17 = vsel %vm1465_vm5, %v2182_v23, %v7373_v3  ;;  %v1552_v4 = vsel %vm1550_vm10, %v1535_v43, %v3567_v0  ;;  %v2158_v22 = vsel %vm1414_vm2, %v7376_v61, %v7375_v33  ;;  %v1577_v23 = vsel %vm1567_vm11, %v1560_v5, %v3627_v9  ;;  %v351_v3 = vld [vmem:[%s4656_s13 + $0x118] sm:$0x3] }
 0x1ff   : > { %v2214_v37 = vsel %vm7370_vm1, %v2198_v17, %v7374_v10  ;;  %v1569_v52 = vsel %vm1567_vm11, %v1552_v4, %v3607_v8  ;;  %v3707_v8 = vunpack.i.h.bf16 %v5506_v21  ;;  %v3827_v43 = vunpack.i.h.bf16 %v5752_v16  ;;  %v3863_v10 = vld [vmem:[%s4656_s13 + $0x70] sm:$0xff] }
 0x200   : > { %1919 = vrot.lane.b32.xlu0 %v7358_v40, %s3968_s12  ;;  %v6113_v34 = vpop.permute.xlu1 %1881  ;;  %v2230_v19 = vsel %vm1499_vm7, %v2214_v37, %v6033_v56  ;;  %v1586_v20 = vsel %vm1584_vm12, %v1569_v52, %v3647_v2  ;;  %v7377_v56 = vld [vmem:[#allocation17_spill] sm:$0xff]  ;;  %v651_v4 = vrot.slane %v350_v51, 1  ;;  %v675_v33 = vrot.slane %v350_v51, 2 }
 0x201   : > { %v2246_v59 = vsel %vm1516_vm8, %v2230_v19, %v6078_v36  ;;  %v1603_v24 = vsel %vm1601_vm13, %v1586_v20, %v3687_v45  ;;  %v2174_v18 = vsel %vm1431_vm3, %v2158_v22, %v7377_v56  ;;  %v7381_v19 = vld [vmem:[#allocation48_spill] sm:$0xff]  ;;  %v676_v61 = vrot.slane %v351_v3, 2 }
 0x202   : > { %v6123_v57 = vpop.permute.xlu0 %1865  ;;  %2125 = vrot.lane.b32.xlu1 %v6104_v14, %s7297_s24  ;;  %v2262_v28 = vsel %vm1533_vm9, %v2246_v59, %v6098_v32  ;;  %v2190_v36 = vsel %vm1448_vm4, %v2174_v18, %v7378_v42  ;;  %v1620_v47 = vsel %vm7379_vm6, %v1603_v24, %v3727_v11  ;;  %v652_v11 = vrot.slane %v351_v3, 1  ;;  %v7383_v18 = vld [vmem:[#allocation70_spill] sm:$0xff]  ;;  %v7385_v42 = vld [vmem:[#allocation57_spill] sm:$0xff] }
 0x203   : > { %v2206_v7 = vsel %vm1465_vm5, %v2190_v36, %v7380_v50  ;;  %v1637_v55 = vsel %vm1635_vm15, %v1620_v47, %v3767_v41  ;;  %v7387_v47 = vld [vmem:[#allocation15_spill] sm:$0xff]  ;;  %v352_v3 = vld [vmem:[%s4656_s13 + $0x120] sm:$0xff] }
 0x204   : > { %2109 = vrot.lane.b32.xlu0 %v7369_v25, %s7297_s24  ;;  %v6139_v46 = vpop.permute.xlu1 %2071  ;;  %v2222_v2 = vsel %vm7370_vm1, %v2206_v7, %v5975_v27  ;;  %v1654_v21 = vsel %vm1652_vm14, %v1637_v55, %v3807_v39  ;;  %v1594_v27 = vsel %vm1584_vm12, %v1577_v23, %v3667_v35  ;;  %v653_v60 = vsel %vm388_vm0, %v651_v4, %v652_v11 }
 0x205   : > { %v2238_v44 = vsel %vm1499_vm7, %v2222_v2, %v6019_v49 }
 0x206   : > { %v2056_v29 = vpop.permute.xlu0 %2055  ;;  %1793 = vrot.lane.b32.xlu1 %v650_v13, %s3965_s9 }
 0x207   : > { %v2278_v54 = vsel %vm1550_vm10, %v2262_v28, %v2056_v29  ;;  %v3787_v29 = vunpack.i.h.bf16 %v5709_v1  ;;  %v1611_v1 = vsel %vm1601_vm13, %v1594_v27, %v3707_v8  ;;  %vm7382_vm13 = vcmask 1045504   ;;  %v7384_v28 = vld [vmem:[#allocation49_spill] sm:$0xff] }
 0x208   : > { %1777 = vrot.lane.b32.xlu0 %v7358_v40, %s3965_s9  ;;  %v6164_v13 = vpop.permute.xlu1 %1913  ;;  %v1628_v16 = vsel %vm7379_vm6, %v1611_v1, %v3747_v12  ;;  %v677_v9 = vsel %vm7382_vm13, %v675_v33, %v676_v61  ;;  %v2159_v35 = vsel %vm1414_vm2, %v7384_v28, %v7383_v18  ;;  %v7395_v18 = vld [vmem:[#allocation31_spill] sm:$0xff]  ;;  %v7396_v28 = vld [vmem:[#allocation16_spill] sm:$0xff] }
 0x20a   : > { %v6178_v0 = vpop.permute.xlu0 %1739  ;;  %1983 = vrot.lane.b32.xlu1 %v6104_v14, %s7293_s6 }
 0x20c   : > { %1967 = vrot.lane.b32.xlu0 %v7369_v25, %s7293_s6  ;;  %v2104_v26 = vpop.permute.xlu1 %2103 }
 0x20d   : > { %v2294_v32 = vsel %vm1567_vm11, %v2278_v54, %v2104_v26  ;;  %v2175_v54 = vsel %vm1431_vm3, %v2159_v35, %v5990_v15  ;;  %v7386_v26 = vld [vmem:[#allocation62_spill] sm:$0xff]  ;;  %v2152_v35 = vsel %vm1414_vm2, %v7396_v28, %v7395_v18 }
 0x20e   : > { %v6204_v58 = vpop.permute.xlu0 %1929  ;;  %1841 = vrot.lane.b32.xlu1 %v6104_v14, %s3966_s10  ;;  %2963 = vmatprep.mubr.msk.f32.mxu0 %vm1584_vm12, %v2294_v32  ;;  %v2254_v14 = vsel %vm1516_vm8, %v2238_v44, %v6076_v38  ;;  %v2151_v8 = vsel %vm1414_vm2, %v7387_v47, %v7386_v26  ;;  %v2191_v50 = vsel %vm1448_vm4, %v2175_v54, %v6068_v48  ;;  %v7388_v32 = vld [vmem:[#allocation76_spill] sm:$0xff]  ;;  %v354_v26 = vld [vmem:[%s4656_s13 + $0x130] sm:$0xff] }
 0x20f   : > { %2461 = vmatmul.mubr.f32.gmra.mrb[2].mxu0 %v1654_v21  ;;  %v2270_v49 = vsel %vm1533_vm9, %v2254_v14, %v6092_v63  ;;  %v2167_v55 = vsel %vm1431_vm3, %v2151_v8, %v7388_v32  ;;  %v2207_v5 = vsel %vm1465_vm5, %v2191_v50, %v6083_v31  ;;  %v7391_v14 = vld [vmem:[#allocation19_spill] sm:$0xff]  ;;  %v355_v47 = vld [vmem:[%s4656_s13 + $0x138] sm:$0x3] }
 0x210   : > { %1825 = vrot.lane.b32.xlu0 %v7369_v25, %s3966_s10  ;;  %v6221_v45 = vpop.permute.xlu1 %1771  ;;  %v2286_v17 = vsel %vm1550_vm10, %v2270_v49, %v6139_v46  ;;  %v1645_v25 = vsel %vm1635_vm15, %v1628_v16, %v3787_v29  ;;  %v2183_v12 = vsel %vm1448_vm4, %v2167_v55, %v6071_v53  ;;  %vm7390_vm15 = vmmov %vm7370_vm1  ;;  %v353_v49 = vld [vmem:[%s4656_s13 + $0x128] sm:$0x3]  ;;  %v680_v16 = vrot.slane %v352_v3, 1  ;;  %v7398_v8 = vld [vmem:[#allocation75_spill] sm:$0xff] }
 0x211   : > { %v1662_v63 = vsel %vm1652_vm14, %v1645_v25, %v3827_v43  ;;  %vm7389_vm14 = vmmov %vm7370_vm1  ;;  %v2199_v48 = vsel %vm1465_vm5, %v2183_v12, %v6086_v6  ;;  %v3864_v25 = vld [vmem:[%s4656_s13 + $0x80] sm:$0xff]  ;;  %v2168_v50 = vsel %vm1431_vm3, %v2152_v35, %v7398_v8  ;;  %v689_v12 = vrot.slane %v355_v47, 1 }
 0x212   : > { %v2120_v62 = vpop.permute.xlu0 %2119  ;;  %2031 = vrot.lane.b32.xlu1 %v350_v51, %s3970_s14  ;;  %v2223_v15 = vsel %vm7389_vm14, %v2207_v5, %v6113_v34  ;;  %v2215_v31 = vsel %vm7390_vm15, %v2199_v48, %v6123_v57  ;;  %vm7394_vm1 = vmmov %vm7382_vm13  ;;  %v688_v5 = vrot.slane %v354_v26, 1 }
 0x213   : > { %v2302_v38 = vsel %vm1567_vm11, %v2286_v17, %v2120_v62  ;;  %v2239_v21 = vsel %vm1499_vm7, %v2223_v15, %v6204_v58  ;;  %v2231_v34 = vsel %vm1499_vm7, %v2215_v31, %v6164_v13  ;;  %v7392_v17 = vld [vmem:[#allocation37_spill] sm:$0xff]  ;;  %vm7399_vm6 = vmmov %vm7389_vm14 }
 0x214   : > { %2015 = vrot.lane.b32.xlu0 %v3863_v10, %s3970_s14  ;;  %2971 = vmatprep.mubr.msk.f32.mxu1 %vm1584_vm12, %v2302_v38  ;;  %v1962_v37 = vpop.permute.xlu1 %1961  ;;  %v681_v38 = vrot.slane %v353_v49, 1  ;;  %vm7401_vm13 = vmmov %vm7399_vm6 }
 0x215   : > { %2501 = vmatmul.mubr.f32.gmra.mrb[2].mxu1 %v1662_v63  ;;  %v2247_v6 = vsel %vm1516_vm8, %v2231_v34, %v1962_v37  ;;  %vm7403_vm14 = vmmov %vm7394_vm1 }
 0x216   : > { %v6237_v46 = vpop.permute.xlu0 %1787  ;;  %1889 = vrot.lane.b32.xlu1 %v350_v51, %s3967_s11 }
 0x218   : > { %1873 = vrot.lane.b32.xlu0 %v3863_v10, %s3967_s11  ;;  %v6242_v52 = vpop.permute.xlu1 %1819 }
 0x21a   : > { %v1978_v41 = vpop.permute.xlu0 %1977  ;;  %2079 = vrot.lane.b32.xlu1 %v653_v60, %s7295_s5 }
 0x21b   : > { %v2255_v23 = vsel %vm1516_vm8, %v2239_v21, %v1978_v41  ;;  %v684_v41 = vrot.slane %v353_v49, 2  ;;  %v3865_v21 = vld [vmem:[%s4656_s13 + $0x90] sm:$0xff] }
 0x21c   : > { %2063 = vrot.lane.b32.xlu0 %v7381_v19, %s7295_s5  ;;  %v2010_v20 = vpop.permute.xlu1 %2009  ;;  %v592_v31 = vrot.slane %v3865_v21, 1 }
 0x21d   : > { %v2263_v44 = vsel %vm1533_vm9, %v2247_v6, %v2010_v20  ;;  %v7393_v20 = vld [vmem:[#allocation59_spill] sm:$0xff] }
 0x21e   : > { %v6247_v39 = vpop.permute.xlu0 %1835  ;;  %1747 = vrot.lane.b32.xlu1 %v350_v51, %s3964_s8 }
 0x220   : > { %1731 = vrot.lane.b32.xlu0 %v3863_v10, %s3964_s8  ;;  %v6251_v22 = vpop.permute.xlu1 %1867  ;;  %v682_v10 = vsel %vm388_vm0, %v680_v16, %v681_v38 }
 0x222   : > { %v2026_v59 = vpop.permute.xlu0 %2025  ;;  %1937 = vrot.lane.b32.xlu1 %v653_v60, %s3968_s12 }
 0x223   : > { %v2271_v29 = vsel %vm1533_vm9, %v2255_v23, %v2026_v59  ;;  %v7400_v23 = vld [vmem:[#allocation68_spill] sm:$0xff] }
 0x224   : > { %1921 = vrot.lane.b32.xlu0 %v7381_v19, %s3968_s12  ;;  %v2058_v24 = vpop.permute.xlu1 %2057  ;;  %v2160_v34 = vsel %vm1414_vm2, %v7338_v30, %v7400_v23 }
 0x225   : > { %v2279_v27 = vsel %vm1550_vm10, %v2263_v44, %v2058_v24 }
 0x226   : > { %v6257_v56 = vpop.permute.xlu0 %1883  ;;  %2127 = vrot.lane.b32.xlu1 %v677_v9, %s7297_s24 }
 0x228   : > { %2111 = vrot.lane.b32.xlu0 %v7385_v42, %s7297_s24  ;;  %v6265_v36 = vpop.permute.xlu1 %1741 }
 0x22a   : > { %v2074_v7 = vpop.permute.xlu0 %2073  ;;  %1795 = vrot.lane.b32.xlu1 %v653_v60, %s3965_s9  ;;  %v683_v60 = vrot.slane %v352_v3, 2 }
 0x22b   : > { %v2287_v58 = vsel %vm1550_vm10, %v2271_v29, %v2074_v7  ;;  %v2184_v7 = vsel %vm1448_vm4, %v2168_v50, %v6221_v45 }
 0x22c   : > { %1779 = vrot.lane.b32.xlu0 %v7381_v19, %s3965_s9  ;;  %v6285_v2 = vpop.permute.xlu1 %1931  ;;  %v685_v59 = vsel %vm7394_vm1, %v683_v60, %v684_v41  ;;  %v2200_v55 = vsel %vm1465_vm5, %v2184_v7, %v6242_v52  ;;  %v3866_v52 = vld [vmem:[%s4656_s13 + $0x98] sm:$0x3]  ;;  %v7405_v60 = vld [vmem:[#allocation18_spill] sm:$0xff]  ;;  %s3083_s13 = sshll.u32 %s3945_s18, 6  ;;  %s3980_s9 = smov [#allocation2]  }
 0x22d   : > { %v2216_v15 = vsel %vm7399_vm6, %v2200_v55, %v6251_v22  ;;  %v593_v29 = vrot.slane %v3866_v52, 1  ;;  %v691_v22 = vrot.slane %v354_v26, 2  ;;  %v7407_v7 = vld [vmem:[#allocation6_spill] sm:$0xff] }
 0x22e   : > { %v6294_v53 = vpop.permute.xlu0 %1915  ;;  %1985 = vrot.lane.b32.xlu1 %v677_v9, %s7293_s6 }
 0x22f   : > { %v2232_v45 = vsel %vm1499_vm7, %v2216_v15, %v6294_v53  ;;  %v690_v53 = vsel %vm388_vm0, %v688_v5, %v689_v12  ;;  %v7409_v15 = vld [vmem:[#allocation33_spill] sm:$0xff] }
 0x230   : > { %1969 = vrot.lane.b32.xlu0 %v7385_v42, %s7293_s6  ;;  %v2122_v57 = vpop.permute.xlu1 %2121 }
 0x231   : > { %v2303_v51 = vsel %vm1567_vm11, %v2287_v58, %v2122_v57  ;;  %v2176_v57 = vsel %vm1431_vm3, %v2160_v34, %v6178_v0 }
 0x232   : > { %v2106_v43 = vpop.permute.xlu0 %2105  ;;  %1843 = vrot.lane.b32.xlu1 %v677_v9, %s3966_s10  ;;  %2972 = vmatprep.mubr.msk.f32.mxu1 %vm1584_vm12, %v2303_v51  ;;  %v692_v51 = vrot.slane %v355_v47, 2  ;;  %v2192_v30 = vsel %vm1448_vm4, %v2176_v57, %v6237_v46  ;;  %v6392_v46 = vsel %vm388_vm0, %v592_v31, %v593_v29  ;;  %vm7410_vm0 = vmmov %vm7399_vm6 }
 0x233   : > { %v2295_v13 = vsel %vm1567_vm11, %v2279_v27, %v2106_v43  ;;  %2506 = vmatmul.mubr.f32.gmra.mrb[4].mxu1 %v7391_v14  ;;  %vm7411_vm15 = vmmov %vm7410_vm0 }
 0x234   : > { %1827 = vrot.lane.b32.xlu0 %v7385_v42, %s3966_s10  ;;  %2964 = vmatprep.mubr.msk.f32.mxu0 %vm1584_vm12, %v2295_v13  ;;  %v6315_v1 = vpop.permute.xlu1 %1789  ;;  %v7397_v42 = vld [vmem:[#allocation65_spill] sm:$0xff]  ;;  %v2208_v13 = vsel %vm1465_vm5, %v2192_v30, %v6247_v39  ;;  %v693_v39 = vsel %vm7403_vm14, %v691_v22, %v692_v51  ;;  %v7412_v51 = vld [vmem:[#allocation27_spill] sm:$0xff]  ;;  %vm7418_vm1 = vmmov %vm7410_vm0 }
 0x235   : > { %2466 = vmatmul.mubr.f32.gmra.mrb[4].mxu0 %v7392_v17  ;;  %v2224_v0 = vsel %vm7401_vm13, %v2208_v13, %v6257_v56  ;;  %v7402_v17 = vld [vmem:[#allocation38_spill] sm:$0xff]  ;;  %v7413_v30 = vld [vmem:[#allocation41_spill] sm:$0xff]  ;;  %vm7419_vm6 = vmmov %vm7410_vm0 }
 0x236   : > { %v6319_v62 = vpop.permute.xlu0 %1773  ;;  %2033 = vrot.lane.b32.xlu1 %v352_v3, %s3970_s14  ;;  %v2240_v49 = vsel %vm1499_vm7, %v2224_v0, %v6285_v2  ;;  %vm7426_vm13 = vmmov %vm7410_vm0 }
 0x237   : > { %vm7427_vm14 = vmmov %vm7410_vm0 }
 0x238   : > { %2017 = vrot.lane.b32.xlu0 %v3864_v25, %s3970_s14  ;;  %v6324_v4 = vpop.permute.xlu1 %1979 }
 0x239   : > { %v2256_v16 = vsel %vm1516_vm8, %v2240_v49, %v6324_v4 }
 0x23a   : > { %v1964_v11 = vpop.permute.xlu0 %1963  ;;  %1891 = vrot.lane.b32.xlu1 %v352_v3, %s3967_s11 }
 0x23b   : > { %v2248_v6 = vsel %vm1516_vm8, %v2232_v45, %v1964_v11 }
 0x23c   : > { %1875 = vrot.lane.b32.xlu0 %v3864_v25, %s3967_s11  ;;  %v6329_v63 = vpop.permute.xlu1 %1837  ;;  %s7435_s11 = smov 112  }
 0x23e   : > { %v6331_v37 = vpop.permute.xlu0 %1821  ;;  %2081 = vrot.lane.b32.xlu1 %v682_v10, %s7295_s5 }
 0x240   : > { %2065 = vrot.lane.b32.xlu0 %v7393_v20, %s7295_s5  ;;  %v2028_v33 = vpop.permute.xlu1 %2027 }
 0x241   : > { %v2272_v38 = vsel %vm1533_vm9, %v2256_v16, %v2028_v33 }
 0x242   : > { %v2012_v61 = vpop.permute.xlu0 %2011  ;;  %1939 = vrot.lane.b32.xlu1 %v682_v10, %s3968_s12  ;;  %v7404_v10 = vld [vmem:[#allocation22_spill] sm:$0xff] }
 0x243   : > { %v2264_v44 = vsel %vm1533_vm9, %v2248_v6, %v2012_v61 }
 0x244   : > { %1923 = vrot.lane.b32.xlu0 %v7393_v20, %s3968_s12  ;;  %v6340_v9 = vpop.permute.xlu1 %1885  ;;  %s7438_s12 = smov 96  }
 0x246   : > { %v6342_v24 = vpop.permute.xlu0 %1869  ;;  %2129 = vrot.lane.b32.xlu1 %v685_v59, %s7297_s24 }
 0x248   : > { %2113 = vrot.lane.b32.xlu0 %v7397_v42, %s7297_s24  ;;  %v2076_v54 = vpop.permute.xlu1 %2075 }
 0x249   : > { %v2288_v25 = vsel %vm1550_vm10, %v2272_v38, %v2076_v54 }
 0x24a   : > { %v2060_v32 = vpop.permute.xlu0 %2059  ;;  %1987 = vrot.lane.b32.xlu1 %v685_v59, %s7293_s6 }
 0x24b   : > { %v2280_v27 = vsel %vm1550_vm10, %v2264_v44, %v2060_v32  ;;  %v7408_v32 = vld [vmem:[#allocation11_spill] sm:$0xff] }
 0x24c   : > { %1971 = vrot.lane.b32.xlu0 %v7397_v42, %s7293_s6  ;;  %v6363_v48 = vpop.permute.xlu1 %1917  ;;  %v2153_v55 = vsel %vm1414_vm2, %v7408_v32, %v7407_v7  ;;  %s2956_s6 = sshll.u32 %s248_s30, 9 }
 0x24d   : > { %s6546_s10 = scalar_lea.vmem [#allocation2], %s2956_s6 }
 0x24e   : > { %v6373_v58 = vpop.permute.xlu0 %1743  ;;  %2035 = vrot.lane.b32.xlu1 %v354_v26, %s3970_s14  ;;  %v7406_v26 = vld [vmem:[#allocation71_spill] sm:$0xff]  ;;  %s2845_s27 = sshll.u32 %s6546_s10, 4  ;;  %s6964_s27 = int_to_ptr.vmem [resolvable:$true] %s2845_s27 }
 0x24f   : > { %v2161_v47 = vsel %vm1414_vm2, %v7358_v40, %v7406_v26  ;;  %s3867_s8 = scalar_lea.vmem %s6964_s27, 8192 }
 0x250   : > { %2019 = vrot.lane.b32.xlu0 %v3865_v21, %s3970_s14  ;;  %v2108_v43 = vpop.permute.xlu1 %2107  ;;  %v2177_v50 = vsel %vm1431_vm3, %v2161_v47, %v6265_v36  ;;  %v2169_v21 = vsel %vm1431_vm3, %v2153_v55, %v7409_v15  ;;  %s3077_s14 = sshll.u32 %s3949_s19, 7  ;;  %s6972_s19 = scalar_lea.sflag [#allocation3], %s248_s30 }
 0x251   : > { %v2296_v14 = vsel %vm1567_vm11, %v2280_v27, %v2108_v43  ;;  %v2193_v5 = vsel %vm1448_vm4, %v2177_v50, %v6315_v1  ;;  %v2185_v40 = vsel %vm1448_vm4, %v2169_v21, %v6319_v62  ;;  %p3868_p1 = scmp.ne.s32.totalorder %s6964_s27, %s3867_s8 }
 0x252   : > { %v1934_v3 = vpop.permute.xlu0 %1933  ;;  %2083 = vrot.lane.b32.xlu1 %v690_v53, %s7295_s5  ;;  %2965 = vmatprep.mubr.msk.f32.mxu0 %vm1584_vm12, %v2296_v14  ;;  %v2209_v31 = vsel %vm1465_vm5, %v2193_v5, %v6329_v63  ;;  %v2201_v23 = vsel %vm1465_vm5, %v2185_v40, %v6331_v37 }
 0x253   : > { %2471 = vmatmul.mubr.f32.gmra.mrb[6].mxu0 %v7402_v17  ;;  %v2225_v36 = vsel %vm7410_vm0, %v2209_v31, %v6340_v9  ;;  %v2217_v1 = vsel %vm7411_vm15, %v2201_v23, %v6342_v24  ;;  %v7421_v23 = vld [vmem:[#allocation12_spill] sm:$0xff]  ;;  %vm2552_vm0 = vcmask 130112   ;;  %vm7433_vm15 = vmmov %vm7418_vm1  ;;  %p3869_p2 = pnand %p3868_p1, %p4058_p3 }
 0x254   : > { %2067 = vrot.lane.b32.xlu0 %v6392_v46, %s7295_s5  ;;  %v6402_v56 = vpop.permute.xlu1 %1775  ;;  %v2241_v34 = vsel %vm1499_vm7, %v2225_v36, %v1934_v3  ;;  %v2233_v63 = vsel %vm1499_vm7, %v2217_v1, %v6363_v48  ;;  %v7420_v36 = vld [vmem:[#allocation61_spill] sm:$0xff]  ;;  %s2842_s5 = sadd.s32 %s3083_s13, %s3077_s14 }
 0x255   : > { %s3078_s23 = sshll.u32 %s2842_s5, 7  ;;  %p3870_p4 = pneg %p3869_p2 }
 0x256   : > { %v2124_v11 = vpop.permute.xlu0 %2123  ;;  %2131 = vrot.lane.b32.xlu1 %v693_v39, %s7297_s24  ;;  %s6962_s18 = scalar_lea.hbm %s7029_s4, %s3078_s23 }
 0x257   : > { %v2304_v2 = vsel %vm1567_vm11, %v2288_v25, %v2124_v11  ;;  %v7414_v25 = vld [vmem:[#allocation36_spill] sm:$0xff] }
 0x258   : > { %2115 = vrot.lane.b32.xlu0 %v7404_v10, %s7297_s24  ;;  %2973 = vmatprep.mubr.msk.f32.mxu1 %vm1584_vm12, %v2304_v2  ;;  %v1966_v4 = vpop.permute.xlu1 %1965  ;;  %v2162_v11 = vsel %vm1414_vm2, %v7381_v19, %v7414_v25 }
 0x259   : > { %2511 = vmatmul.mubr.f32.gmra.mrb[6].mxu1 %v7405_v60  ;;  %v2249_v6 = vsel %vm1516_vm8, %v2233_v63, %v1966_v4  ;;  %v2178_v10 = vsel %vm1431_vm3, %v2162_v11, %v6373_v58  ;;  %v7415_v4 = vld [vmem:[#allocation63_spill] sm:$0xff]  ;;  %v7416_v60 = vld [vmem:[#allocation13_spill] sm:$0xff] }
 0x25a   : > { %v1792_v41 = vpop.permute.xlu0 %1791 }
 0x25c   : > { %v1824_v61 = vpop.permute.xlu1 %1823 }
 0x25e   : > { %v1982_v59 = vpop.permute.xlu0 %1981 }
 0x25f   : > { %v2257_v52 = vsel %vm1516_vm8, %v2241_v34, %v1982_v59  ;;  %v2154_v59 = vsel %vm1414_vm2, %v7416_v60, %v7415_v4 }
 0x260   : > { %v2014_v18 = vpop.permute.xlu1 %2013 }
 0x261   : > { %v2265_v37 = vsel %vm1533_vm9, %v2249_v6, %v2014_v18  ;;  %v2194_v18 = vsel %vm1448_vm4, %v2178_v10, %v1792_v41 }
 0x262   : > { %v1840_v33 = vpop.permute.xlu0 %1839 }
 0x263   : > { %v2210_v47 = vsel %vm1465_vm5, %v2194_v18, %v1840_v33 }
 0x264   : > { %v1872_v28 = vpop.permute.xlu1 %1871 }
 0x266   : > { %v2030_v35 = vpop.permute.xlu0 %2029 }
 0x267   : > { %v2273_v62 = vsel %vm1533_vm9, %v2257_v52, %v2030_v35 }
 0x268   : > { %v2062_v42 = vpop.permute.xlu1 %2061 }
 0x269   : > { %v2281_v44 = vsel %vm1550_vm10, %v2265_v37, %v2062_v42  ;;  %v7417_v42 = vld [vmem:[#allocation78_spill] sm:$0xff]  ;;  %v7422_v37 = vld [vmem:[#allocation35_spill] sm:$0xff] }
 0x26a   : > { %v1888_v54 = vpop.permute.xlu0 %1887  ;;  %v2170_v26 = vsel %vm1431_vm3, %v2154_v59, %v7417_v42 }
 0x26b   : > { %v2186_v19 = vsel %vm1448_vm4, %v2170_v26, %v6402_v56  ;;  %v2226_v50 = vsel %vm7418_vm1, %v2210_v47, %v1888_v54  ;;  %v7428_v47 = vld [vmem:[#allocation29_spill] sm:$0xff] }
 0x26c   : > { %v6415_v8 = vpop.permute.xlu1 %1745  ;;  %v2202_v58 = vsel %vm1465_vm5, %v2186_v19, %v1824_v61 }
 0x26d   : > { %v2218_v55 = vsel %vm7419_vm6, %v2202_v58, %v1872_v28  ;;  %v7430_v58 = vld [vmem:[#allocation72_spill] sm:$0xff] }
 0x26e   : > { %v2078_v12 = vpop.permute.xlu0 %2077 }
 0x26f   : > { %v2289_v9 = vsel %vm1550_vm10, %v2273_v62, %v2078_v12 }
 0x270   : > { %v1936_v45 = vpop.permute.xlu1 %1935 }
 0x271   : > { %v2242_v32 = vsel %vm1499_vm7, %v2226_v50, %v1936_v45  ;;  %v7429_v50 = vld [vmem:[#allocation40_spill] sm:$0xff] }
 0x272   : > { %v1920_v29 = vpop.permute.xlu0 %1919 }
 0x273   : > { %v2234_v12 = vsel %vm1499_vm7, %v2218_v55, %v1920_v29 }
 0x274   : > { %v2126_v22 = vpop.permute.xlu1 %2125 }
 0x275   : > { %v2305_v57 = vsel %vm1567_vm11, %v2289_v9, %v2126_v22 }
 0x276   : > { %v2110_v24 = vpop.permute.xlu0 %2109  ;;  %2974 = vmatprep.mubr.msk.f32.mxu1 %vm1584_vm12, %v2305_v57  ;;  %v2163_v57 = vsel %vm1414_vm2, %v7393_v20, %v7422_v37 }
 0x277   : > { %v2297_v53 = vsel %vm1567_vm11, %v2281_v44, %v2110_v24  ;;  %2516 = vmatmul.mubr.f32.gmra.mrb[8].mxu1 %v7412_v51  ;;  %v2179_v24 = vsel %vm1431_vm3, %v2163_v57, %v6415_v8  ;;  %v7424_v51 = vld [vmem:[#allocation26_spill] sm:$0xff] }
 0x278   : > { %2966 = vmatprep.mubr.msk.f32.mxu0 %vm1584_vm12, %v2297_v53  ;;  %v1794_v48 = vpop.permute.xlu1 %1793  ;;  %v7423_v53 = vld [vmem:[#allocation67_spill] sm:$0xff] }
 0x279   : > { %2476 = vmatmul.mubr.f32.gmra.mrb[8].mxu0 %v7413_v30  ;;  %v2155_v30 = vsel %vm1414_vm2, %v7424_v51, %v7423_v53 }
 0x27a   : > { %v1778_v27 = vpop.permute.xlu0 %1777 }
 0x27c   : > { %v1984_v43 = vpop.permute.xlu1 %1983 }
 0x27d   : > { %v2258_v41 = vsel %vm1516_vm8, %v2242_v32, %v1984_v43  ;;  %v2195_v43 = vsel %vm1448_vm4, %v2179_v24, %v1794_v48  ;;  %v2164_v32 = vsel %vm1414_vm2, %v6392_v46, %v7430_v58 }
 0x27e   : > { %v1968_v13 = vpop.permute.xlu0 %1967 }
 0x27f   : > { %v2250_v33 = vsel %vm1516_vm8, %v2234_v12, %v1968_v13  ;;  %v7431_v12 = vld [vmem:[#allocation66_spill] sm:$0xff] }
 0x280   : > { %v1842_v14 = vpop.permute.xlu1 %1841 }
 0x282   : > { %v1826_v0 = vpop.permute.xlu0 %1825 }
 0x284   : > { %v2032_v3 = vpop.permute.xlu1 %2031 }
 0x285   : > { %v2274_v15 = vsel %vm1533_vm9, %v2258_v41, %v2032_v3  ;;  %v7425_v3 = vld [vmem:[#allocation79_spill] sm:$0xff]  ;;  %v6525_v41 = vld [vmem:[%s7028_s3] ss:$0 sm:$0xff] }
 0x286   : > { %v2016_v49 = vpop.permute.xlu0 %2015 }
 0x287   : > { %v2266_v54 = vsel %vm1533_vm9, %v2250_v33, %v2016_v49  ;;  %v2171_v49 = vsel %vm1431_vm3, %v2155_v30, %v7425_v3  ;;  %v7436_v30 = vld [vmem:[#allocation52_spill] sm:$0xff] }
 0x288   : > { %v1890_v17 = vpop.permute.xlu1 %1889 }
 0x28a   : > { %v1874_v39 = vpop.permute.xlu0 %1873 }
 0x28c   : > { %v2080_v16 = vpop.permute.xlu1 %2079 }
 0x28d   : > { %v2290_v56 = vsel %vm1550_vm10, %v2274_v15, %v2080_v16  ;;  %v2211_v16 = vsel %vm1465_vm5, %v2195_v43, %v1842_v14  ;;  %v7432_v15 = vld [vmem:[#allocation28_spill] sm:$0xff]  ;;  %v7437_v43 = vld [vmem:[#allocation21_spill] sm:$0xff] }
 0x28e   : > { %v2064_v38 = vpop.permute.xlu0 %2063  ;;  %v2227_v20 = vsel %vm7426_vm13, %v2211_v16, %v1890_v17  ;;  %v2156_v33 = vsel %vm1414_vm2, %v7432_v15, %v7431_v12 }
 0x28f   : > { %v2282_v31 = vsel %vm1550_vm10, %v2266_v54, %v2064_v38  ;;  %v2187_v38 = vsel %vm1448_vm4, %v2171_v49, %v1778_v27 }
 0x290   : > { %v6454_v2 = vpop.permute.xlu1 %1747  ;;  %v2203_v11 = vsel %vm1465_vm5, %v2187_v38, %v1826_v0 }
 0x291   : > { %v2219_v10 = vsel %vm7427_vm14, %v2203_v11, %v1874_v39 }
 0x292   : > { %v6462_v35 = vpop.permute.xlu0 %1731 }
 0x293   : > { %v2172_v46 = vsel %vm1431_vm3, %v2156_v33, %v6462_v35 }
 0x294   : > { %v1938_v7 = vpop.permute.xlu1 %1937 }
 0x295   : > { %v2243_v8 = vsel %vm1499_vm7, %v2227_v20, %v1938_v7 }
 0x296   : > { %v1922_v5 = vpop.permute.xlu0 %1921 }
 0x297   : > { %v2235_v60 = vsel %vm1499_vm7, %v2219_v10, %v1922_v5  ;;  %v2180_v5 = vsel %vm1431_vm3, %v2164_v32, %v6454_v2  ;;  %vm7434_vm3 = vmmov %vm7418_vm1 }
 0x298   : > { %v2128_v21 = vpop.permute.xlu1 %2127 }
 0x299   : > { %v2306_v61 = vsel %vm1567_vm11, %v2290_v56, %v2128_v21 }
 0x29a   : > { %v2112_v40 = vpop.permute.xlu0 %2111  ;;  %2975 = vmatprep.mubr.msk.f32.mxu1 %vm1584_vm12, %v2306_v61 }
 0x29b   : > { %v2298_v28 = vsel %vm1567_vm11, %v2282_v31, %v2112_v40  ;;  %2521 = vmatmul.mubr.f32.gmra.mrb[10].mxu1 %v7420_v36 }
 0x29c   : > { %2967 = vmatprep.mubr.msk.f32.mxu0 %vm1584_vm12, %v2298_v28  ;;  %v1796_v45 = vpop.permute.xlu1 %1795 }
 0x29d   : > { %2481 = vmatmul.mubr.f32.gmra.mrb[10].mxu0 %v7421_v23  ;;  %v2196_v56 = vsel %vm1448_vm4, %v2180_v5, %v1796_v45 }
 0x29e   : > { %v1780_v34 = vpop.permute.xlu0 %1779 }
 0x29f   : > { %v2188_v2 = vsel %vm1448_vm4, %v2172_v46, %v1780_v34 }
 0x2a0   : > { %v1986_v1 = vpop.permute.xlu1 %1985 }
 0x2a1   : > { %v2259_v4 = vsel %vm1516_vm8, %v2243_v8, %v1986_v1 }
 0x2a2   : > { %v1970_v52 = vpop.permute.xlu0 %1969 }
 0x2a3   : > { %v2251_v27 = vsel %vm1516_vm8, %v2235_v60, %v1970_v52 }
 0x2a4   : > { %v1844_v29 = vpop.permute.xlu1 %1843 }
 0x2a5   : > { %v2212_v61 = vsel %vm1465_vm5, %v2196_v56, %v1844_v29 }
 0x2a6   : > { %v1828_v63 = vpop.permute.xlu0 %1827 }
 0x2a7   : > { %v2204_v45 = vsel %vm1465_vm5, %v2188_v2, %v1828_v63 }
 0x2a8   : > { %v2034_v62 = vpop.permute.xlu1 %2033 }
 0x2a9   : > { %v2275_v59 = vsel %vm1533_vm9, %v2259_v4, %v2034_v62 }
 0x2aa   : > { %v2018_v6 = vpop.permute.xlu0 %2017 }
 0x2ab   : > { %v2267_v0 = vsel %vm1533_vm9, %v2251_v27, %v2018_v6 }
 0x2ac   : > { %v1892_v9 = vpop.permute.xlu1 %1891 }
 0x2ad   : > { %v2228_v28 = vsel %vm7433_vm15, %v2212_v61, %v1892_v9 }
 0x2ae   : > { %v1876_v22 = vpop.permute.xlu0 %1875 }
 0x2af   : > { %v2220_v34 = vsel %vm7434_vm3, %v2204_v45, %v1876_v22 }
 0x2b0   : > { %v2082_v44 = vpop.permute.xlu1 %2081 }
 0x2b1   : > { %v2291_v14 = vsel %vm1550_vm10, %v2275_v59, %v2082_v44 }
 0x2b2   : > { %v2066_v13 = vpop.permute.xlu0 %2065 }
 0x2b3   : > { %v2283_v39 = vsel %vm1550_vm10, %v2267_v0, %v2066_v13 }
 0x2b4   : > { %v1940_v25 = vpop.permute.xlu1 %1939 }
 0x2b5   : > { %v2244_v1 = vsel %vm1499_vm7, %v2228_v28, %v1940_v25 }
 0x2b6   : > { %v1924_v48 = vpop.permute.xlu0 %1923 }
 0x2b7   : > { %v2236_v62 = vsel %vm1499_vm7, %v2220_v34, %v1924_v48 }
 0x2b8   : > { %v2130_v17 = vpop.permute.xlu1 %2129 }
 0x2b9   : > { %v2307_v18 = vsel %vm1567_vm11, %v2291_v14, %v2130_v17 }
 0x2ba   : > { %v2114_v42 = vpop.permute.xlu0 %2113  ;;  %2976 = vmatprep.mubr.msk.f32.mxu1 %vm1584_vm12, %v2307_v18 }
 0x2bb   : > { %v2299_v26 = vsel %vm1567_vm11, %v2283_v39, %v2114_v42  ;;  %2526 = vmatmul.mubr.f32.gmra.mrb[12].mxu1 %v7428_v47 }
 0x2bc   : > { %2968 = vmatprep.mubr.msk.f32.mxu0 %vm1584_vm12, %v2299_v26  ;;  %v1988_v19 = vpop.permute.xlu1 %1987 }
 0x2bd   : > { %2486 = vmatmul.mubr.f32.gmra.mrb[12].mxu0 %v7429_v50  ;;  %v2260_v29 = vsel %vm1516_vm8, %v2244_v1, %v1988_v19 }
 0x2be   : > { %v1972_v7 = vpop.permute.xlu0 %1971 }
 0x2bf   : > { %v2252_v9 = vsel %vm1516_vm8, %v2236_v62, %v1972_v7 }
 0x2c0   : > { %v2036_v55 = vpop.permute.xlu1 %2035 }
 0x2c1   : > { %v2276_v6 = vsel %vm1533_vm9, %v2260_v29, %v2036_v55 }
 0x2c2   : > { %v2020_v21 = vpop.permute.xlu0 %2019  ;;  %v2497_v54 = vpop.f32.mrb[0].mxu1 }
 0x2c3   : > { %v6537_v31 = vadd.f32 %v6525_v41, %v2497_v54  ;;  %v2499_v40 = vpop.f32.mrb[1].mxu1  ;;  %v2268_v57 = vsel %vm1533_vm9, %v2252_v9, %v2020_v21 }
 0x2c4   : > { %v2457_v36 = vpop.f32.mrb[0].mxu0  ;;  %v2084_v23 = vpop.permute.xlu1 %2083 }
 0x2c5   : > { %v6544_v52 = vadd.f32 %v6525_v41, %v2457_v36  ;;  %2544 = vst.msk [vmem:[%s6546_s10 + $0x100] sm:$0xff] %vm1414_vm2, %v6537_v31  ;;  %v2459_v35 = vpop.f32.mrb[1].mxu0  ;;  %v2292_v22 = vsel %vm1550_vm10, %v2276_v6, %v2084_v23 }
 0x2c6   : > { %2561 = vst.msk [vmem:[%s6546_s10 + $0x100] sm:$0xff] %vm2552_vm0, %v6537_v31  ;;  %v2068_v63 = vpop.permute.xlu0 %2067 }
 0x2c7   : > { %2536 = vst.msk [vmem:[%s6546_s10] sm:$0xff] %vm1414_vm2, %v6544_v52  ;;  %2585 = vrot.lane.b32.xlu0 %v6544_v52, %s7435_s11  ;;  %v2284_v24 = vsel %vm1550_vm10, %v2268_v57, %v2068_v63 }
 0x2c8   : > { %2553 = vst.msk [vmem:[%s6546_s10] sm:$0xff] %vm2552_vm0, %v6544_v52  ;;  %v2132_v37 = vpop.permute.xlu1 %2131 }
 0x2c9   : > { %v2308_v44 = vsel %vm1567_vm11, %v2292_v22, %v2132_v37 }
 0x2ca   : > { %v2116_v53 = vpop.permute.xlu0 %2115  ;;  %2977 = vmatprep.mubr.msk.f32.mxu1 %vm1584_vm12, %v2308_v44 }
 0x2cb   : > { %v2300_v51 = vsel %vm1567_vm11, %v2284_v24, %v2116_v53  ;;  %2531 = vmatmul.mubr.f32.gmra.mrb[14].mxu1 %v7436_v30 }
 0x2cc   : > { %2969 = vmatprep.mubr.msk.f32.mxu0 %vm1584_vm12, %v2300_v51 }
 0x2cd   : > { %2491 = vmatmul.mubr.f32.gmra.mrb[14].mxu0 %v7437_v43 }
 0x2e2   : > { %v2462_v13 = vpop.f32.mrb[2].mxu0 }
 0x2e3   : > { %v6577_v3 = vadd.f32 %v6525_v41, %v2462_v13  ;;  %v2464_v49 = vpop.f32.mrb[3].mxu0 }
 0x2e5   : > { %2537 = vst.msk [vmem:[%s6546_s10 + $0x10] sm:$0xff] %vm1414_vm2, %v6577_v3  ;;  %2587 = vrot.lane.b32.xlu1 %v6577_v3, %s7435_s11 }
 0x2e6   : > { %2554 = vst.msk [vmem:[%s6546_s10 + $0x10] sm:$0xff] %vm2552_vm0, %v6577_v3 }
 0x2e8   : > { %v2502_v16 = vpop.f32.mrb[2].mxu1 }
 0x2e9   : > { %v6588_v38 = vadd.f32 %v6525_v41, %v2502_v16  ;;  %v2504_v20 = vpop.f32.mrb[3].mxu1 }
 0x2eb   : > { %2545 = vst.msk [vmem:[%s6546_s10 + $0x110] sm:$0xff] %vm1414_vm2, %v6588_v38 }
 0x2ec   : > { %2562 = vst.msk [vmem:[%s6546_s10 + $0x110] sm:$0xff] %vm2552_vm0, %v6588_v38 }
 0x306   : > { %v2507_v25 = vpop.f32.mrb[4].mxu1 }
 0x307   : > { %v6597_v11 = vadd.f32 %v6525_v41, %v2507_v25  ;;  %v2509_v8 = vpop.f32.mrb[5].mxu1 }
 0x308   : > { %v2467_v10 = vpop.f32.mrb[4].mxu0 }
 0x309   : > { %v6600_v4 = vadd.f32 %v6525_v41, %v2467_v10  ;;  %2546 = vst.msk [vmem:[%s6546_s10 + $0x120] sm:$0xff] %vm1414_vm2, %v6597_v11  ;;  %v2469_v48 = vpop.f32.mrb[5].mxu0 }
 0x30a   : > { %2563 = vst.msk [vmem:[%s6546_s10 + $0x120] sm:$0xff] %vm2552_vm0, %v6597_v11 }
 0x30b   : > { %2538 = vst.msk [vmem:[%s6546_s10 + $0x20] sm:$0xff] %vm1414_vm2, %v6600_v4  ;;  %2589 = vrot.lane.b32.xlu0 %v6600_v4, %s7435_s11 }
 0x30c   : > { %2555 = vst.msk [vmem:[%s6546_s10 + $0x20] sm:$0xff] %vm2552_vm0, %v6600_v4 }
 0x326   : > { %v2472_v60 = vpop.f32.mrb[6].mxu0 }
 0x327   : > { %v6617_v59 = vadd.f32 %v6525_v41, %v2472_v60  ;;  %v2474_v27 = vpop.f32.mrb[7].mxu0 }
 0x329   : > { %2539 = vst.msk [vmem:[%s6546_s10 + $0x30] sm:$0xff] %vm1414_vm2, %v6617_v59  ;;  %2591 = vrot.lane.b32.xlu1 %v6617_v59, %s7435_s11 }
 0x32a   : > { %2556 = vst.msk [vmem:[%s6546_s10 + $0x30] sm:$0xff] %vm2552_vm0, %v6617_v59 }
 0x32c   : > { %v2512_v14 = vpop.f32.mrb[6].mxu1 }
 0x32d   : > { %v6628_v17 = vadd.f32 %v6525_v41, %v2512_v14  ;;  %v2514_v0 = vpop.f32.mrb[7].mxu1 }
 0x32f   : > { %2547 = vst.msk [vmem:[%s6546_s10 + $0x130] sm:$0xff] %vm1414_vm2, %v6628_v17 }
 0x330   : > { %2564 = vst.msk [vmem:[%s6546_s10 + $0x130] sm:$0xff] %vm2552_vm0, %v6628_v17 }
 0x339   : > { %v2586_v18 = vpop.permute.xlu0 %2585 }
 0x33a   : > { %2978 = vst.msk [vmem:[%s6546_s10 + $0x8] sm:$0xff] %vm1414_vm2, %v2586_v18 }
 0x33b   : > { %2994 = vst.msk [vmem:[%s6546_s10 + $0x8] sm:$0xff] %vm2552_vm0, %v2586_v18 }
 0x34a   : > { %v2517_v39 = vpop.f32.mrb[8].mxu1 }
 0x34b   : > { %v6641_v42 = vadd.f32 %v6525_v41, %v2517_v39  ;;  %v2519_v26 = vpop.f32.mrb[9].mxu1 }
 0x34c   : > { %v2477_v47 = vpop.f32.mrb[8].mxu0 }
 0x34d   : > { %v6644_v19 = vadd.f32 %v6525_v41, %v2477_v47  ;;  %2548 = vst.msk [vmem:[%s6546_s10 + $0x140] sm:$0xff] %vm1414_vm2, %v6641_v42  ;;  %v2479_v50 = vpop.f32.mrb[9].mxu0 }
 0x34e   : > { %2565 = vst.msk [vmem:[%s6546_s10 + $0x140] sm:$0xff] %vm2552_vm0, %v6641_v42 }
 0x34f   : > { %2540 = vst.msk [vmem:[%s6546_s10 + $0x40] sm:$0xff] %vm1414_vm2, %v6644_v19  ;;  %2593 = vrot.lane.b32.xlu0 %v6644_v19, %s7435_s11 }
 0x350   : > { %2557 = vst.msk [vmem:[%s6546_s10 + $0x40] sm:$0xff] %vm2552_vm0, %v6644_v19 }
 0x357   : > { %v2588_v7 = vpop.permute.xlu1 %2587 }
 0x358   : > { %2979 = vst.msk [vmem:[%s6546_s10 + $0x18] sm:$0xff] %vm1414_vm2, %v2588_v7 }
 0x359   : > { %2995 = vst.msk [vmem:[%s6546_s10 + $0x18] sm:$0xff] %vm2552_vm0, %v2588_v7 }
 0x36e   : > { %v2522_v58 = vpop.f32.mrb[10].mxu1 }
 0x36f   : > { %v6665_v32 = vadd.f32 %v6525_v41, %v2522_v58  ;;  %v2524_v55 = vpop.f32.mrb[11].mxu1 }
 0x370   : > { %v2482_v5 = vpop.f32.mrb[10].mxu0 }
 0x371   : > { %v6668_v12 = vadd.f32 %v6525_v41, %v2482_v5  ;;  %2549 = vst.msk [vmem:[%s6546_s10 + $0x150] sm:$0xff] %vm1414_vm2, %v6665_v32  ;;  %v2484_v15 = vpop.f32.mrb[11].mxu0 }
 0x372   : > { %2566 = vst.msk [vmem:[%s6546_s10 + $0x150] sm:$0xff] %vm2552_vm0, %v6665_v32 }
 0x373   : > { %2541 = vst.msk [vmem:[%s6546_s10 + $0x50] sm:$0xff] %vm1414_vm2, %v6668_v12  ;;  %2595 = vrot.lane.b32.xlu1 %v6668_v12, %s7435_s11 }
 0x374   : > { %2558 = vst.msk [vmem:[%s6546_s10 + $0x50] sm:$0xff] %vm2552_vm0, %v6668_v12 }
 0x37d   : > { %v2590_v33 = vpop.permute.xlu0 %2589 }
 0x37e   : > { %2980 = vst.msk [vmem:[%s6546_s10 + $0x28] sm:$0xff] %vm1414_vm2, %v2590_v33 }
 0x37f   : > { %2996 = vst.msk [vmem:[%s6546_s10 + $0x28] sm:$0xff] %vm2552_vm0, %v2590_v33 }
 0x38e   : > { %v2527_v56 = vpop.f32.mrb[12].mxu1 }
 0x38f   : > { %v2528_v21 = vadd.f32 %v6525_v41, %v2527_v56  ;;  %v2529_v54 = vpop.f32.mrb[13].mxu1 }
 0x390   : > { %v2487_v46 = vpop.f32.mrb[12].mxu0 }
 0x391   : > { %v2488_v61 = vadd.f32 %v6525_v41, %v2487_v46  ;;  %2550 = vst.msk [vmem:[%s6546_s10 + $0x160] sm:$0xff] %vm1414_vm2, %v2528_v21  ;;  %v2489_v40 = vpop.f32.mrb[13].mxu0 }
 0x392   : > { %2567 = vst.msk [vmem:[%s6546_s10 + $0x160] sm:$0xff] %vm2552_vm0, %v2528_v21 }
 0x393   : > { %2542 = vst.msk [vmem:[%s6546_s10 + $0x60] sm:$0xff] %vm1414_vm2, %v2488_v61  ;;  %2597 = vrot.lane.b32.xlu0 %v2488_v61, %s7435_s11 }
 0x394   : > { %2559 = vst.msk [vmem:[%s6546_s10 + $0x60] sm:$0xff] %vm2552_vm0, %v2488_v61 }
 0x397   : > { %2601 = vrot.lane.b32.xlu0 %v6537_v31, %s7435_s11 }
 0x39b   : > { %2605 = vrot.lane.b32.xlu0 %v6597_v11, %s7435_s11  ;;  %v2592_v2 = vpop.permute.xlu1 %2591 }
 0x39c   : > { %2981 = vst.msk [vmem:[%s6546_s10 + $0x38] sm:$0xff] %vm1414_vm2, %v2592_v2 }
 0x39d   : > { %2997 = vst.msk [vmem:[%s6546_s10 + $0x38] sm:$0xff] %vm2552_vm0, %v2592_v2 }
 0x39e   : > { %v2532_v28 = vpop.f32.mrb[14].mxu1 }
 0x39f   : > { %2609 = vrot.lane.b32.xlu0 %v6641_v42, %s7435_s11  ;;  %v2533_v36 = vadd.f32 %v6525_v41, %v2532_v28  ;;  %v2534_v23 = vpop.f32.mrb[15].mxu1 }
 0x3a0   : > { %v2492_v45 = vpop.f32.mrb[14].mxu0 }
 0x3a1   : > { %v2493_v1 = vadd.f32 %v6525_v41, %v2492_v45  ;;  %2551 = vst.msk [vmem:[%s6546_s10 + $0x170] sm:$0xff] %vm1414_vm2, %v2533_v36  ;;  %v2494_v35 = vpop.f32.mrb[15].mxu0 }
 0x3a2   : > { %2568 = vst.msk [vmem:[%s6546_s10 + $0x170] sm:$0xff] %vm2552_vm0, %v2533_v36 }
 0x3a3   : > { %2543 = vst.msk [vmem:[%s6546_s10 + $0x70] sm:$0xff] %vm1414_vm2, %v2493_v1  ;;  %2599 = vrot.lane.b32.xlu1 %v2493_v1, %s7435_s11  ;;  %2613 = vrot.lane.b32.xlu0 %v2528_v21, %s7435_s11 }
 0x3a4   : > { %2560 = vst.msk [vmem:[%s6546_s10 + $0x70] sm:$0xff] %vm2552_vm0, %v2493_v1 }
 0x3a7   : > { %2603 = vrot.lane.b32.xlu1 %v6588_v38, %s7435_s11  ;;  %2666 = vrot.lane.b32.xlu0 %v6544_v52, %s7438_s12 }
 0x3ab   : > { %2607 = vrot.lane.b32.xlu1 %v6628_v17, %s7435_s11  ;;  %2670 = vrot.lane.b32.xlu0 %v6600_v4, %s7438_s12 }
 0x3af   : > { %2611 = vrot.lane.b32.xlu1 %v6665_v32, %s7435_s11  ;;  %2674 = vrot.lane.b32.xlu0 %v6644_v19, %s7438_s12 }
 0x3b3   : > { %2615 = vrot.lane.b32.xlu1 %v2533_v36, %s7435_s11  ;;  %2678 = vrot.lane.b32.xlu0 %v2488_v61, %s7438_s12  ;;  %s3871_s11 = sshll.u32 %s3980_s9, 4  ;;  %s3872_s11 = int_to_ptr.vmem [resolvable:$false] %s3871_s11 }
 0x3b4   : > { %p3874_p5 = scmp.lt.s32.totalorder %s6964_s27, %s3872_s11 }
 0x3b7   : > { %2668 = vrot.lane.b32.xlu1 %v6577_v3, %s7438_s12  ;;  %2682 = vrot.lane.b32.xlu0 %v6537_v31, %s7438_s12 }
 0x3bb   : > { %2672 = vrot.lane.b32.xlu1 %v6617_v59, %s7438_s12  ;;  %2686 = vrot.lane.b32.xlu0 %v6597_v11, %s7438_s12 }
 0x3bf   : > { %2676 = vrot.lane.b32.xlu1 %v6668_v12, %s7438_s12  ;;  %2690 = vrot.lane.b32.xlu0 %v6641_v42, %s7438_s12 }
 0x3c1   : > { %v2594_v41 = vpop.permute.xlu0 %2593 }
 0x3c2   : > { %2982 = vst.msk [vmem:[%s6546_s10 + $0x48] sm:$0xff] %vm1414_vm2, %v2594_v41 }
 0x3c3   : > { %2998 = vst.msk [vmem:[%s6546_s10 + $0x48] sm:$0xff] %vm2552_vm0, %v2594_v41  ;;  %2680 = vrot.lane.b32.xlu1 %v2493_v1, %s7438_s12  ;;  %2694 = vrot.lane.b32.xlu0 %v2528_v21, %s7438_s12 }
 0x3c7   : > { %2684 = vrot.lane.b32.xlu1 %v6588_v38, %s7438_s12  ;;  %2747 = vrot.lane.b32.xlu0 %v6544_v52, %s7297_s24 }
 0x3cb   : > { %2688 = vrot.lane.b32.xlu1 %v6628_v17, %s7438_s12  ;;  %2751 = vrot.lane.b32.xlu0 %v6600_v4, %s7297_s24 }
 0x3cf   : > { %2692 = vrot.lane.b32.xlu1 %v6665_v32, %s7438_s12  ;;  %2755 = vrot.lane.b32.xlu0 %v6644_v19, %s7297_s24 }
 0x3d3   : > { %2696 = vrot.lane.b32.xlu1 %v2533_v36, %s7438_s12  ;;  %2759 = vrot.lane.b32.xlu0 %v2488_v61, %s7297_s24  ;;  %s3873_s12 = scalar_lea.vmem %s3872_s11, 16384 }
 0x3d4   : > { %p3875_p6 = scmp.lt.s32.totalorder %s3873_s12, %s3867_s8 }
 0x3d6   : > { %p3876_p7 = por %p3875_p6, %p3874_p5 }
 0x3d7   : > { %2749 = vrot.lane.b32.xlu1 %v6577_v3, %s7297_s24  ;;  %2763 = vrot.lane.b32.xlu0 %v6537_v31, %s7297_s24 }
 0x3d8   : > { %p3877_p9 = pnand %p3876_p7, %p3870_p4 }
 0x3db   : > { %2753 = vrot.lane.b32.xlu1 %v6617_v59, %s7297_s24  ;;  %2767 = vrot.lane.b32.xlu0 %v6597_v11, %s7297_s24 }
 0x3df   : > { %2757 = vrot.lane.b32.xlu1 %v6668_v12, %s7297_s24  ;;  %2771 = vrot.lane.b32.xlu0 %v6641_v42, %s7297_s24 }
 0x3e3   : > { %2761 = vrot.lane.b32.xlu1 %v2493_v1, %s7297_s24  ;;  %2775 = vrot.lane.b32.xlu0 %v2528_v21, %s7297_s24 }
 0x3e5   : > { %v2596_v31 = vpop.permute.xlu1 %2595 }
 0x3e6   : > { %2983 = vst.msk [vmem:[%s6546_s10 + $0x58] sm:$0xff] %vm1414_vm2, %v2596_v31 }
 0x3e7   : > { %2999 = vst.msk [vmem:[%s6546_s10 + $0x58] sm:$0xff] %vm2552_vm0, %v2596_v31  ;;  %2765 = vrot.lane.b32.xlu1 %v6588_v38, %s7297_s24 }
 0x3eb   : > { %2769 = vrot.lane.b32.xlu1 %v6628_v17, %s7297_s24 }
 0x3ef   : > { %2773 = vrot.lane.b32.xlu1 %v6665_v32, %s7297_s24 }
 0x3f3   : > { %2777 = vrot.lane.b32.xlu1 %v2533_v36, %s7297_s24 }
 0x405   : > { %v2598_v52 = vpop.permute.xlu0 %2597 }
 0x406   : > { %2984 = vst.msk [vmem:[%s6546_s10 + $0x68] sm:$0xff] %vm1414_vm2, %v2598_v52 }
 0x407   : > { %3000 = vst.msk [vmem:[%s6546_s10 + $0x68] sm:$0xff] %vm2552_vm0, %v2598_v52 }
 0x409   : > { %v2602_v34 = vpop.permute.xlu0 %2601 }
 0x40a   : > { %2986 = vst.msk [vmem:[%s6546_s10 + $0x108] sm:$0xff] %vm1414_vm2, %v2602_v34 }
 0x40b   : > { %3002 = vst.msk [vmem:[%s6546_s10 + $0x108] sm:$0xff] %vm2552_vm0, %v2602_v34 }
 0x40d   : > { %v2606_v29 = vpop.permute.xlu0 %2605 }
 0x40e   : > { %2988 = vst.msk [vmem:[%s6546_s10 + $0x128] sm:$0xff] %vm1414_vm2, %v2606_v29 }
 0x40f   : > { %3004 = vst.msk [vmem:[%s6546_s10 + $0x128] sm:$0xff] %vm2552_vm0, %v2606_v29 }
 0x411   : > { %v2610_v63 = vpop.permute.xlu0 %2609 }
 0x412   : > { %2990 = vst.msk [vmem:[%s6546_s10 + $0x148] sm:$0xff] %vm1414_vm2, %v2610_v63 }
 0x413   : > { %3006 = vst.msk [vmem:[%s6546_s10 + $0x148] sm:$0xff] %vm2552_vm0, %v2610_v63 }
 0x415   : > { %v2600_v62 = vpop.permute.xlu1 %2599  ;;  %v2614_v6 = vpop.permute.xlu0 %2613 }
 0x416   : > { %2985 = vst.msk [vmem:[%s6546_s10 + $0x78] sm:$0xff] %vm1414_vm2, %v2600_v62  ;;  %2992 = vst.msk [vmem:[%s6546_s10 + $0x168] sm:$0xff] %vm1414_vm2, %v2614_v6 }
 0x417   : > { %3001 = vst.msk [vmem:[%s6546_s10 + $0x78] sm:$0xff] %vm2552_vm0, %v2600_v62  ;;  %3008 = vst.msk [vmem:[%s6546_s10 + $0x168] sm:$0xff] %vm2552_vm0, %v2614_v6 }
 0x419   : > { %v2604_v9 = vpop.permute.xlu1 %2603  ;;  %v2667_v22 = vpop.permute.xlu0 %2666 }
 0x41a   : > { %2987 = vst.msk [vmem:[%s6546_s10 + $0x118] sm:$0xff] %vm1414_vm2, %v2604_v9  ;;  %3010 = vst.msk [vmem:[%s6546_s10 + $0x80] sm:$0xff] %vm1414_vm2, %v2667_v22 }
 0x41b   : > { %3003 = vst.msk [vmem:[%s6546_s10 + $0x118] sm:$0xff] %vm2552_vm0, %v2604_v9  ;;  %3026 = vst.msk [vmem:[%s6546_s10 + $0x80] sm:$0xff] %vm2552_vm0, %v2667_v22 }
 0x41d   : > { %v2608_v37 = vpop.permute.xlu1 %2607  ;;  %v2671_v57 = vpop.permute.xlu0 %2670 }
 0x41e   : > { %2989 = vst.msk [vmem:[%s6546_s10 + $0x138] sm:$0xff] %vm1414_vm2, %v2608_v37  ;;  %3012 = vst.msk [vmem:[%s6546_s10 + $0xa0] sm:$0xff] %vm1414_vm2, %v2671_v57 }
 0x41f   : > { %3005 = vst.msk [vmem:[%s6546_s10 + $0x138] sm:$0xff] %vm2552_vm0, %v2608_v37  ;;  %3028 = vst.msk [vmem:[%s6546_s10 + $0xa0] sm:$0xff] %vm2552_vm0, %v2671_v57 }
 0x421   : > { %v2612_v44 = vpop.permute.xlu1 %2611  ;;  %v2675_v24 = vpop.permute.xlu0 %2674 }
 0x422   : > { %2991 = vst.msk [vmem:[%s6546_s10 + $0x158] sm:$0xff] %vm1414_vm2, %v2612_v44  ;;  %3014 = vst.msk [vmem:[%s6546_s10 + $0xc0] sm:$0xff] %vm1414_vm2, %v2675_v24 }
 0x423   : > { %3007 = vst.msk [vmem:[%s6546_s10 + $0x158] sm:$0xff] %vm2552_vm0, %v2612_v44  ;;  %3030 = vst.msk [vmem:[%s6546_s10 + $0xc0] sm:$0xff] %vm2552_vm0, %v2675_v24 }
 0x425   : > { %v2616_v53 = vpop.permute.xlu1 %2615  ;;  %v2679_v51 = vpop.permute.xlu0 %2678 }
 0x426   : > { %2993 = vst.msk [vmem:[%s6546_s10 + $0x178] sm:$0xff] %vm1414_vm2, %v2616_v53  ;;  %3016 = vst.msk [vmem:[%s6546_s10 + $0xe0] sm:$0xff] %vm1414_vm2, %v2679_v51 }
 0x427   : > { %3009 = vst.msk [vmem:[%s6546_s10 + $0x178] sm:$0xff] %vm2552_vm0, %v2616_v53  ;;  %3032 = vst.msk [vmem:[%s6546_s10 + $0xe0] sm:$0xff] %vm2552_vm0, %v2679_v51 }
 0x429   : > { %v2669_v30 = vpop.permute.xlu1 %2668  ;;  %v2683_v43 = vpop.permute.xlu0 %2682 }
 0x42a   : > { %3011 = vst.msk [vmem:[%s6546_s10 + $0x90] sm:$0xff] %vm1414_vm2, %v2669_v30  ;;  %3018 = vst.msk [vmem:[%s6546_s10 + $0x180] sm:$0xff] %vm1414_vm2, %v2683_v43 }
 0x42b   : > { %3027 = vst.msk [vmem:[%s6546_s10 + $0x90] sm:$0xff] %vm2552_vm0, %v2669_v30  ;;  %3034 = vst.msk [vmem:[%s6546_s10 + $0x180] sm:$0xff] %vm2552_vm0, %v2683_v43 }
 0x42d   : > { %v2673_v13 = vpop.permute.xlu1 %2672  ;;  %v2687_v3 = vpop.permute.xlu0 %2686 }
 0x42e   : > { %3013 = vst.msk [vmem:[%s6546_s10 + $0xb0] sm:$0xff] %vm1414_vm2, %v2673_v13  ;;  %3020 = vst.msk [vmem:[%s6546_s10 + $0x1a0] sm:$0xff] %vm1414_vm2, %v2687_v3 }
 0x42f   : > { %3029 = vst.msk [vmem:[%s6546_s10 + $0xb0] sm:$0xff] %vm2552_vm0, %v2673_v13  ;;  %3036 = vst.msk [vmem:[%s6546_s10 + $0x1a0] sm:$0xff] %vm2552_vm0, %v2687_v3 }
 0x431   : > { %v2677_v49 = vpop.permute.xlu1 %2676  ;;  %v2691_v16 = vpop.permute.xlu0 %2690 }
 0x432   : > { %3015 = vst.msk [vmem:[%s6546_s10 + $0xd0] sm:$0xff] %vm1414_vm2, %v2677_v49  ;;  %3022 = vst.msk [vmem:[%s6546_s10 + $0x1c0] sm:$0xff] %vm1414_vm2, %v2691_v16 }
 0x433   : > { %3031 = vst.msk [vmem:[%s6546_s10 + $0xd0] sm:$0xff] %vm2552_vm0, %v2677_v49  ;;  %3038 = vst.msk [vmem:[%s6546_s10 + $0x1c0] sm:$0xff] %vm2552_vm0, %v2691_v16 }
 0x435   : > { %v2681_v38 = vpop.permute.xlu1 %2680  ;;  %v2695_v20 = vpop.permute.xlu0 %2694 }
 0x436   : > { %3017 = vst.msk [vmem:[%s6546_s10 + $0xf0] sm:$0xff] %vm1414_vm2, %v2681_v38  ;;  %3024 = vst.msk [vmem:[%s6546_s10 + $0x1e0] sm:$0xff] %vm1414_vm2, %v2695_v20 }
 0x437   : > { %3033 = vst.msk [vmem:[%s6546_s10 + $0xf0] sm:$0xff] %vm2552_vm0, %v2681_v38  ;;  %3040 = vst.msk [vmem:[%s6546_s10 + $0x1e0] sm:$0xff] %vm2552_vm0, %v2695_v20 }
 0x439   : > { %v2685_v25 = vpop.permute.xlu1 %2684  ;;  %v2748_v11 = vpop.permute.xlu0 %2747 }
 0x43a   : > { %3019 = vst.msk [vmem:[%s6546_s10 + $0x190] sm:$0xff] %vm1414_vm2, %v2685_v25  ;;  %3042 = vst.msk [vmem:[%s6546_s10 + $0x88] sm:$0xff] %vm1414_vm2, %v2748_v11 }
 0x43b   : > { %3035 = vst.msk [vmem:[%s6546_s10 + $0x190] sm:$0xff] %vm2552_vm0, %v2685_v25  ;;  %3058 = vst.msk [vmem:[%s6546_s10 + $0x88] sm:$0xff] %vm2552_vm0, %v2748_v11 }
 0x43d   : > { %v2689_v8 = vpop.permute.xlu1 %2688  ;;  %v2752_v10 = vpop.permute.xlu0 %2751 }
 0x43e   : > { %3021 = vst.msk [vmem:[%s6546_s10 + $0x1b0] sm:$0xff] %vm1414_vm2, %v2689_v8  ;;  %3044 = vst.msk [vmem:[%s6546_s10 + $0xa8] sm:$0xff] %vm1414_vm2, %v2752_v10 }
 0x43f   : > { %3037 = vst.msk [vmem:[%s6546_s10 + $0x1b0] sm:$0xff] %vm2552_vm0, %v2689_v8  ;;  %3060 = vst.msk [vmem:[%s6546_s10 + $0xa8] sm:$0xff] %vm2552_vm0, %v2752_v10 }
 0x441   : > { %v2693_v4 = vpop.permute.xlu1 %2692  ;;  %v2756_v48 = vpop.permute.xlu0 %2755 }
 0x442   : > { %3023 = vst.msk [vmem:[%s6546_s10 + $0x1d0] sm:$0xff] %vm1414_vm2, %v2693_v4  ;;  %3046 = vst.msk [vmem:[%s6546_s10 + $0xc8] sm:$0xff] %vm1414_vm2, %v2756_v48 }
 0x443   : > { %3039 = vst.msk [vmem:[%s6546_s10 + $0x1d0] sm:$0xff] %vm2552_vm0, %v2693_v4  ;;  %3062 = vst.msk [vmem:[%s6546_s10 + $0xc8] sm:$0xff] %vm2552_vm0, %v2756_v48 }
 0x445   : > { %v2697_v60 = vpop.permute.xlu1 %2696  ;;  %v2760_v59 = vpop.permute.xlu0 %2759 }
 0x446   : > { %3025 = vst.msk [vmem:[%s6546_s10 + $0x1f0] sm:$0xff] %vm1414_vm2, %v2697_v60  ;;  %3048 = vst.msk [vmem:[%s6546_s10 + $0xe8] sm:$0xff] %vm1414_vm2, %v2760_v59 }
 0x447   : > { %3041 = vst.msk [vmem:[%s6546_s10 + $0x1f0] sm:$0xff] %vm2552_vm0, %v2697_v60  ;;  %3064 = vst.msk [vmem:[%s6546_s10 + $0xe8] sm:$0xff] %vm2552_vm0, %v2760_v59 }
 0x449   : > { %v2750_v27 = vpop.permute.xlu1 %2749  ;;  %v2764_v14 = vpop.permute.xlu0 %2763 }
 0x44a   : > { %3043 = vst.msk [vmem:[%s6546_s10 + $0x98] sm:$0xff] %vm1414_vm2, %v2750_v27  ;;  %3050 = vst.msk [vmem:[%s6546_s10 + $0x188] sm:$0xff] %vm1414_vm2, %v2764_v14 }
 0x44b   : > { %3059 = vst.msk [vmem:[%s6546_s10 + $0x98] sm:$0xff] %vm2552_vm0, %v2750_v27  ;;  %3066 = vst.msk [vmem:[%s6546_s10 + $0x188] sm:$0xff] %vm2552_vm0, %v2764_v14 }
 0x44d   : > { %v2754_v17 = vpop.permute.xlu1 %2753  ;;  %v2768_v0 = vpop.permute.xlu0 %2767 }
 0x44e   : > { %3045 = vst.msk [vmem:[%s6546_s10 + $0xb8] sm:$0xff] %vm1414_vm2, %v2754_v17  ;;  %3052 = vst.msk [vmem:[%s6546_s10 + $0x1a8] sm:$0xff] %vm1414_vm2, %v2768_v0 }
 0x44f   : > { %3061 = vst.msk [vmem:[%s6546_s10 + $0xb8] sm:$0xff] %vm2552_vm0, %v2754_v17  ;;  %3068 = vst.msk [vmem:[%s6546_s10 + $0x1a8] sm:$0xff] %vm2552_vm0, %v2768_v0 }
 0x451   : > { %v2758_v18 = vpop.permute.xlu1 %2757  ;;  %v2772_v39 = vpop.permute.xlu0 %2771 }
 0x452   : > { %3047 = vst.msk [vmem:[%s6546_s10 + $0xd8] sm:$0xff] %vm1414_vm2, %v2758_v18  ;;  %3054 = vst.msk [vmem:[%s6546_s10 + $0x1c8] sm:$0xff] %vm1414_vm2, %v2772_v39 }
 0x453   : > { %3063 = vst.msk [vmem:[%s6546_s10 + $0xd8] sm:$0xff] %vm2552_vm0, %v2758_v18  ;;  %3070 = vst.msk [vmem:[%s6546_s10 + $0x1c8] sm:$0xff] %vm2552_vm0, %v2772_v39 }
 0x455   : > { %v2762_v42 = vpop.permute.xlu1 %2761  ;;  %v2776_v26 = vpop.permute.xlu0 %2775 }
 0x456   : > { %3049 = vst.msk [vmem:[%s6546_s10 + $0xf8] sm:$0xff] %vm1414_vm2, %v2762_v42  ;;  %3056 = vst.msk [vmem:[%s6546_s10 + $0x1e8] sm:$0xff] %vm1414_vm2, %v2776_v26 }
 0x457   : > { %3065 = vst.msk [vmem:[%s6546_s10 + $0xf8] sm:$0xff] %vm2552_vm0, %v2762_v42  ;;  %3072 = vst.msk [vmem:[%s6546_s10 + $0x1e8] sm:$0xff] %vm2552_vm0, %v2776_v26 }
 0x459   : > { %v2766_v47 = vpop.permute.xlu1 %2765 }
 0x45a   : > { %3051 = vst.msk [vmem:[%s6546_s10 + $0x198] sm:$0xff] %vm1414_vm2, %v2766_v47 }
 0x45b   : > { %3067 = vst.msk [vmem:[%s6546_s10 + $0x198] sm:$0xff] %vm2552_vm0, %v2766_v47 }
 0x45d   : > { %v2770_v19 = vpop.permute.xlu1 %2769 }
 0x45e   : > { %3053 = vst.msk [vmem:[%s6546_s10 + $0x1b8] sm:$0xff] %vm1414_vm2, %v2770_v19 }
 0x45f   : > { %3069 = vst.msk [vmem:[%s6546_s10 + $0x1b8] sm:$0xff] %vm2552_vm0, %v2770_v19 }
 0x461   : > { %v2774_v50 = vpop.permute.xlu1 %2773 }
 0x462   : > { %3055 = vst.msk [vmem:[%s6546_s10 + $0x1d8] sm:$0xff] %vm1414_vm2, %v2774_v50 }
 0x463   : > { %3071 = vst.msk [vmem:[%s6546_s10 + $0x1d8] sm:$0xff] %vm2552_vm0, %v2774_v50 }
 0x465   : > { %v2778_v7 = vpop.permute.xlu1 %2777 }
 0x466   : > { %3057 = vst.msk [vmem:[%s6546_s10 + $0x1f8] sm:$0xff] %vm1414_vm2, %v2778_v7 }
 0x467   : > { %3073 = vst.msk [vmem:[%s6546_s10 + $0x1f8] sm:$0xff] %vm2552_vm0, %v2778_v7 }
 0x468   : > { %3880 = shalt.err (!%p3877_p9)
}
 0x469   : > { %s3881_s30 = scalar_lea.hbm %s6962_s18, 8192  ;;  %s3885_s14 = scalar_lea.hbm %s7029_s4, 32768 }
 0x46a   : > { %p3882_p10 = scmp.ne.s32.totalorder %s6962_s18, %s3881_s30  ;;  %p3886_p13 = scmp.lt.u32.totalorder %s6962_s18, %s7029_s4 }
 0x46b   : > { %p3887_p0 = scmp.lt.u32.totalorder %s3885_s14, %s3881_s30  ;;  %p3889_p2 = scmp.lt.u32.totalorder %s3881_s30, %s6962_s18 }
 0x46c   : > { %p3883_p11 = pnand %p3882_p10, %p4058_p3 }
 0x46d   : > { %p3888_p1 = por %p3887_p0, %p3886_p13 }
 0x46e   : > { %p3884_p12 = pneg %p3883_p11 }
 0x46f   : > { %p3890_p4 = por %p3889_p2, %p3888_p1 }
 0x471   : > { %p3891_p5 = pnand %p3890_p4, %p3884_p12 }
 0x473   : > { %3894 = shalt.err (!%p3891_p5)
}
 0x474   : > { %s3981_s24 = smov 128   ;;  %s7439_s6 = smov 8  }
 0x475   : > { %3154 = dma.vmem_to_hbm [thread:$0]  (%p4058_p3), %s6964_s27, 8192, %s6962_s18, %s6972_s19, %s3981_s24, %s3981_s24, %s7439_s6  }
 0x476 PF: > { %p3160_p6 = scmp.ge.s32.totalorder %s3961_s22, 2  ;;  %s2860_s8 = sand.u32 1, %s3933_s15  }
 0x477   : > { %s2861_s9 = scalar_lea.sflag [#allocation3], %s2860_s8 }
 0x478   : > { %p3157_p7 = pnand %p3160_p6, %p4067_p8 }
 0x47a   : > { %3928 = dma.done.wait (!%p3157_p7), %s2861_s9, 8192  }
 0x47b   : > { %3930 = vsyncadd (!%p3157_p7), %s2861_s9, 4294959104  ;;  %s17_s22 = sadd.s32 1, %s3961_s22   ;;  %s7440_s15 = smov %s3937_s16 }
 0x47c   : > { %p14_p9 = scmp.ge.s32.totalorder %s17_s22, 6   ;;  %s7441_s16 = smov %s3941_s17 }
 0x47d   : > { %s7442_s17 = smov %s4076_s7  ;;  %s7443_s18 = smov %s3953_s20 }
 0x47e   : > { %s7444_s19 = smov %s3957_s21  ;;  %s7445_s20 = smov %s7448_s25 }
 0x47f   : > { %s7446_s21 = smov %s7452_s26  ;;  %16 = sbr.rel (!%p14_p9) target bundleno = 5 (0x5), region = 77 }
 0x486   :  { %2866 = vsyncpa [#allocation3], 1 }
 0x487   :  { %2868 = vsyncpa [#allocation3 + $0x1], 1 }

</bundles_post_ra>
